<compile_context>
chip_gen: v6e
topology: v6e:2x2x1
jax: 0.10.0
libtpu: 0.0.40
codegen_flags: <defaults>
</compile_context>

<pallas_src>
import math
from functools import partial

import jax
import jax.numpy as jnp
from jax.experimental import pallas as pl
from jax.experimental.pallas import tpu as pltpu


# ---------------------------------------------------------------------------
# In-kernel helpers
# ---------------------------------------------------------------------------
def _layernorm(x, g, b, eps=1e-5):
    mu = jnp.mean(x, axis=-1, keepdims=True)
    var = jnp.mean((x - mu) ** 2, axis=-1, keepdims=True)
    return (x - mu) * jax.lax.rsqrt(var + eps) * g + b


# ---------------------------------------------------------------------------
# Fused encoder stack kernel: grid=(B,), each grid step runs ALL layers on one
# (S, E) activation slab kept in VMEM/vregs the whole time.
# ---------------------------------------------------------------------------
def _encoder_stack_kernel(nhead, num_layers, apply_final_norm,
                          x_ref, wqkv_ref, bqkv_ref, wo_ref,
                          w1_ref, b1_ref, w2_ref, vec_ref, out_ref):
    S, E = x_ref.shape
    dh = E // nhead

    def layer_body(_, x):
        xb = x.astype(jnp.bfloat16)

        # --- fused QKV projection: one wide lane-dense (S, 3E) MXU matmul ---
        # (1/sqrt(dh) is pre-folded into the Q columns/bias on the host.)
        qkv = jnp.dot(xb, wqkv_ref[...],
                      preferred_element_type=jnp.float32) + bqkv_ref[...]   # (S, 3E) f32

        # --- per-head attention on 2-D tiles ---
        # No head stacking, no (H,S,dh)/(H,S,E) 3-D intermediates: each head is
        # a static lane slice, batched dot_generals would lower to the same
        # per-head MXU matmuls anyway.
        # TODO(synk): src_mask / key_padding_mask not applied (mask=None only).
        heads = []
        for h in range(nhead):
            q = qkv[:, h * dh:(h + 1) * dh].astype(jnp.bfloat16)            # (S, dh)
            k = qkv[:, E + h * dh:E + (h + 1) * dh].astype(jnp.bfloat16)    # (S, dh)
            v = qkv[:, 2 * E + h * dh:2 * E + (h + 1) * dh].astype(jnp.bfloat16)
            s = jnp.einsum("qd,kd->qk", q, k,
                           preferred_element_type=jnp.float32)              # (S, S)
            s = s - jnp.max(s, axis=-1, keepdims=True)
            p = jnp.exp(s)
            p = p * pl.reciprocal(jnp.sum(p, axis=-1, keepdims=True), approx=True)
            heads.append(jnp.dot(p.astype(jnp.bfloat16), v,
                                 preferred_element_type=jnp.float32))       # (S, dh)

        # Merge heads back to (S, E) once; ONE (S,E)@(E,E) output projection
        # (K = E contraction on the MXU instead of H small K = dh matmuls).
        o = jnp.concatenate(heads, axis=-1).astype(jnp.bfloat16)            # (S, E)

        vec = vec_ref[...]                                                  # (8, E) f32
        bo, b2 = vec[0:1], vec[1:2]
        g1, be1 = vec[2:3], vec[3:4]
        g2, be2 = vec[4:5], vec[5:6]

        attn = jnp.dot(o, wo_ref[...], preferred_element_type=jnp.float32) + bo

        # --- residual + LayerNorm 1 (post-norm) ---
        y = _layernorm(x + attn, g1, be1)

        # --- feed-forward (ReLU) ---
        h1 = jnp.dot(y.astype(jnp.bfloat16), w1_ref[...],
                     preferred_element_type=jnp.float32) + b1_ref[...]
        h1 = jnp.maximum(h1, 0.0)
        ff = jnp.dot(h1.astype(jnp.bfloat16), w2_ref[...],
                     preferred_element_type=jnp.float32) + b2

        # --- residual + LayerNorm 2 ---
        return _layernorm(y + ff, g2, be2)

    x = x_ref[...]
    # Only unroll very shallow stacks: each iteration is an entire transformer
    # layer, so rolled-loop overhead is noise but full unroll multiplies the
    # instruction footprint / vreg live ranges.
    x = jax.lax.fori_loop(0, num_layers, layer_body, x,
                          unroll=(num_layers <= 2))
    if apply_final_norm:
        vec = vec_ref[...]
        x = _layernorm(x, vec[6:7], vec[7:8])
    out_ref[...] = x


# ---------------------------------------------------------------------------
# Generation-aware VMEM budget
# ---------------------------------------------------------------------------
def _vmem_limit_bytes():
    # ~85% of physical VMEM (headroom for Mosaic internal scratch / buffers),
    # capped at 110 MiB:  ~54 MiB on v7x (64 MiB/TC), ~108 MiB on v5e/v6e.
    phys = 128 * 1024 * 1024
    try:
        phys = int(pltpu.get_tpu_info().vmem_capacity_bytes)
    except Exception:
        pass
    return min(int(phys * 0.85), 110 * 1024 * 1024)


# ---------------------------------------------------------------------------
# TransformerEncoder.forward equivalent (single pallas_call for the full stack)
# ---------------------------------------------------------------------------
def transformer_encoder(src, layer_params, num_layers, nhead, final_norm=None, mask=None):
    # clones(): all layers share the SAME parameters -> single param set reused.
    assert mask is None, "src_mask is not supported by this kernel (mask=None only)"
    B, S, E = src.shape
    p = layer_params
    Fff = p["w1"].shape[1]
    assert E % nhead == 0
    dh = E // nhead
    scale = 1.0 / math.sqrt(dh)

    # Fold attention scale into the Q projection; fuse QKV; bf16 MXU operands.
    wqkv = jnp.concatenate([p["wq"] * scale, p["wk"], p["wv"]],
                           axis=1).astype(jnp.bfloat16)                           # (E, 3E)
    bqkv = jnp.concatenate([p["bq"] * scale, p["bk"], p["bv"]], axis=1)           # (1, 3E)
    wo = p["wo"].astype(jnp.bfloat16)                                             # (E, E)
    w1 = p["w1"].astype(jnp.bfloat16)                                             # (E, F)
    w2 = p["w2"].astype(jnp.bfloat16)                                             # (F, E)
    b1 = p["b1"]                                                                  # (1, F)

    if final_norm is not None:
        gf, bf = final_norm["g"], final_norm["b"]
    else:
        gf = jnp.ones((1, E), jnp.float32)
        bf = jnp.zeros((1, E), jnp.float32)
    # Pack the eight (1, E) vectors into one (8, E) tile: one DMA, one operand.
    vec = jnp.concatenate([p["bo"], p["b2"], p["g1"], p["be1"],
                           p["g2"], p["be2"], gf, bf], axis=0)                    # (8, E)

    kernel = partial(_encoder_stack_kernel, nhead, num_layers, final_norm is not None)

    def build(weight_pipeline_mode):
        def wspec(shape):
            kwargs = {}
            if weight_pipeline_mode is not None:
                kwargs["pipeline_mode"] = weight_pipeline_mode
            return pl.BlockSpec(shape, lambda b: (0, 0), **kwargs)

        return pl.pallas_call(
            kernel,
            out_shape=jax.ShapeDtypeStruct((B, S, E), jnp.float32),
            grid=(B,),
            in_specs=[
                pl.BlockSpec((None, S, E), lambda b: (b, 0, 0)),   # activations (squeezed batch)
                wspec((E, 3 * E)),                                 # wqkv (bf16, scale folded)
                wspec((1, 3 * E)),                                 # bqkv
                wspec((E, E)),                                     # wo (bf16)
                wspec((E, Fff)),                                   # w1 (bf16)
                wspec((1, Fff)),                                   # b1
                wspec((Fff, E)),                                   # w2 (bf16)
                wspec((8, E)),                                     # packed bias/gamma/beta
            ],
            out_specs=pl.BlockSpec((None, S, E), lambda b: (b, 0, 0)),
            compiler_params=pltpu.CompilerParams(
                dimension_semantics=("parallel",),                 # shards batch over v7x's 2 TCs
                vmem_limit_bytes=_vmem_limit_bytes(),
            ),
        )

    args = (src, wqkv, bqkv, wo, w1, b1, w2, vec)
    try:
        # Weights have a constant index_map across the batch grid -> single
        # buffer them (no pointless double-buffering of the weight footprint).
        return build(pl.Buffered(1))(*args)
    except Exception:
        # TODO(synk): this jax version rejected per-BlockSpec pipeline_mode;
        # fall back to default double-buffered weights.
        return build(None)(*args)
    # TODO(synk): for production S/E/dim_ff, add a query-block grid axis with
    # online softmax and tile dim_ff so neither the (S,S) scores nor the (S,F)
    # FFN intermediate is fully resident (mandatory for v7x's 64 MiB VMEM).


# ---------------------------------------------------------------------------
# Deterministic parameter init (shapes of a standard encoder layer)
# ---------------------------------------------------------------------------
def init_layer_params(key, d_model, dim_ff):
    ks = jax.random.split(key, 12)

    def lin(kw, kb, din, dout):
        w = jax.random.normal(kw, (din, dout), jnp.float32) * 0.05
        b = jax.random.normal(kb, (1, dout), jnp.float32) * 0.01
        return w, b

    wq, bq = lin(ks[0], ks[1], d_model, d_model)
    wk, bk = lin(ks[2], ks[3], d_model, d_model)
    wv, bv = lin(ks[4], ks[5], d_model, d_model)
    wo, bo = lin(ks[6], ks[7], d_model, d_model)
    w1, b1 = lin(ks[8], ks[9], d_model, dim_ff)
    w2, b2 = lin(ks[10], ks[11], dim_ff, d_model)
    return {
        "wq": wq, "bq": bq, "wk": wk, "bk": bk, "wv": wv, "bv": bv,
        "wo": wo, "bo": bo, "w1": w1, "b1": b1, "w2": w2, "b2": b2,
        "g1": jnp.ones((1, d_model), jnp.float32),
        "be1": jnp.zeros((1, d_model), jnp.float32),
        "g2": jnp.ones((1, d_model), jnp.float32),
        "be2": jnp.zeros((1, d_model), jnp.float32),
    }


# ---------------------------------------------------------------------------
# Pure-JAX f32 reference (mirrors PyTorch post-LN TransformerEncoderLayer, eval)
# ---------------------------------------------------------------------------
def _ref_layernorm(x, g, b, eps=1e-5):
    mu = jnp.mean(x, axis=-1, keepdims=True)
    var = jnp.mean((x - mu) ** 2, axis=-1, keepdims=True)
    return (x - mu) / jnp.sqrt(var + eps) * g + b


def ref_encoder_layer(x, p, nhead):
    B, S, E = x.shape
    dh = E // nhead
    q = (x @ p["wq"] + p["bq"]).reshape(B, S, nhead, dh)
    k = (x @ p["wk"] + p["bk"]).reshape(B, S, nhead, dh)
    v = (x @ p["wv"] + p["bv"]).reshape(B, S, nhead, dh)
    s = jnp.einsum("bqhd,bkhd->bhqk", q, k) / math.sqrt(dh)
    a = jax.nn.softmax(s, axis=-1)
    o = jnp.einsum("bhqk,bkhd->bqhd", a, v).reshape(B, S, E)
    attn = o @ p["wo"] + p["bo"]
    y = _ref_layernorm(x + attn, p["g1"], p["be1"])
    ff = jnp.maximum(y @ p["w1"] + p["b1"], 0.0) @ p["w2"] + p["b2"]
    return _ref_layernorm(y + ff, p["g2"], p["be2"])


def ref_transformer_encoder(src, p, num_layers, nhead, final_norm=None):
    out = src
    for _ in range(num_layers):
        out = ref_encoder_layer(out, p, nhead)
    if final_norm is not None:
        out = _ref_layernorm(out, final_norm["g"], final_norm["b"])
    return out


# ---------------------------------------------------------------------------
if __name__ == "__main__":
    B, S, d_model, nhead, dim_ff, num_layers = 2, 8, 32, 4, 64, 2

    key = jax.random.PRNGKey(0)
    k_x, k_p = jax.random.split(key)
    x = jax.random.normal(k_x, (B, S, d_model), jnp.float32)

    layer_params = init_layer_params(k_p, d_model, dim_ff)
    final_norm = {"g": jnp.ones((1, d_model), jnp.float32),
                  "b": jnp.zeros((1, d_model), jnp.float32)}

    out = transformer_encoder(x, layer_params, num_layers, nhead,
                              final_norm=final_norm, mask=None)
    out = jax.block_until_ready(out)

    ref = ref_transformer_encoder(x, layer_params, num_layers, nhead, final_norm=final_norm)
    assert out.shape == (B, S, d_model)
    # bf16 MXU operands with f32 accumulation -> loosened tolerance vs f32 reference.
    assert jnp.allclose(out, ref, rtol=5e-2, atol=5e-2), "mismatch vs JAX reference"

    print("KERNEL_OK")
</pallas_src>

<mosaic_0001>
module attributes {stable_mosaic.version = 11 : i64} {
  func.func @_encoder_stack_kernel(%arg0: i32, %arg1: memref<1x8x32xf32, #tpu.memory_space<vmem>>, %arg2: memref<32x96xbf16, #tpu.memory_space<vmem>>, %arg3: memref<1x96xf32, #tpu.memory_space<vmem>>, %arg4: memref<32x32xbf16, #tpu.memory_space<vmem>>, %arg5: memref<32x64xbf16, #tpu.memory_space<vmem>>, %arg6: memref<1x64xf32, #tpu.memory_space<vmem>>, %arg7: memref<64x32xbf16, #tpu.memory_space<vmem>>, %arg8: memref<8x32xf32, #tpu.memory_space<vmem>>, %arg9: memref<1x8x32xf32, #tpu.memory_space<vmem>>) attributes {dimension_semantics = [#tpu.dimension_semantics<parallel>], iteration_bounds = array<i64: 2>, scalar_prefetch = 0 : i64, scratch_operands = 0 : i64, tpu.core_type = #tpu.core_type<tc>, window_params = [{transform_indices = @transform_0, window_bounds = array<i64: 1, 8, 32>}, {pipeline_mode = #tpu.pipeline_mode<synchronous>, transform_indices = @transform_1, window_bounds = array<i64: 32, 96>}, {pipeline_mode = #tpu.pipeline_mode<synchronous>, transform_indices = @transform_2, window_bounds = array<i64: 1, 96>}, {pipeline_mode = #tpu.pipeline_mode<synchronous>, transform_indices = @transform_3, window_bounds = array<i64: 32, 32>}, {pipeline_mode = #tpu.pipeline_mode<synchronous>, transform_indices = @transform_4, window_bounds = array<i64: 32, 64>}, {pipeline_mode = #tpu.pipeline_mode<synchronous>, transform_indices = @transform_5, window_bounds = array<i64: 1, 64>}, {pipeline_mode = #tpu.pipeline_mode<synchronous>, transform_indices = @transform_6, window_bounds = array<i64: 64, 32>}, {pipeline_mode = #tpu.pipeline_mode<synchronous>, transform_indices = @transform_7, window_bounds = array<i64: 8, 32>}, {transform_indices = @transform_8, window_bounds = array<i64: 1, 8, 32>}]} {
    %c0 = arith.constant 0 : index
    %c0_0 = arith.constant 0 : index
    %c0_1 = arith.constant 0 : index
    %0 = vector.load %arg1[%c0, %c0_0, %c0_1] : memref<1x8x32xf32, #tpu.memory_space<vmem>>, vector<1x8x32xf32>
    %1 = vector.shape_cast %0 : vector<1x8x32xf32> to vector<8x32xf32>
    %c0_i32 = arith.constant 0 : i32
    %2 = arith.truncf %1 : vector<8x32xf32> to vector<8x32xbf16>
    %c0_2 = arith.constant 0 : index
    %c0_3 = arith.constant 0 : index
    %3 = vector.load %arg2[%c0_2, %c0_3] : memref<32x96xbf16, #tpu.memory_space<vmem>>, vector<32x96xbf16>
    %cst = arith.constant dense<0.000000e+00> : vector<8x96xf32>
    %4 = tpu.matmul %2, %3, %cst {dimension_numbers = #tpu.dot_dimension_numbers<[1], [0], [0], [1], [0, 0, 1, 1], [], []>} : vector<8x32xbf16>, vector<32x96xbf16>, vector<8x96xf32> -> vector<8x96xf32>
    %c0_4 = arith.constant 0 : index
    %c0_5 = arith.constant 0 : index
    %5 = vector.load %arg3[%c0_4, %c0_5] : memref<1x96xf32, #tpu.memory_space<vmem>>, vector<1x96xf32>
    %6 = vector.broadcast %5 : vector<1x96xf32> to vector<8x96xf32>
    %7 = arith.addf %4, %6 : vector<8x96xf32>
    %8 = vector.extract_strided_slice %7 {offsets = [0, 0], sizes = [8, 8], strides = [1, 1]} : vector<8x96xf32> to vector<8x8xf32>
    %9 = arith.truncf %8 : vector<8x8xf32> to vector<8x8xbf16>
    %10 = vector.extract_strided_slice %7 {offsets = [0, 32], sizes = [8, 8], strides = [1, 1]} : vector<8x96xf32> to vector<8x8xf32>
    %11 = arith.truncf %10 : vector<8x8xf32> to vector<8x8xbf16>
    %12 = vector.extract_strided_slice %7 {offsets = [0, 64], sizes = [8, 8], strides = [1, 1]} : vector<8x96xf32> to vector<8x8xf32>
    %13 = arith.truncf %12 : vector<8x8xf32> to vector<8x8xbf16>
    "tpu.trace_start"() <{level = 10 : i32, message = "qd,kd->qk"}> : () -> ()
    %cst_6 = arith.constant dense<0.000000e+00> : vector<8x8xf32>
    %14 = tpu.matmul %9, %11, %cst_6 {dimension_numbers = #tpu.dot_dimension_numbers<[1], [1], [0], [0], [0, 0, 1, 0], [], []>} : vector<8x8xbf16>, vector<8x8xbf16>, vector<8x8xf32> -> vector<8x8xf32>
    "tpu.trace_stop"() : () -> ()
    %cst_7 = arith.constant dense<0xFF800000> : vector<8xf32>
    %15 = vector.multi_reduction <maximumf>, %14, %cst_7 [1] : vector<8x8xf32> to vector<8xf32>
    %16 = vector.shape_cast %15 : vector<8xf32> to vector<8x1xf32>
    %17 = vector.broadcast %16 : vector<8x1xf32> to vector<8x8xf32>
    %18 = arith.subf %14, %17 : vector<8x8xf32>
    %19 = math.exp %18 : vector<8x8xf32>
    %cst_8 = arith.constant dense<0.000000e+00> : vector<8xf32>
    %20 = vector.multi_reduction <add>, %19, %cst_8 [1] : vector<8x8xf32> to vector<8xf32>
    %21 = vector.shape_cast %20 : vector<8xf32> to vector<8x1xf32>
    %22 = tpu.reciprocal %21 {approx = true} : vector<8x1xf32> -> vector<8x1xf32>
    %23 = vector.broadcast %22 : vector<8x1xf32> to vector<8x8xf32>
    %24 = arith.mulf %19, %23 : vector<8x8xf32>
    %25 = arith.truncf %24 : vector<8x8xf32> to vector<8x8xbf16>
    %cst_9 = arith.constant dense<0.000000e+00> : vector<8x8xf32>
    %26 = tpu.matmul %25, %13, %cst_9 {dimension_numbers = #tpu.dot_dimension_numbers<[1], [0], [0], [1], [0, 0, 1, 1], [], []>} : vector<8x8xbf16>, vector<8x8xbf16>, vector<8x8xf32> -> vector<8x8xf32>
    %27 = vector.extract_strided_slice %7 {offsets = [0, 8], sizes = [8, 8], strides = [1, 1]} : vector<8x96xf32> to vector<8x8xf32>
    %28 = arith.truncf %27 : vector<8x8xf32> to vector<8x8xbf16>
    %29 = vector.extract_strided_slice %7 {offsets = [0, 40], sizes = [8, 8], strides = [1, 1]} : vector<8x96xf32> to vector<8x8xf32>
    %30 = arith.truncf %29 : vector<8x8xf32> to vector<8x8xbf16>
    %31 = vector.extract_strided_slice %7 {offsets = [0, 72], sizes = [8, 8], strides = [1, 1]} : vector<8x96xf32> to vector<8x8xf32>
    %32 = arith.truncf %31 : vector<8x8xf32> to vector<8x8xbf16>
    "tpu.trace_start"() <{level = 10 : i32, message = "qd,kd->qk"}> : () -> ()
    %cst_10 = arith.constant dense<0.000000e+00> : vector<8x8xf32>
    %33 = tpu.matmul %28, %30, %cst_10 {dimension_numbers = #tpu.dot_dimension_numbers<[1], [1], [0], [0], [0, 0, 1, 0], [], []>} : vector<8x8xbf16>, vector<8x8xbf16>, vector<8x8xf32> -> vector<8x8xf32>
    "tpu.trace_stop"() : () -> ()
    %cst_11 = arith.constant dense<0xFF800000> : vector<8xf32>
    %34 = vector.multi_reduction <maximumf>, %33, %cst_11 [1] : vector<8x8xf32> to vector<8xf32>
    %35 = vector.shape_cast %34 : vector<8xf32> to vector<8x1xf32>
    %36 = vector.broadcast %35 : vector<8x1xf32> to vector<8x8xf32>
    %37 = arith.subf %33, %36 : vector<8x8xf32>
    %38 = math.exp %37 : vector<8x8xf32>
    %cst_12 = arith.constant dense<0.000000e+00> : vector<8xf32>
    %39 = vector.multi_reduction <add>, %38, %cst_12 [1] : vector<8x8xf32> to vector<8xf32>
    %40 = vector.shape_cast %39 : vector<8xf32> to vector<8x1xf32>
    %41 = tpu.reciprocal %40 {approx = true} : vector<8x1xf32> -> vector<8x1xf32>
    %42 = vector.broadcast %41 : vector<8x1xf32> to vector<8x8xf32>
    %43 = arith.mulf %38, %42 : vector<8x8xf32>
    %44 = arith.truncf %43 : vector<8x8xf32> to vector<8x8xbf16>
    %cst_13 = arith.constant dense<0.000000e+00> : vector<8x8xf32>
    %45 = tpu.matmul %44, %32, %cst_13 {dimension_numbers = #tpu.dot_dimension_numbers<[1], [0], [0], [1], [0, 0, 1, 1], [], []>} : vector<8x8xbf16>, vector<8x8xbf16>, vector<8x8xf32> -> vector<8x8xf32>
    %46 = vector.extract_strided_slice %7 {offsets = [0, 16], sizes = [8, 8], strides = [1, 1]} : vector<8x96xf32> to vector<8x8xf32>
    %47 = arith.truncf %46 : vector<8x8xf32> to vector<8x8xbf16>
    %48 = vector.extract_strided_slice %7 {offsets = [0, 48], sizes = [8, 8], strides = [1, 1]} : vector<8x96xf32> to vector<8x8xf32>
    %49 = arith.truncf %48 : vector<8x8xf32> to vector<8x8xbf16>
    %50 = vector.extract_strided_slice %7 {offsets = [0, 80], sizes = [8, 8], strides = [1, 1]} : vector<8x96xf32> to vector<8x8xf32>
    %51 = arith.truncf %50 : vector<8x8xf32> to vector<8x8xbf16>
    "tpu.trace_start"() <{level = 10 : i32, message = "qd,kd->qk"}> : () -> ()
    %cst_14 = arith.constant dense<0.000000e+00> : vector<8x8xf32>
    %52 = tpu.matmul %47, %49, %cst_14 {dimension_numbers = #tpu.dot_dimension_numbers<[1], [1], [0], [0], [0, 0, 1, 0], [], []>} : vector<8x8xbf16>, vector<8x8xbf16>, vector<8x8xf32> -> vector<8x8xf32>
    "tpu.trace_stop"() : () -> ()
    %cst_15 = arith.constant dense<0xFF800000> : vector<8xf32>
    %53 = vector.multi_reduction <maximumf>, %52, %cst_15 [1] : vector<8x8xf32> to vector<8xf32>
    %54 = vector.shape_cast %53 : vector<8xf32> to vector<8x1xf32>
    %55 = vector.broadcast %54 : vector<8x1xf32> to vector<8x8xf32>
    %56 = arith.subf %52, %55 : vector<8x8xf32>
    %57 = math.exp %56 : vector<8x8xf32>
    %cst_16 = arith.constant dense<0.000000e+00> : vector<8xf32>
    %58 = vector.multi_reduction <add>, %57, %cst_16 [1] : vector<8x8xf32> to vector<8xf32>
    %59 = vector.shape_cast %58 : vector<8xf32> to vector<8x1xf32>
    %60 = tpu.reciprocal %59 {approx = true} : vector<8x1xf32> -> vector<8x1xf32>
    %61 = vector.broadcast %60 : vector<8x1xf32> to vector<8x8xf32>
    %62 = arith.mulf %57, %61 : vector<8x8xf32>
    %63 = arith.truncf %62 : vector<8x8xf32> to vector<8x8xbf16>
    %cst_17 = arith.constant dense<0.000000e+00> : vector<8x8xf32>
    %64 = tpu.matmul %63, %51, %cst_17 {dimension_numbers = #tpu.dot_dimension_numbers<[1], [0], [0], [1], [0, 0, 1, 1], [], []>} : vector<8x8xbf16>, vector<8x8xbf16>, vector<8x8xf32> -> vector<8x8xf32>
    %65 = vector.extract_strided_slice %7 {offsets = [0, 24], sizes = [8, 8], strides = [1, 1]} : vector<8x96xf32> to vector<8x8xf32>
    %66 = arith.truncf %65 : vector<8x8xf32> to vector<8x8xbf16>
    %67 = vector.extract_strided_slice %7 {offsets = [0, 56], sizes = [8, 8], strides = [1, 1]} : vector<8x96xf32> to vector<8x8xf32>
    %68 = arith.truncf %67 : vector<8x8xf32> to vector<8x8xbf16>
    %69 = vector.extract_strided_slice %7 {offsets = [0, 88], sizes = [8, 8], strides = [1, 1]} : vector<8x96xf32> to vector<8x8xf32>
    %70 = arith.truncf %69 : vector<8x8xf32> to vector<8x8xbf16>
    "tpu.trace_start"() <{level = 10 : i32, message = "qd,kd->qk"}> : () -> ()
    %cst_18 = arith.constant dense<0.000000e+00> : vector<8x8xf32>
    %71 = tpu.matmul %66, %68, %cst_18 {dimension_numbers = #tpu.dot_dimension_numbers<[1], [1], [0], [0], [0, 0, 1, 0], [], []>} : vector<8x8xbf16>, vector<8x8xbf16>, vector<8x8xf32> -> vector<8x8xf32>
    "tpu.trace_stop"() : () -> ()
    %cst_19 = arith.constant dense<0xFF800000> : vector<8xf32>
    %72 = vector.multi_reduction <maximumf>, %71, %cst_19 [1] : vector<8x8xf32> to vector<8xf32>
    %73 = vector.shape_cast %72 : vector<8xf32> to vector<8x1xf32>
    %74 = vector.broadcast %73 : vector<8x1xf32> to vector<8x8xf32>
    %75 = arith.subf %71, %74 : vector<8x8xf32>
    %76 = math.exp %75 : vector<8x8xf32>
    %cst_20 = arith.constant dense<0.000000e+00> : vector<8xf32>
    %77 = vector.multi_reduction <add>, %76, %cst_20 [1] : vector<8x8xf32> to vector<8xf32>
    %78 = vector.shape_cast %77 : vector<8xf32> to vector<8x1xf32>
    %79 = tpu.reciprocal %78 {approx = true} : vector<8x1xf32> -> vector<8x1xf32>
    %80 = vector.broadcast %79 : vector<8x1xf32> to vector<8x8xf32>
    %81 = arith.mulf %76, %80 : vector<8x8xf32>
    %82 = arith.truncf %81 : vector<8x8xf32> to vector<8x8xbf16>
    %cst_21 = arith.constant dense<0.000000e+00> : vector<8x8xf32>
    %83 = tpu.matmul %82, %70, %cst_21 {dimension_numbers = #tpu.dot_dimension_numbers<[1], [0], [0], [1], [0, 0, 1, 1], [], []>} : vector<8x8xbf16>, vector<8x8xbf16>, vector<8x8xf32> -> vector<8x8xf32>
    %84 = tpu.concatenate %26, %45, %64, %83 in 1 : vector<8x8xf32>, vector<8x8xf32>, vector<8x8xf32>, vector<8x8xf32> -> vector<8x32xf32>
    %85 = arith.truncf %84 : vector<8x32xf32> to vector<8x32xbf16>
    %c0_22 = arith.constant 0 : index
    %c0_23 = arith.constant 0 : index
    %86 = vector.load %arg8[%c0_22, %c0_23] : memref<8x32xf32, #tpu.memory_space<vmem>>, vector<8x32xf32>
    %87 = vector.extract_strided_slice %86 {offsets = [0, 0], sizes = [1, 32], strides = [1, 1]} : vector<8x32xf32> to vector<1x32xf32>
    %88 = vector.extract_strided_slice %86 {offsets = [1, 0], sizes = [1, 32], strides = [1, 1]} : vector<8x32xf32> to vector<1x32xf32>
    %89 = vector.extract_strided_slice %86 {offsets = [2, 0], sizes = [1, 32], strides = [1, 1]} : vector<8x32xf32> to vector<1x32xf32>
    %90 = vector.extract_strided_slice %86 {offsets = [3, 0], sizes = [1, 32], strides = [1, 1]} : vector<8x32xf32> to vector<1x32xf32>
    %91 = vector.extract_strided_slice %86 {offsets = [4, 0], sizes = [1, 32], strides = [1, 1]} : vector<8x32xf32> to vector<1x32xf32>
    %92 = vector.extract_strided_slice %86 {offsets = [5, 0], sizes = [1, 32], strides = [1, 1]} : vector<8x32xf32> to vector<1x32xf32>
    %c0_24 = arith.constant 0 : index
    %c0_25 = arith.constant 0 : index
    %93 = vector.load %arg4[%c0_24, %c0_25] : memref<32x32xbf16, #tpu.memory_space<vmem>>, vector<32x32xbf16>
    %cst_26 = arith.constant dense<0.000000e+00> : vector<8x32xf32>
    %94 = tpu.matmul %85, %93, %cst_26 {dimension_numbers = #tpu.dot_dimension_numbers<[1], [0], [0], [1], [0, 0, 1, 1], [], []>} : vector<8x32xbf16>, vector<32x32xbf16>, vector<8x32xf32> -> vector<8x32xf32>
    %95 = vector.broadcast %87 : vector<1x32xf32> to vector<8x32xf32>
    %96 = arith.addf %94, %95 : vector<8x32xf32>
    %97 = arith.addf %1, %96 : vector<8x32xf32>
    %cst_27 = arith.constant dense<0.000000e+00> : vector<8xf32>
    %98 = vector.multi_reduction <add>, %97, %cst_27 [1] : vector<8x32xf32> to vector<8xf32>
    %99 = vector.shape_cast %98 : vector<8xf32> to vector<8x1xf32>
    %cst_28 = arith.constant 3.200000e+01 : f32
    %100 = vector.broadcast %cst_28 : f32 to vector<8x1xf32>
    %101 = arith.divf %99, %100 : vector<8x1xf32>
    %102 = vector.broadcast %101 : vector<8x1xf32> to vector<8x32xf32>
    %103 = arith.subf %97, %102 : vector<8x32xf32>
    %104 = arith.mulf %103, %103 : vector<8x32xf32>
    %cst_29 = arith.constant dense<0.000000e+00> : vector<8xf32>
    %105 = vector.multi_reduction <add>, %104, %cst_29 [1] : vector<8x32xf32> to vector<8xf32>
    %106 = vector.shape_cast %105 : vector<8xf32> to vector<8x1xf32>
    %cst_30 = arith.constant 3.200000e+01 : f32
    %107 = vector.broadcast %cst_30 : f32 to vector<8x1xf32>
    %108 = arith.divf %106, %107 : vector<8x1xf32>
    %109 = vector.broadcast %101 : vector<8x1xf32> to vector<8x32xf32>
    %110 = arith.subf %97, %109 : vector<8x32xf32>
    %cst_31 = arith.constant 9.99999974E-6 : f32
    %111 = vector.broadcast %cst_31 : f32 to vector<8x1xf32>
    %112 = arith.addf %108, %111 : vector<8x1xf32>
    %113 = math.rsqrt %112 : vector<8x1xf32>
    %114 = vector.broadcast %113 : vector<8x1xf32> to vector<8x32xf32>
    %115 = arith.mulf %110, %114 : vector<8x32xf32>
    %116 = vector.broadcast %89 : vector<1x32xf32> to vector<8x32xf32>
    %117 = arith.mulf %115, %116 : vector<8x32xf32>
    %118 = vector.broadcast %90 : vector<1x32xf32> to vector<8x32xf32>
    %119 = arith.addf %117, %118 : vector<8x32xf32>
    %120 = arith.truncf %119 : vector<8x32xf32> to vector<8x32xbf16>
    %c0_32 = arith.constant 0 : index
    %c0_33 = arith.constant 0 : index
    %121 = vector.load %arg5[%c0_32, %c0_33] : memref<32x64xbf16, #tpu.memory_space<vmem>>, vector<32x64xbf16>
    %cst_34 = arith.constant dense<0.000000e+00> : vector<8x64xf32>
    %122 = tpu.matmul %120, %121, %cst_34 {dimension_numbers = #tpu.dot_dimension_numbers<[1], [0], [0], [1], [0, 0, 1, 1], [], []>} : vector<8x32xbf16>, vector<32x64xbf16>, vector<8x64xf32> -> vector<8x64xf32>
    %c0_35 = arith.constant 0 : index
    %c0_36 = arith.constant 0 : index
    %123 = vector.load %arg6[%c0_35, %c0_36] : memref<1x64xf32, #tpu.memory_space<vmem>>, vector<1x64xf32>
    %124 = vector.broadcast %123 : vector<1x64xf32> to vector<8x64xf32>
    %125 = arith.addf %122, %124 : vector<8x64xf32>
    %cst_37 = arith.constant 0.000000e+00 : f32
    %126 = vector.broadcast %cst_37 : f32 to vector<8x64xf32>
    %127 = arith.maximumf %125, %126 : vector<8x64xf32>
    %128 = arith.truncf %127 : vector<8x64xf32> to vector<8x64xbf16>
    %c0_38 = arith.constant 0 : index
    %c0_39 = arith.constant 0 : index
    %129 = vector.load %arg7[%c0_38, %c0_39] : memref<64x32xbf16, #tpu.memory_space<vmem>>, vector<64x32xbf16>
    %cst_40 = arith.constant dense<0.000000e+00> : vector<8x32xf32>
    %130 = tpu.matmul %128, %129, %cst_40 {dimension_numbers = #tpu.dot_dimension_numbers<[1], [0], [0], [1], [0, 0, 1, 1], [], []>} : vector<8x64xbf16>, vector<64x32xbf16>, vector<8x32xf32> -> vector<8x32xf32>
    %131 = vector.broadcast %88 : vector<1x32xf32> to vector<8x32xf32>
    %132 = arith.addf %130, %131 : vector<8x32xf32>
    %133 = arith.addf %119, %132 : vector<8x32xf32>
    %cst_41 = arith.constant dense<0.000000e+00> : vector<8xf32>
    %134 = vector.multi_reduction <add>, %133, %cst_41 [1] : vector<8x32xf32> to vector<8xf32>
    %135 = vector.shape_cast %134 : vector<8xf32> to vector<8x1xf32>
    %cst_42 = arith.constant 3.200000e+01 : f32
    %136 = vector.broadcast %cst_42 : f32 to vector<8x1xf32>
    %137 = arith.divf %135, %136 : vector<8x1xf32>
    %138 = vector.broadcast %137 : vector<8x1xf32> to vector<8x32xf32>
    %139 = arith.subf %133, %138 : vector<8x32xf32>
    %140 = arith.mulf %139, %139 : vector<8x32xf32>
    %cst_43 = arith.constant dense<0.000000e+00> : vector<8xf32>
    %141 = vector.multi_reduction <add>, %140, %cst_43 [1] : vector<8x32xf32> to vector<8xf32>
    %142 = vector.shape_cast %141 : vector<8xf32> to vector<8x1xf32>
    %cst_44 = arith.constant 3.200000e+01 : f32
    %143 = vector.broadcast %cst_44 : f32 to vector<8x1xf32>
    %144 = arith.divf %142, %143 : vector<8x1xf32>
    %145 = vector.broadcast %137 : vector<8x1xf32> to vector<8x32xf32>
    %146 = arith.subf %133, %145 : vector<8x32xf32>
    %cst_45 = arith.constant 9.99999974E-6 : f32
    %147 = vector.broadcast %cst_45 : f32 to vector<8x1xf32>
    %148 = arith.addf %144, %147 : vector<8x1xf32>
    %149 = math.rsqrt %148 : vector<8x1xf32>
    %150 = vector.broadcast %149 : vector<8x1xf32> to vector<8x32xf32>
    %151 = arith.mulf %146, %150 : vector<8x32xf32>
    %152 = vector.broadcast %91 : vector<1x32xf32> to vector<8x32xf32>
    %153 = arith.mulf %151, %152 : vector<8x32xf32>
    %154 = vector.broadcast %92 : vector<1x32xf32> to vector<8x32xf32>
    %155 = arith.addf %153, %154 : vector<8x32xf32>
    %c1_i32 = arith.constant 1 : i32
    %156 = arith.truncf %155 : vector<8x32xf32> to vector<8x32xbf16>
    %c0_46 = arith.constant 0 : index
    %c0_47 = arith.constant 0 : index
    %157 = vector.load %arg2[%c0_46, %c0_47] : memref<32x96xbf16, #tpu.memory_space<vmem>>, vector<32x96xbf16>
    %cst_48 = arith.constant dense<0.000000e+00> : vector<8x96xf32>
    %158 = tpu.matmul %156, %157, %cst_48 {dimension_numbers = #tpu.dot_dimension_numbers<[1], [0], [0], [1], [0, 0, 1, 1], [], []>} : vector<8x32xbf16>, vector<32x96xbf16>, vector<8x96xf32> -> vector<8x96xf32>
    %c0_49 = arith.constant 0 : index
    %c0_50 = arith.constant 0 : index
    %159 = vector.load %arg3[%c0_49, %c0_50] : memref<1x96xf32, #tpu.memory_space<vmem>>, vector<1x96xf32>
    %160 = vector.broadcast %159 : vector<1x96xf32> to vector<8x96xf32>
    %161 = arith.addf %158, %160 : vector<8x96xf32>
    %162 = vector.extract_strided_slice %161 {offsets = [0, 0], sizes = [8, 8], strides = [1, 1]} : vector<8x96xf32> to vector<8x8xf32>
    %163 = arith.truncf %162 : vector<8x8xf32> to vector<8x8xbf16>
    %164 = vector.extract_strided_slice %161 {offsets = [0, 32], sizes = [8, 8], strides = [1, 1]} : vector<8x96xf32> to vector<8x8xf32>
    %165 = arith.truncf %164 : vector<8x8xf32> to vector<8x8xbf16>
    %166 = vector.extract_strided_slice %161 {offsets = [0, 64], sizes = [8, 8], strides = [1, 1]} : vector<8x96xf32> to vector<8x8xf32>
    %167 = arith.truncf %166 : vector<8x8xf32> to vector<8x8xbf16>
    "tpu.trace_start"() <{level = 10 : i32, message = "qd,kd->qk"}> : () -> ()
    %cst_51 = arith.constant dense<0.000000e+00> : vector<8x8xf32>
    %168 = tpu.matmul %163, %165, %cst_51 {dimension_numbers = #tpu.dot_dimension_numbers<[1], [1], [0], [0], [0, 0, 1, 0], [], []>} : vector<8x8xbf16>, vector<8x8xbf16>, vector<8x8xf32> -> vector<8x8xf32>
    "tpu.trace_stop"() : () -> ()
    %cst_52 = arith.constant dense<0xFF800000> : vector<8xf32>
    %169 = vector.multi_reduction <maximumf>, %168, %cst_52 [1] : vector<8x8xf32> to vector<8xf32>
    %170 = vector.shape_cast %169 : vector<8xf32> to vector<8x1xf32>
    %171 = vector.broadcast %170 : vector<8x1xf32> to vector<8x8xf32>
    %172 = arith.subf %168, %171 : vector<8x8xf32>
    %173 = math.exp %172 : vector<8x8xf32>
    %cst_53 = arith.constant dense<0.000000e+00> : vector<8xf32>
    %174 = vector.multi_reduction <add>, %173, %cst_53 [1] : vector<8x8xf32> to vector<8xf32>
    %175 = vector.shape_cast %174 : vector<8xf32> to vector<8x1xf32>
    %176 = tpu.reciprocal %175 {approx = true} : vector<8x1xf32> -> vector<8x1xf32>
    %177 = vector.broadcast %176 : vector<8x1xf32> to vector<8x8xf32>
    %178 = arith.mulf %173, %177 : vector<8x8xf32>
    %179 = arith.truncf %178 : vector<8x8xf32> to vector<8x8xbf16>
    %cst_54 = arith.constant dense<0.000000e+00> : vector<8x8xf32>
    %180 = tpu.matmul %179, %167, %cst_54 {dimension_numbers = #tpu.dot_dimension_numbers<[1], [0], [0], [1], [0, 0, 1, 1], [], []>} : vector<8x8xbf16>, vector<8x8xbf16>, vector<8x8xf32> -> vector<8x8xf32>
    %181 = vector.extract_strided_slice %161 {offsets = [0, 8], sizes = [8, 8], strides = [1, 1]} : vector<8x96xf32> to vector<8x8xf32>
    %182 = arith.truncf %181 : vector<8x8xf32> to vector<8x8xbf16>
    %183 = vector.extract_strided_slice %161 {offsets = [0, 40], sizes = [8, 8], strides = [1, 1]} : vector<8x96xf32> to vector<8x8xf32>
    %184 = arith.truncf %183 : vector<8x8xf32> to vector<8x8xbf16>
    %185 = vector.extract_strided_slice %161 {offsets = [0, 72], sizes = [8, 8], strides = [1, 1]} : vector<8x96xf32> to vector<8x8xf32>
    %186 = arith.truncf %185 : vector<8x8xf32> to vector<8x8xbf16>
    "tpu.trace_start"() <{level = 10 : i32, message = "qd,kd->qk"}> : () -> ()
    %cst_55 = arith.constant dense<0.000000e+00> : vector<8x8xf32>
    %187 = tpu.matmul %182, %184, %cst_55 {dimension_numbers = #tpu.dot_dimension_numbers<[1], [1], [0], [0], [0, 0, 1, 0], [], []>} : vector<8x8xbf16>, vector<8x8xbf16>, vector<8x8xf32> -> vector<8x8xf32>
    "tpu.trace_stop"() : () -> ()
    %cst_56 = arith.constant dense<0xFF800000> : vector<8xf32>
    %188 = vector.multi_reduction <maximumf>, %187, %cst_56 [1] : vector<8x8xf32> to vector<8xf32>
    %189 = vector.shape_cast %188 : vector<8xf32> to vector<8x1xf32>
    %190 = vector.broadcast %189 : vector<8x1xf32> to vector<8x8xf32>
    %191 = arith.subf %187, %190 : vector<8x8xf32>
    %192 = math.exp %191 : vector<8x8xf32>
    %cst_57 = arith.constant dense<0.000000e+00> : vector<8xf32>
    %193 = vector.multi_reduction <add>, %192, %cst_57 [1] : vector<8x8xf32> to vector<8xf32>
    %194 = vector.shape_cast %193 : vector<8xf32> to vector<8x1xf32>
    %195 = tpu.reciprocal %194 {approx = true} : vector<8x1xf32> -> vector<8x1xf32>
    %196 = vector.broadcast %195 : vector<8x1xf32> to vector<8x8xf32>
    %197 = arith.mulf %192, %196 : vector<8x8xf32>
    %198 = arith.truncf %197 : vector<8x8xf32> to vector<8x8xbf16>
    %cst_58 = arith.constant dense<0.000000e+00> : vector<8x8xf32>
    %199 = tpu.matmul %198, %186, %cst_58 {dimension_numbers = #tpu.dot_dimension_numbers<[1], [0], [0], [1], [0, 0, 1, 1], [], []>} : vector<8x8xbf16>, vector<8x8xbf16>, vector<8x8xf32> -> vector<8x8xf32>
    %200 = vector.extract_strided_slice %161 {offsets = [0, 16], sizes = [8, 8], strides = [1, 1]} : vector<8x96xf32> to vector<8x8xf32>
    %201 = arith.truncf %200 : vector<8x8xf32> to vector<8x8xbf16>
    %202 = vector.extract_strided_slice %161 {offsets = [0, 48], sizes = [8, 8], strides = [1, 1]} : vector<8x96xf32> to vector<8x8xf32>
    %203 = arith.truncf %202 : vector<8x8xf32> to vector<8x8xbf16>
    %204 = vector.extract_strided_slice %161 {offsets = [0, 80], sizes = [8, 8], strides = [1, 1]} : vector<8x96xf32> to vector<8x8xf32>
    %205 = arith.truncf %204 : vector<8x8xf32> to vector<8x8xbf16>
    "tpu.trace_start"() <{level = 10 : i32, message = "qd,kd->qk"}> : () -> ()
    %cst_59 = arith.constant dense<0.000000e+00> : vector<8x8xf32>
    %206 = tpu.matmul %201, %203, %cst_59 {dimension_numbers = #tpu.dot_dimension_numbers<[1], [1], [0], [0], [0, 0, 1, 0], [], []>} : vector<8x8xbf16>, vector<8x8xbf16>, vector<8x8xf32> -> vector<8x8xf32>
    "tpu.trace_stop"() : () -> ()
    %cst_60 = arith.constant dense<0xFF800000> : vector<8xf32>
    %207 = vector.multi_reduction <maximumf>, %206, %cst_60 [1] : vector<8x8xf32> to vector<8xf32>
    %208 = vector.shape_cast %207 : vector<8xf32> to vector<8x1xf32>
    %209 = vector.broadcast %208 : vector<8x1xf32> to vector<8x8xf32>
    %210 = arith.subf %206, %209 : vector<8x8xf32>
    %211 = math.exp %210 : vector<8x8xf32>
    %cst_61 = arith.constant dense<0.000000e+00> : vector<8xf32>
    %212 = vector.multi_reduction <add>, %211, %cst_61 [1] : vector<8x8xf32> to vector<8xf32>
    %213 = vector.shape_cast %212 : vector<8xf32> to vector<8x1xf32>
    %214 = tpu.reciprocal %213 {approx = true} : vector<8x1xf32> -> vector<8x1xf32>
    %215 = vector.broadcast %214 : vector<8x1xf32> to vector<8x8xf32>
    %216 = arith.mulf %211, %215 : vector<8x8xf32>
    %217 = arith.truncf %216 : vector<8x8xf32> to vector<8x8xbf16>
    %cst_62 = arith.constant dense<0.000000e+00> : vector<8x8xf32>
    %218 = tpu.matmul %217, %205, %cst_62 {dimension_numbers = #tpu.dot_dimension_numbers<[1], [0], [0], [1], [0, 0, 1, 1], [], []>} : vector<8x8xbf16>, vector<8x8xbf16>, vector<8x8xf32> -> vector<8x8xf32>
    %219 = vector.extract_strided_slice %161 {offsets = [0, 24], sizes = [8, 8], strides = [1, 1]} : vector<8x96xf32> to vector<8x8xf32>
    %220 = arith.truncf %219 : vector<8x8xf32> to vector<8x8xbf16>
    %221 = vector.extract_strided_slice %161 {offsets = [0, 56], sizes = [8, 8], strides = [1, 1]} : vector<8x96xf32> to vector<8x8xf32>
    %222 = arith.truncf %221 : vector<8x8xf32> to vector<8x8xbf16>
    %223 = vector.extract_strided_slice %161 {offsets = [0, 88], sizes = [8, 8], strides = [1, 1]} : vector<8x96xf32> to vector<8x8xf32>
    %224 = arith.truncf %223 : vector<8x8xf32> to vector<8x8xbf16>
    "tpu.trace_start"() <{level = 10 : i32, message = "qd,kd->qk"}> : () -> ()
    %cst_63 = arith.constant dense<0.000000e+00> : vector<8x8xf32>
    %225 = tpu.matmul %220, %222, %cst_63 {dimension_numbers = #tpu.dot_dimension_numbers<[1], [1], [0], [0], [0, 0, 1, 0], [], []>} : vector<8x8xbf16>, vector<8x8xbf16>, vector<8x8xf32> -> vector<8x8xf32>
    "tpu.trace_stop"() : () -> ()
    %cst_64 = arith.constant dense<0xFF800000> : vector<8xf32>
    %226 = vector.multi_reduction <maximumf>, %225, %cst_64 [1] : vector<8x8xf32> to vector<8xf32>
    %227 = vector.shape_cast %226 : vector<8xf32> to vector<8x1xf32>
    %228 = vector.broadcast %227 : vector<8x1xf32> to vector<8x8xf32>
    %229 = arith.subf %225, %228 : vector<8x8xf32>
    %230 = math.exp %229 : vector<8x8xf32>
    %cst_65 = arith.constant dense<0.000000e+00> : vector<8xf32>
    %231 = vector.multi_reduction <add>, %230, %cst_65 [1] : vector<8x8xf32> to vector<8xf32>
    %232 = vector.shape_cast %231 : vector<8xf32> to vector<8x1xf32>
    %233 = tpu.reciprocal %232 {approx = true} : vector<8x1xf32> -> vector<8x1xf32>
    %234 = vector.broadcast %233 : vector<8x1xf32> to vector<8x8xf32>
    %235 = arith.mulf %230, %234 : vector<8x8xf32>
    %236 = arith.truncf %235 : vector<8x8xf32> to vector<8x8xbf16>
    %cst_66 = arith.constant dense<0.000000e+00> : vector<8x8xf32>
    %237 = tpu.matmul %236, %224, %cst_66 {dimension_numbers = #tpu.dot_dimension_numbers<[1], [0], [0], [1], [0, 0, 1, 1], [], []>} : vector<8x8xbf16>, vector<8x8xbf16>, vector<8x8xf32> -> vector<8x8xf32>
    %238 = tpu.concatenate %180, %199, %218, %237 in 1 : vector<8x8xf32>, vector<8x8xf32>, vector<8x8xf32>, vector<8x8xf32> -> vector<8x32xf32>
    %239 = arith.truncf %238 : vector<8x32xf32> to vector<8x32xbf16>
    %c0_67 = arith.constant 0 : index
    %c0_68 = arith.constant 0 : index
    %240 = vector.load %arg8[%c0_67, %c0_68] : memref<8x32xf32, #tpu.memory_space<vmem>>, vector<8x32xf32>
    %241 = vector.extract_strided_slice %240 {offsets = [0, 0], sizes = [1, 32], strides = [1, 1]} : vector<8x32xf32> to vector<1x32xf32>
    %242 = vector.extract_strided_slice %240 {offsets = [1, 0], sizes = [1, 32], strides = [1, 1]} : vector<8x32xf32> to vector<1x32xf32>
    %243 = vector.extract_strided_slice %240 {offsets = [2, 0], sizes = [1, 32], strides = [1, 1]} : vector<8x32xf32> to vector<1x32xf32>
    %244 = vector.extract_strided_slice %240 {offsets = [3, 0], sizes = [1, 32], strides = [1, 1]} : vector<8x32xf32> to vector<1x32xf32>
    %245 = vector.extract_strided_slice %240 {offsets = [4, 0], sizes = [1, 32], strides = [1, 1]} : vector<8x32xf32> to vector<1x32xf32>
    %246 = vector.extract_strided_slice %240 {offsets = [5, 0], sizes = [1, 32], strides = [1, 1]} : vector<8x32xf32> to vector<1x32xf32>
    %c0_69 = arith.constant 0 : index
    %c0_70 = arith.constant 0 : index
    %247 = vector.load %arg4[%c0_69, %c0_70] : memref<32x32xbf16, #tpu.memory_space<vmem>>, vector<32x32xbf16>
    %cst_71 = arith.constant dense<0.000000e+00> : vector<8x32xf32>
    %248 = tpu.matmul %239, %247, %cst_71 {dimension_numbers = #tpu.dot_dimension_numbers<[1], [0], [0], [1], [0, 0, 1, 1], [], []>} : vector<8x32xbf16>, vector<32x32xbf16>, vector<8x32xf32> -> vector<8x32xf32>
    %249 = vector.broadcast %241 : vector<1x32xf32> to vector<8x32xf32>
    %250 = arith.addf %248, %249 : vector<8x32xf32>
    %251 = arith.addf %155, %250 : vector<8x32xf32>
    %cst_72 = arith.constant dense<0.000000e+00> : vector<8xf32>
    %252 = vector.multi_reduction <add>, %251, %cst_72 [1] : vector<8x32xf32> to vector<8xf32>
    %253 = vector.shape_cast %252 : vector<8xf32> to vector<8x1xf32>
    %cst_73 = arith.constant 3.200000e+01 : f32
    %254 = vector.broadcast %cst_73 : f32 to vector<8x1xf32>
    %255 = arith.divf %253, %254 : vector<8x1xf32>
    %256 = vector.broadcast %255 : vector<8x1xf32> to vector<8x32xf32>
    %257 = arith.subf %251, %256 : vector<8x32xf32>
    %258 = arith.mulf %257, %257 : vector<8x32xf32>
    %cst_74 = arith.constant dense<0.000000e+00> : vector<8xf32>
    %259 = vector.multi_reduction <add>, %258, %cst_74 [1] : vector<8x32xf32> to vector<8xf32>
    %260 = vector.shape_cast %259 : vector<8xf32> to vector<8x1xf32>
    %cst_75 = arith.constant 3.200000e+01 : f32
    %261 = vector.broadcast %cst_75 : f32 to vector<8x1xf32>
    %262 = arith.divf %260, %261 : vector<8x1xf32>
    %263 = vector.broadcast %255 : vector<8x1xf32> to vector<8x32xf32>
    %264 = arith.subf %251, %263 : vector<8x32xf32>
    %cst_76 = arith.constant 9.99999974E-6 : f32
    %265 = vector.broadcast %cst_76 : f32 to vector<8x1xf32>
    %266 = arith.addf %262, %265 : vector<8x1xf32>
    %267 = math.rsqrt %266 : vector<8x1xf32>
    %268 = vector.broadcast %267 : vector<8x1xf32> to vector<8x32xf32>
    %269 = arith.mulf %264, %268 : vector<8x32xf32>
    %270 = vector.broadcast %243 : vector<1x32xf32> to vector<8x32xf32>
    %271 = arith.mulf %269, %270 : vector<8x32xf32>
    %272 = vector.broadcast %244 : vector<1x32xf32> to vector<8x32xf32>
    %273 = arith.addf %271, %272 : vector<8x32xf32>
    %274 = arith.truncf %273 : vector<8x32xf32> to vector<8x32xbf16>
    %c0_77 = arith.constant 0 : index
    %c0_78 = arith.constant 0 : index
    %275 = vector.load %arg5[%c0_77, %c0_78] : memref<32x64xbf16, #tpu.memory_space<vmem>>, vector<32x64xbf16>
    %cst_79 = arith.constant dense<0.000000e+00> : vector<8x64xf32>
    %276 = tpu.matmul %274, %275, %cst_79 {dimension_numbers = #tpu.dot_dimension_numbers<[1], [0], [0], [1], [0, 0, 1, 1], [], []>} : vector<8x32xbf16>, vector<32x64xbf16>, vector<8x64xf32> -> vector<8x64xf32>
    %c0_80 = arith.constant 0 : index
    %c0_81 = arith.constant 0 : index
    %277 = vector.load %arg6[%c0_80, %c0_81] : memref<1x64xf32, #tpu.memory_space<vmem>>, vector<1x64xf32>
    %278 = vector.broadcast %277 : vector<1x64xf32> to vector<8x64xf32>
    %279 = arith.addf %276, %278 : vector<8x64xf32>
    %cst_82 = arith.constant 0.000000e+00 : f32
    %280 = vector.broadcast %cst_82 : f32 to vector<8x64xf32>
    %281 = arith.maximumf %279, %280 : vector<8x64xf32>
    %282 = arith.truncf %281 : vector<8x64xf32> to vector<8x64xbf16>
    %c0_83 = arith.constant 0 : index
    %c0_84 = arith.constant 0 : index
    %283 = vector.load %arg7[%c0_83, %c0_84] : memref<64x32xbf16, #tpu.memory_space<vmem>>, vector<64x32xbf16>
    %cst_85 = arith.constant dense<0.000000e+00> : vector<8x32xf32>
    %284 = tpu.matmul %282, %283, %cst_85 {dimension_numbers = #tpu.dot_dimension_numbers<[1], [0], [0], [1], [0, 0, 1, 1], [], []>} : vector<8x64xbf16>, vector<64x32xbf16>, vector<8x32xf32> -> vector<8x32xf32>
    %285 = vector.broadcast %242 : vector<1x32xf32> to vector<8x32xf32>
    %286 = arith.addf %284, %285 : vector<8x32xf32>
    %287 = arith.addf %273, %286 : vector<8x32xf32>
    %cst_86 = arith.constant dense<0.000000e+00> : vector<8xf32>
    %288 = vector.multi_reduction <add>, %287, %cst_86 [1] : vector<8x32xf32> to vector<8xf32>
    %289 = vector.shape_cast %288 : vector<8xf32> to vector<8x1xf32>
    %cst_87 = arith.constant 3.200000e+01 : f32
    %290 = vector.broadcast %cst_87 : f32 to vector<8x1xf32>
    %291 = arith.divf %289, %290 : vector<8x1xf32>
    %292 = vector.broadcast %291 : vector<8x1xf32> to vector<8x32xf32>
    %293 = arith.subf %287, %292 : vector<8x32xf32>
    %294 = arith.mulf %293, %293 : vector<8x32xf32>
    %cst_88 = arith.constant dense<0.000000e+00> : vector<8xf32>
    %295 = vector.multi_reduction <add>, %294, %cst_88 [1] : vector<8x32xf32> to vector<8xf32>
    %296 = vector.shape_cast %295 : vector<8xf32> to vector<8x1xf32>
    %cst_89 = arith.constant 3.200000e+01 : f32
    %297 = vector.broadcast %cst_89 : f32 to vector<8x1xf32>
    %298 = arith.divf %296, %297 : vector<8x1xf32>
    %299 = vector.broadcast %291 : vector<8x1xf32> to vector<8x32xf32>
    %300 = arith.subf %287, %299 : vector<8x32xf32>
    %cst_90 = arith.constant 9.99999974E-6 : f32
    %301 = vector.broadcast %cst_90 : f32 to vector<8x1xf32>
    %302 = arith.addf %298, %301 : vector<8x1xf32>
    %303 = math.rsqrt %302 : vector<8x1xf32>
    %304 = vector.broadcast %303 : vector<8x1xf32> to vector<8x32xf32>
    %305 = arith.mulf %300, %304 : vector<8x32xf32>
    %306 = vector.broadcast %245 : vector<1x32xf32> to vector<8x32xf32>
    %307 = arith.mulf %305, %306 : vector<8x32xf32>
    %308 = vector.broadcast %246 : vector<1x32xf32> to vector<8x32xf32>
    %309 = arith.addf %307, %308 : vector<8x32xf32>
    %c0_91 = arith.constant 0 : index
    %c0_92 = arith.constant 0 : index
    %310 = vector.load %arg8[%c0_91, %c0_92] : memref<8x32xf32, #tpu.memory_space<vmem>>, vector<8x32xf32>
    %311 = vector.extract_strided_slice %310 {offsets = [6, 0], sizes = [1, 32], strides = [1, 1]} : vector<8x32xf32> to vector<1x32xf32>
    %312 = vector.extract_strided_slice %310 {offsets = [7, 0], sizes = [1, 32], strides = [1, 1]} : vector<8x32xf32> to vector<1x32xf32>
    %cst_93 = arith.constant dense<0.000000e+00> : vector<8xf32>
    %313 = vector.multi_reduction <add>, %309, %cst_93 [1] : vector<8x32xf32> to vector<8xf32>
    %314 = vector.shape_cast %313 : vector<8xf32> to vector<8x1xf32>
    %cst_94 = arith.constant 3.200000e+01 : f32
    %315 = vector.broadcast %cst_94 : f32 to vector<8x1xf32>
    %316 = arith.divf %314, %315 : vector<8x1xf32>
    %317 = vector.broadcast %316 : vector<8x1xf32> to vector<8x32xf32>
    %318 = arith.subf %309, %317 : vector<8x32xf32>
    %319 = arith.mulf %318, %318 : vector<8x32xf32>
    %cst_95 = arith.constant dense<0.000000e+00> : vector<8xf32>
    %320 = vector.multi_reduction <add>, %319, %cst_95 [1] : vector<8x32xf32> to vector<8xf32>
    %321 = vector.shape_cast %320 : vector<8xf32> to vector<8x1xf32>
    %cst_96 = arith.constant 3.200000e+01 : f32
    %322 = vector.broadcast %cst_96 : f32 to vector<8x1xf32>
    %323 = arith.divf %321, %322 : vector<8x1xf32>
    %324 = vector.broadcast %316 : vector<8x1xf32> to vector<8x32xf32>
    %325 = arith.subf %309, %324 : vector<8x32xf32>
    %cst_97 = arith.constant 9.99999974E-6 : f32
    %326 = vector.broadcast %cst_97 : f32 to vector<8x1xf32>
    %327 = arith.addf %323, %326 : vector<8x1xf32>
    %328 = math.rsqrt %327 : vector<8x1xf32>
    %329 = vector.broadcast %328 : vector<8x1xf32> to vector<8x32xf32>
    %330 = arith.mulf %325, %329 : vector<8x32xf32>
    %331 = vector.broadcast %311 : vector<1x32xf32> to vector<8x32xf32>
    %332 = arith.mulf %330, %331 : vector<8x32xf32>
    %333 = vector.broadcast %312 : vector<1x32xf32> to vector<8x32xf32>
    %334 = arith.addf %332, %333 : vector<8x32xf32>
    %c0_98 = arith.constant 0 : index
    %c0_99 = arith.constant 0 : index
    %c0_100 = arith.constant 0 : index
    %335 = vector.load %arg9[%c0_98, %c0_99, %c0_100] : memref<1x8x32xf32, #tpu.memory_space<vmem>>, vector<1x8x32xf32>
    %336 = vector.shape_cast %335 : vector<1x8x32xf32> to vector<8x32xf32>
    %337 = vector.shape_cast %334 : vector<8x32xf32> to vector<1x8x32xf32>
    tpu.vector_store %arg9[%c0_98, %c0_99, %c0_100], %337 {strides = array<i32>} : memref<1x8x32xf32, #tpu.memory_space<vmem>>, vector<1x8x32xf32>,
    return
  }
  func.func @transform_0(%arg0: i32) -> (i32, i32, i32) {
    %c0_i32 = arith.constant 0 : i32
    %c0_i32_0 = arith.constant 0 : i32
    %c0_i32_1 = arith.constant 0 : i32
    return %arg0, %c0_i32, %c0_i32_0 : i32, i32, i32
  }
  func.func @transform_1(%arg0: i32) -> (i32, i32) {
    %c0_i32 = arith.constant 0 : i32
    %c0_i32_0 = arith.constant 0 : i32
    %c0_i32_1 = arith.constant 0 : i32
    return %c0_i32, %c0_i32_0 : i32, i32
  }
  func.func @transform_2(%arg0: i32) -> (i32, i32) {
    %c0_i32 = arith.constant 0 : i32
    %c0_i32_0 = arith.constant 0 : i32
    %c0_i32_1 = arith.constant 0 : i32
    return %c0_i32, %c0_i32_0 : i32, i32
  }
  func.func @transform_3(%arg0: i32) -> (i32, i32) {
    %c0_i32 = arith.constant 0 : i32
    %c0_i32_0 = arith.constant 0 : i32
    %c0_i32_1 = arith.constant 0 : i32
    return %c0_i32, %c0_i32_0 : i32, i32
  }
  func.func @transform_4(%arg0: i32) -> (i32, i32) {
    %c0_i32 = arith.constant 0 : i32
    %c0_i32_0 = arith.constant 0 : i32
    %c0_i32_1 = arith.constant 0 : i32
    return %c0_i32, %c0_i32_0 : i32, i32
  }
  func.func @transform_5(%arg0: i32) -> (i32, i32) {
    %c0_i32 = arith.constant 0 : i32
    %c0_i32_0 = arith.constant 0 : i32
    %c0_i32_1 = arith.constant 0 : i32
    return %c0_i32, %c0_i32_0 : i32, i32
  }
  func.func @transform_6(%arg0: i32) -> (i32, i32) {
    %c0_i32 = arith.constant 0 : i32
    %c0_i32_0 = arith.constant 0 : i32
    %c0_i32_1 = arith.constant 0 : i32
    return %c0_i32, %c0_i32_0 : i32, i32
  }
  func.func @transform_7(%arg0: i32) -> (i32, i32) {
    %c0_i32 = arith.constant 0 : i32
    %c0_i32_0 = arith.constant 0 : i32
    %c0_i32_1 = arith.constant 0 : i32
    return %c0_i32, %c0_i32_0 : i32, i32
  }
  func.func @transform_8(%arg0: i32) -> (i32, i32, i32) {
    %c0_i32 = arith.constant 0 : i32
    %c0_i32_0 = arith.constant 0 : i32
    %c0_i32_1 = arith.constant 0 : i32
    return %arg0, %c0_i32, %c0_i32_0 : i32, i32, i32
  }
}

module attributes {stable_mosaic.version = 11 : i64} {
  func.func @_encoder_stack_kernel(%arg0: i32, %arg1: memref<1x8x32xf32, #tpu.memory_space<vmem>>, %arg2: memref<32x96xbf16, #tpu.memory_space<vmem>>, %arg3: memref<1x96xf32, #tpu.memory_space<vmem>>, %arg4: memref<32x32xbf16, #tpu.memory_space<vmem>>, %arg5: memref<32x64xbf16, #tpu.memory_space<vmem>>, %arg6: memref<1x64xf32, #tpu.memory_space<vmem>>, %arg7: memref<64x32xbf16, #tpu.memory_space<vmem>>, %arg8: memref<8x32xf32, #tpu.memory_space<vmem>>, %arg9: memref<1x8x32xf32, #tpu.memory_space<vmem>>) attributes {dimension_semantics = [#tpu.dimension_semantics<parallel>], iteration_bounds = array<i64: 2>, scalar_prefetch = 0 : i64, scratch_operands = 0 : i64, tpu.core_type = #tpu.core_type<tc>, window_params = [{transform_indices = @transform_0, window_bounds = array<i64: 1, 8, 32>}, {pipeline_mode = #tpu.pipeline_mode<synchronous>, transform_indices = @transform_1, window_bounds = array<i64: 32, 96>}, {pipeline_mode = #tpu.pipeline_mode<synchronous>, transform_indices = @transform_2, window_bounds = array<i64: 1, 96>}, {pipeline_mode = #tpu.pipeline_mode<synchronous>, transform_indices = @transform_3, window_bounds = array<i64: 32, 32>}, {pipeline_mode = #tpu.pipeline_mode<synchronous>, transform_indices = @transform_4, window_bounds = array<i64: 32, 64>}, {pipeline_mode = #tpu.pipeline_mode<synchronous>, transform_indices = @transform_5, window_bounds = array<i64: 1, 64>}, {pipeline_mode = #tpu.pipeline_mode<synchronous>, transform_indices = @transform_6, window_bounds = array<i64: 64, 32>}, {pipeline_mode = #tpu.pipeline_mode<synchronous>, transform_indices = @transform_7, window_bounds = array<i64: 8, 32>}, {transform_indices = @transform_8, window_bounds = array<i64: 1, 8, 32>}]} {
    %c0 = arith.constant 0 : index
    %c0_0 = arith.constant 0 : index
    %c0_1 = arith.constant 0 : index
    %0 = vector.load %arg1[%c0, %c0_0, %c0_1] : memref<1x8x32xf32, #tpu.memory_space<vmem>>, vector<1x8x32xf32>
    %1 = vector.shape_cast %0 : vector<1x8x32xf32> to vector<8x32xf32>
    %c0_i32 = arith.constant 0 : i32
    %2 = arith.truncf %1 : vector<8x32xf32> to vector<8x32xbf16>
    %c0_2 = arith.constant 0 : index
    %c0_3 = arith.constant 0 : index
    %3 = vector.load %arg2[%c0_2, %c0_3] : memref<32x96xbf16, #tpu.memory_space<vmem>>, vector<32x96xbf16>
    %cst = arith.constant dense<0.000000e+00> : vector<8x96xf32>
    %4 = tpu.matmul %2, %3, %cst {dimension_numbers = #tpu.dot_dimension_numbers<[1], [0], [0], [1], [0, 0, 1, 1], [], []>} : vector<8x32xbf16>, vector<32x96xbf16>, vector<8x96xf32> -> vector<8x96xf32>
    %c0_4 = arith.constant 0 : index
    %c0_5 = arith.constant 0 : index
    %5 = vector.load %arg3[%c0_4, %c0_5] : memref<1x96xf32, #tpu.memory_space<vmem>>, vector<1x96xf32>
    %6 = vector.broadcast %5 : vector<1x96xf32> to vector<8x96xf32>
    %7 = arith.addf %4, %6 : vector<8x96xf32>
    %8 = vector.extract_strided_slice %7 {offsets = [0, 0], sizes = [8, 8], strides = [1, 1]} : vector<8x96xf32> to vector<8x8xf32>
    %9 = arith.truncf %8 : vector<8x8xf32> to vector<8x8xbf16>
    %10 = vector.extract_strided_slice %7 {offsets = [0, 32], sizes = [8, 8], strides = [1, 1]} : vector<8x96xf32> to vector<8x8xf32>
    %11 = arith.truncf %10 : vector<8x8xf32> to vector<8x8xbf16>
    %12 = vector.extract_strided_slice %7 {offsets = [0, 64], sizes = [8, 8], strides = [1, 1]} : vector<8x96xf32> to vector<8x8xf32>
    %13 = arith.truncf %12 : vector<8x8xf32> to vector<8x8xbf16>
    "tpu.trace_start"() <{level = 10 : i32, message = "qd,kd->qk"}> : () -> ()
    %cst_6 = arith.constant dense<0.000000e+00> : vector<8x8xf32>
    %14 = tpu.matmul %9, %11, %cst_6 {dimension_numbers = #tpu.dot_dimension_numbers<[1], [1], [0], [0], [0, 0, 1, 0], [], []>} : vector<8x8xbf16>, vector<8x8xbf16>, vector<8x8xf32> -> vector<8x8xf32>
    "tpu.trace_stop"() : () -> ()
    %cst_7 = arith.constant dense<0xFF800000> : vector<8xf32>
    %15 = vector.multi_reduction <maximumf>, %14, %cst_7 [1] : vector<8x8xf32> to vector<8xf32>
    %16 = vector.shape_cast %15 : vector<8xf32> to vector<8x1xf32>
    %17 = vector.broadcast %16 : vector<8x1xf32> to vector<8x8xf32>
    %18 = arith.subf %14, %17 : vector<8x8xf32>
    %19 = math.exp %18 : vector<8x8xf32>
    %cst_8 = arith.constant dense<0.000000e+00> : vector<8xf32>
    %20 = vector.multi_reduction <add>, %19, %cst_8 [1] : vector<8x8xf32> to vector<8xf32>
    %21 = vector.shape_cast %20 : vector<8xf32> to vector<8x1xf32>
    %22 = tpu.reciprocal %21 {approx = true} : vector<8x1xf32> -> vector<8x1xf32>
    %23 = vector.broadcast %22 : vector<8x1xf32> to vector<8x8xf32>
    %24 = arith.mulf %19, %23 : vector<8x8xf32>
    %25 = arith.truncf %24 : vector<8x8xf32> to vector<8x8xbf16>
    %cst_9 = arith.constant dense<0.000000e+00> : vector<8x8xf32>
    %26 = tpu.matmul %25, %13, %cst_9 {dimension_numbers = #tpu.dot_dimension_numbers<[1], [0], [0], [1], [0, 0, 1, 1], [], []>} : vector<8x8xbf16>, vector<8x8xbf16>, vector<8x8xf32> -> vector<8x8xf32>
    %27 = vector.extract_strided_slice %7 {offsets = [0, 8], sizes = [8, 8], strides = [1, 1]} : vector<8x96xf32> to vector<8x8xf32>
    %28 = arith.truncf %27 : vector<8x8xf32> to vector<8x8xbf16>
    %29 = vector.extract_strided_slice %7 {offsets = [0, 40], sizes = [8, 8], strides = [1, 1]} : vector<8x96xf32> to vector<8x8xf32>
    %30 = arith.truncf %29 : vector<8x8xf32> to vector<8x8xbf16>
    %31 = vector.extract_strided_slice %7 {offsets = [0, 72], sizes = [8, 8], strides = [1, 1]} : vector<8x96xf32> to vector<8x8xf32>
    %32 = arith.truncf %31 : vector<8x8xf32> to vector<8x8xbf16>
    "tpu.trace_start"() <{level = 10 : i32, message = "qd,kd->qk"}> : () -> ()
    %cst_10 = arith.constant dense<0.000000e+00> : vector<8x8xf32>
    %33 = tpu.matmul %28, %30, %cst_10 {dimension_numbers = #tpu.dot_dimension_numbers<[1], [1], [0], [0], [0, 0, 1, 0], [], []>} : vector<8x8xbf16>, vector<8x8xbf16>, vector<8x8xf32> -> vector<8x8xf32>
    "tpu.trace_stop"() : () -> ()
    %cst_11 = arith.constant dense<0xFF800000> : vector<8xf32>
    %34 = vector.multi_reduction <maximumf>, %33, %cst_11 [1] : vector<8x8xf32> to vector<8xf32>
    %35 = vector.shape_cast %34 : vector<8xf32> to vector<8x1xf32>
    %36 = vector.broadcast %35 : vector<8x1xf32> to vector<8x8xf32>
    %37 = arith.subf %33, %36 : vector<8x8xf32>
    %38 = math.exp %37 : vector<8x8xf32>
    %cst_12 = arith.constant dense<0.000000e+00> : vector<8xf32>
    %39 = vector.multi_reduction <add>, %38, %cst_12 [1] : vector<8x8xf32> to vector<8xf32>
    %40 = vector.shape_cast %39 : vector<8xf32> to vector<8x1xf32>
    %41 = tpu.reciprocal %40 {approx = true} : vector<8x1xf32> -> vector<8x1xf32>
    %42 = vector.broadcast %41 : vector<8x1xf32> to vector<8x8xf32>
    %43 = arith.mulf %38, %42 : vector<8x8xf32>
    %44 = arith.truncf %43 : vector<8x8xf32> to vector<8x8xbf16>
    %cst_13 = arith.constant dense<0.000000e+00> : vector<8x8xf32>
    %45 = tpu.matmul %44, %32, %cst_13 {dimension_numbers = #tpu.dot_dimension_numbers<[1], [0], [0], [1], [0, 0, 1, 1], [], []>} : vector<8x8xbf16>, vector<8x8xbf16>, vector<8x8xf32> -> vector<8x8xf32>
    %46 = vector.extract_strided_slice %7 {offsets = [0, 16], sizes = [8, 8], strides = [1, 1]} : vector<8x96xf32> to vector<8x8xf32>
    %47 = arith.truncf %46 : vector<8x8xf32> to vector<8x8xbf16>
    %48 = vector.extract_strided_slice %7 {offsets = [0, 48], sizes = [8, 8], strides = [1, 1]} : vector<8x96xf32> to vector<8x8xf32>
    %49 = arith.truncf %48 : vector<8x8xf32> to vector<8x8xbf16>
    %50 = vector.extract_strided_slice %7 {offsets = [0, 80], sizes = [8, 8], strides = [1, 1]} : vector<8x96xf32> to vector<8x8xf32>
    %51 = arith.truncf %50 : vector<8x8xf32> to vector<8x8xbf16>
    "tpu.trace_start"() <{level = 10 : i32, message = "qd,kd->qk"}> : () -> ()
    %cst_14 = arith.constant dense<0.000000e+00> : vector<8x8xf32>
    %52 = tpu.matmul %47, %49, %cst_14 {dimension_numbers = #tpu.dot_dimension_numbers<[1], [1], [0], [0], [0, 0, 1, 0], [], []>} : vector<8x8xbf16>, vector<8x8xbf16>, vector<8x8xf32> -> vector<8x8xf32>
    "tpu.trace_stop"() : () -> ()
    %cst_15 = arith.constant dense<0xFF800000> : vector<8xf32>
    %53 = vector.multi_reduction <maximumf>, %52, %cst_15 [1] : vector<8x8xf32> to vector<8xf32>
    %54 = vector.shape_cast %53 : vector<8xf32> to vector<8x1xf32>
    %55 = vector.broadcast %54 : vector<8x1xf32> to vector<8x8xf32>
    %56 = arith.subf %52, %55 : vector<8x8xf32>
    %57 = math.exp %56 : vector<8x8xf32>
    %cst_16 = arith.constant dense<0.000000e+00> : vector<8xf32>
    %58 = vector.multi_reduction <add>, %57, %cst_16 [1] : vector<8x8xf32> to vector<8xf32>
    %59 = vector.shape_cast %58 : vector<8xf32> to vector<8x1xf32>
    %60 = tpu.reciprocal %59 {approx = true} : vector<8x1xf32> -> vector<8x1xf32>
    %61 = vector.broadcast %60 : vector<8x1xf32> to vector<8x8xf32>
    %62 = arith.mulf %57, %61 : vector<8x8xf32>
    %63 = arith.truncf %62 : vector<8x8xf32> to vector<8x8xbf16>
    %cst_17 = arith.constant dense<0.000000e+00> : vector<8x8xf32>
    %64 = tpu.matmul %63, %51, %cst_17 {dimension_numbers = #tpu.dot_dimension_numbers<[1], [0], [0], [1], [0, 0, 1, 1], [], []>} : vector<8x8xbf16>, vector<8x8xbf16>, vector<8x8xf32> -> vector<8x8xf32>
    %65 = vector.extract_strided_slice %7 {offsets = [0, 24], sizes = [8, 8], strides = [1, 1]} : vector<8x96xf32> to vector<8x8xf32>
    %66 = arith.truncf %65 : vector<8x8xf32> to vector<8x8xbf16>
    %67 = vector.extract_strided_slice %7 {offsets = [0, 56], sizes = [8, 8], strides = [1, 1]} : vector<8x96xf32> to vector<8x8xf32>
    %68 = arith.truncf %67 : vector<8x8xf32> to vector<8x8xbf16>
    %69 = vector.extract_strided_slice %7 {offsets = [0, 88], sizes = [8, 8], strides = [1, 1]} : vector<8x96xf32> to vector<8x8xf32>
    %70 = arith.truncf %69 : vector<8x8xf32> to vector<8x8xbf16>
    "tpu.trace_start"() <{level = 10 : i32, message = "qd,kd->qk"}> : () -> ()
    %cst_18 = arith.constant dense<0.000000e+00> : vector<8x8xf32>
    %71 = tpu.matmul %66, %68, %cst_18 {dimension_numbers = #tpu.dot_dimension_numbers<[1], [1], [0], [0], [0, 0, 1, 0], [], []>} : vector<8x8xbf16>, vector<8x8xbf16>, vector<8x8xf32> -> vector<8x8xf32>
    "tpu.trace_stop"() : () -> ()
    %cst_19 = arith.constant dense<0xFF800000> : vector<8xf32>
    %72 = vector.multi_reduction <maximumf>, %71, %cst_19 [1] : vector<8x8xf32> to vector<8xf32>
    %73 = vector.shape_cast %72 : vector<8xf32> to vector<8x1xf32>
    %74 = vector.broadcast %73 : vector<8x1xf32> to vector<8x8xf32>
    %75 = arith.subf %71, %74 : vector<8x8xf32>
    %76 = math.exp %75 : vector<8x8xf32>
    %cst_20 = arith.constant dense<0.000000e+00> : vector<8xf32>
    %77 = vector.multi_reduction <add>, %76, %cst_20 [1] : vector<8x8xf32> to vector<8xf32>
    %78 = vector.shape_cast %77 : vector<8xf32> to vector<8x1xf32>
    %79 = tpu.reciprocal %78 {approx = true} : vector<8x1xf32> -> vector<8x1xf32>
    %80 = vector.broadcast %79 : vector<8x1xf32> to vector<8x8xf32>
    %81 = arith.mulf %76, %80 : vector<8x8xf32>
    %82 = arith.truncf %81 : vector<8x8xf32> to vector<8x8xbf16>
    %cst_21 = arith.constant dense<0.000000e+00> : vector<8x8xf32>
    %83 = tpu.matmul %82, %70, %cst_21 {dimension_numbers = #tpu.dot_dimension_numbers<[1], [0], [0], [1], [0, 0, 1, 1], [], []>} : vector<8x8xbf16>, vector<8x8xbf16>, vector<8x8xf32> -> vector<8x8xf32>
    %84 = tpu.concatenate %26, %45, %64, %83 in 1 : vector<8x8xf32>, vector<8x8xf32>, vector<8x8xf32>, vector<8x8xf32> -> vector<8x32xf32>
    %85 = arith.truncf %84 : vector<8x32xf32> to vector<8x32xbf16>
    %c0_22 = arith.constant 0 : index
    %c0_23 = arith.constant 0 : index
    %86 = vector.load %arg8[%c0_22, %c0_23] : memref<8x32xf32, #tpu.memory_space<vmem>>, vector<8x32xf32>
    %87 = vector.extract_strided_slice %86 {offsets = [0, 0], sizes = [1, 32], strides = [1, 1]} : vector<8x32xf32> to vector<1x32xf32>
    %88 = vector.extract_strided_slice %86 {offsets = [1, 0], sizes = [1, 32], strides = [1, 1]} : vector<8x32xf32> to vector<1x32xf32>
    %89 = vector.extract_strided_slice %86 {offsets = [2, 0], sizes = [1, 32], strides = [1, 1]} : vector<8x32xf32> to vector<1x32xf32>
    %90 = vector.extract_strided_slice %86 {offsets = [3, 0], sizes = [1, 32], strides = [1, 1]} : vector<8x32xf32> to vector<1x32xf32>
    %91 = vector.extract_strided_slice %86 {offsets = [4, 0], sizes = [1, 32], strides = [1, 1]} : vector<8x32xf32> to vector<1x32xf32>
    %92 = vector.extract_strided_slice %86 {offsets = [5, 0], sizes = [1, 32], strides = [1, 1]} : vector<8x32xf32> to vector<1x32xf32>
    %c0_24 = arith.constant 0 : index
    %c0_25 = arith.constant 0 : index
    %93 = vector.load %arg4[%c0_24, %c0_25] : memref<32x32xbf16, #tpu.memory_space<vmem>>, vector<32x32xbf16>
    %cst_26 = arith.constant dense<0.000000e+00> : vector<8x32xf32>
    %94 = tpu.matmul %85, %93, %cst_26 {dimension_numbers = #tpu.dot_dimension_numbers<[1], [0], [0], [1], [0, 0, 1, 1], [], []>} : vector<8x32xbf16>, vector<32x32xbf16>, vector<8x32xf32> -> vector<8x32xf32>
    %95 = vector.broadcast %87 : vector<1x32xf32> to vector<8x32xf32>
    %96 = arith.addf %94, %95 : vector<8x32xf32>
    %97 = arith.addf %1, %96 : vector<8x32xf32>
    %cst_27 = arith.constant dense<0.000000e+00> : vector<8xf32>
    %98 = vector.multi_reduction <add>, %97, %cst_27 [1] : vector<8x32xf32> to vector<8xf32>
    %99 = vector.shape_cast %98 : vector<8xf32> to vector<8x1xf32>
    %cst_28 = arith.constant 3.200000e+01 : f32
    %100 = vector.broadcast %cst_28 : f32 to vector<8x1xf32>
    %101 = arith.divf %99, %100 : vector<8x1xf32>
    %102 = vector.broadcast %101 : vector<8x1xf32> to vector<8x32xf32>
    %103 = arith.subf %97, %102 : vector<8x32xf32>
    %104 = arith.mulf %103, %103 : vector<8x32xf32>
    %cst_29 = arith.constant dense<0.000000e+00> : vector<8xf32>
    %105 = vector.multi_reduction <add>, %104, %cst_29 [1] : vector<8x32xf32> to vector<8xf32>
    %106 = vector.shape_cast %105 : vector<8xf32> to vector<8x1xf32>
    %cst_30 = arith.constant 3.200000e+01 : f32
    %107 = vector.broadcast %cst_30 : f32 to vector<8x1xf32>
    %108 = arith.divf %106, %107 : vector<8x1xf32>
    %109 = vector.broadcast %101 : vector<8x1xf32> to vector<8x32xf32>
    %110 = arith.subf %97, %109 : vector<8x32xf32>
    %cst_31 = arith.constant 9.99999974E-6 : f32
    %111 = vector.broadcast %cst_31 : f32 to vector<8x1xf32>
    %112 = arith.addf %108, %111 : vector<8x1xf32>
    %113 = math.rsqrt %112 : vector<8x1xf32>
    %114 = vector.broadcast %113 : vector<8x1xf32> to vector<8x32xf32>
    %115 = arith.mulf %110, %114 : vector<8x32xf32>
    %116 = vector.broadcast %89 : vector<1x32xf32> to vector<8x32xf32>
    %117 = arith.mulf %115, %116 : vector<8x32xf32>
    %118 = vector.broadcast %90 : vector<1x32xf32> to vector<8x32xf32>
    %119 = arith.addf %117, %118 : vector<8x32xf32>
    %120 = arith.truncf %119 : vector<8x32xf32> to vector<8x32xbf16>
    %c0_32 = arith.constant 0 : index
    %c0_33 = arith.constant 0 : index
    %121 = vector.load %arg5[%c0_32, %c0_33] : memref<32x64xbf16, #tpu.memory_space<vmem>>, vector<32x64xbf16>
    %cst_34 = arith.constant dense<0.000000e+00> : vector<8x64xf32>
    %122 = tpu.matmul %120, %121, %cst_34 {dimension_numbers = #tpu.dot_dimension_numbers<[1], [0], [0], [1], [0, 0, 1, 1], [], []>} : vector<8x32xbf16>, vector<32x64xbf16>, vector<8x64xf32> -> vector<8x64xf32>
    %c0_35 = arith.constant 0 : index
    %c0_36 = arith.constant 0 : index
    %123 = vector.load %arg6[%c0_35, %c0_36] : memref<1x64xf32, #tpu.memory_space<vmem>>, vector<1x64xf32>
    %124 = vector.broadcast %123 : vector<1x64xf32> to vector<8x64xf32>
    %125 = arith.addf %122, %124 : vector<8x64xf32>
    %cst_37 = arith.constant 0.000000e+00 : f32
    %126 = vector.broadcast %cst_37 : f32 to vector<8x64xf32>
    %127 = arith.maximumf %125, %126 : vector<8x64xf32>
    %128 = arith.truncf %127 : vector<8x64xf32> to vector<8x64xbf16>
    %c0_38 = arith.constant 0 : index
    %c0_39 = arith.constant 0 : index
    %129 = vector.load %arg7[%c0_38, %c0_39] : memref<64x32xbf16, #tpu.memory_space<vmem>>, vector<64x32xbf16>
    %cst_40 = arith.constant dense<0.000000e+00> : vector<8x32xf32>
    %130 = tpu.matmul %128, %129, %cst_40 {dimension_numbers = #tpu.dot_dimension_numbers<[1], [0], [0], [1], [0, 0, 1, 1], [], []>} : vector<8x64xbf16>, vector<64x32xbf16>, vector<8x32xf32> -> vector<8x32xf32>
    %131 = vector.broadcast %88 : vector<1x32xf32> to vector<8x32xf32>
    %132 = arith.addf %130, %131 : vector<8x32xf32>
    %133 = arith.addf %119, %132 : vector<8x32xf32>
    %cst_41 = arith.constant dense<0.000000e+00> : vector<8xf32>
    %134 = vector.multi_reduction <add>, %133, %cst_41 [1] : vector<8x32xf32> to vector<8xf32>
    %135 = vector.shape_cast %134 : vector<8xf32> to vector<8x1xf32>
    %cst_42 = arith.constant 3.200000e+01 : f32
    %136 = vector.broadcast %cst_42 : f32 to vector<8x1xf32>
    %137 = arith.divf %135, %136 : vector<8x1xf32>
    %138 = vector.broadcast %137 : vector<8x1xf32> to vector<8x32xf32>
    %139 = arith.subf %133, %138 : vector<8x32xf32>
    %140 = arith.mulf %139, %139 : vector<8x32xf32>
    %cst_43 = arith.constant dense<0.000000e+00> : vector<8xf32>
    %141 = vector.multi_reduction <add>, %140, %cst_43 [1] : vector<8x32xf32> to vector<8xf32>
    %142 = vector.shape_cast %141 : vector<8xf32> to vector<8x1xf32>
    %cst_44 = arith.constant 3.200000e+01 : f32
    %143 = vector.broadcast %cst_44 : f32 to vector<8x1xf32>
    %144 = arith.divf %142, %143 : vector<8x1xf32>
    %145 = vector.broadcast %137 : vector<8x1xf32> to vector<8x32xf32>
    %146 = arith.subf %133, %145 : vector<8x32xf32>
    %cst_45 = arith.constant 9.99999974E-6 : f32
    %147 = vector.broadcast %cst_45 : f32 to vector<8x1xf32>
    %148 = arith.addf %144, %147 : vector<8x1xf32>
    %149 = math.rsqrt %148 : vector<8x1xf32>
    %150 = vector.broadcast %149 : vector<8x1xf32> to vector<8x32xf32>
    %151 = arith.mulf %146, %150 : vector<8x32xf32>
    %152 = vector.broadcast %91 : vector<1x32xf32> to vector<8x32xf32>
    %153 = arith.mulf %151, %152 : vector<8x32xf32>
    %154 = vector.broadcast %92 : vector<1x32xf32> to vector<8x32xf32>
    %155 = arith.addf %153, %154 : vector<8x32xf32>
    %c1_i32 = arith.constant 1 : i32
    %156 = arith.truncf %155 : vector<8x32xf32> to vector<8x32xbf16>
    %c0_46 = arith.constant 0 : index
    %c0_47 = arith.constant 0 : index
    %157 = vector.load %arg2[%c0_46, %c0_47] : memref<32x96xbf16, #tpu.memory_space<vmem>>, vector<32x96xbf16>
    %cst_48 = arith.constant dense<0.000000e+00> : vector<8x96xf32>
    %158 = tpu.matmul %156, %157, %cst_48 {dimension_numbers = #tpu.dot_dimension_numbers<[1], [0], [0], [1], [0, 0, 1, 1], [], []>} : vector<8x32xbf16>, vector<32x96xbf16>, vector<8x96xf32> -> vector<8x96xf32>
    %c0_49 = arith.constant 0 : index
    %c0_50 = arith.constant 0 : index
    %159 = vector.load %arg3[%c0_49, %c0_50] : memref<1x96xf32, #tpu.memory_space<vmem>>, vector<1x96xf32>
    %160 = vector.broadcast %159 : vector<1x96xf32> to vector<8x96xf32>
    %161 = arith.addf %158, %160 : vector<8x96xf32>
    %162 = vector.extract_strided_slice %161 {offsets = [0, 0], sizes = [8, 8], strides = [1, 1]} : vector<8x96xf32> to vector<8x8xf32>
    %163 = arith.truncf %162 : vector<8x8xf32> to vector<8x8xbf16>
    %164 = vector.extract_strided_slice %161 {offsets = [0, 32], sizes = [8, 8], strides = [1, 1]} : vector<8x96xf32> to vector<8x8xf32>
    %165 = arith.truncf %164 : vector<8x8xf32> to vector<8x8xbf16>
    %166 = vector.extract_strided_slice %161 {offsets = [0, 64], sizes = [8, 8], strides = [1, 1]} : vector<8x96xf32> to vector<8x8xf32>
    %167 = arith.truncf %166 : vector<8x8xf32> to vector<8x8xbf16>
    "tpu.trace_start"() <{level = 10 : i32, message = "qd,kd->qk"}> : () -> ()
    %cst_51 = arith.constant dense<0.000000e+00> : vector<8x8xf32>
    %168 = tpu.matmul %163, %165, %cst_51 {dimension_numbers = #tpu.dot_dimension_numbers<[1], [1], [0], [0], [0, 0, 1, 0], [], []>} : vector<8x8xbf16>, vector<8x8xbf16>, vector<8x8xf32> -> vector<8x8xf32>
    "tpu.trace_stop"() : () -> ()
    %cst_52 = arith.constant dense<0xFF800000> : vector<8xf32>
    %169 = vector.multi_reduction <maximumf>, %168, %cst_52 [1] : vector<8x8xf32> to vector<8xf32>
    %170 = vector.shape_cast %169 : vector<8xf32> to vector<8x1xf32>
    %171 = vector.broadcast %170 : vector<8x1xf32> to vector<8x8xf32>
    %172 = arith.subf %168, %171 : vector<8x8xf32>
    %173 = math.exp %172 : vector<8x8xf32>
    %cst_53 = arith.constant dense<0.000000e+00> : vector<8xf32>
    %174 = vector.multi_reduction <add>, %173, %cst_53 [1] : vector<8x8xf32> to vector<8xf32>
    %175 = vector.shape_cast %174 : vector<8xf32> to vector<8x1xf32>
    %176 = tpu.reciprocal %175 {approx = true} : vector<8x1xf32> -> vector<8x1xf32>
    %177 = vector.broadcast %176 : vector<8x1xf32> to vector<8x8xf32>
    %178 = arith.mulf %173, %177 : vector<8x8xf32>
    %179 = arith.truncf %178 : vector<8x8xf32> to vector<8x8xbf16>
    %cst_54 = arith.constant dense<0.000000e+00> : vector<8x8xf32>
    %180 = tpu.matmul %179, %167, %cst_54 {dimension_numbers = #tpu.dot_dimension_numbers<[1], [0], [0], [1], [0, 0, 1, 1], [], []>} : vector<8x8xbf16>, vector<8x8xbf16>, vector<8x8xf32> -> vector<8x8xf32>
    %181 = vector.extract_strided_slice %161 {offsets = [0, 8], sizes = [8, 8], strides = [1, 1]} : vector<8x96xf32> to vector<8x8xf32>
    %182 = arith.truncf %181 : vector<8x8xf32> to vector<8x8xbf16>
    %183 = vector.extract_strided_slice %161 {offsets = [0, 40], sizes = [8, 8], strides = [1, 1]} : vector<8x96xf32> to vector<8x8xf32>
    %184 = arith.truncf %183 : vector<8x8xf32> to vector<8x8xbf16>
    %185 = vector.extract_strided_slice %161 {offsets = [0, 72], sizes = [8, 8], strides = [1, 1]} : vector<8x96xf32> to vector<8x8xf32>
    %186 = arith.truncf %185 : vector<8x8xf32> to vector<8x8xbf16>
    "tpu.trace_start"() <{level = 10 : i32, message = "qd,kd->qk"}> : () -> ()
    %cst_55 = arith.constant dense<0.000000e+00> : vector<8x8xf32>
    %187 = tpu.matmul %182, %184, %cst_55 {dimension_numbers = #tpu.dot_dimension_numbers<[1], [1], [0], [0], [0, 0, 1, 0], [], []>} : vector<8x8xbf16>, vector<8x8xbf16>, vector<8x8xf32> -> vector<8x8xf32>
    "tpu.trace_stop"() : () -> ()
    %cst_56 = arith.constant dense<0xFF800000> : vector<8xf32>
    %188 = vector.multi_reduction <maximumf>, %187, %cst_56 [1] : vector<8x8xf32> to vector<8xf32>
    %189 = vector.shape_cast %188 : vector<8xf32> to vector<8x1xf32>
    %190 = vector.broadcast %189 : vector<8x1xf32> to vector<8x8xf32>
    %191 = arith.subf %187, %190 : vector<8x8xf32>
    %192 = math.exp %191 : vector<8x8xf32>
    %cst_57 = arith.constant dense<0.000000e+00> : vector<8xf32>
    %193 = vector.multi_reduction <add>, %192, %cst_57 [1] : vector<8x8xf32> to vector<8xf32>
    %194 = vector.shape_cast %193 : vector<8xf32> to vector<8x1xf32>
    %195 = tpu.reciprocal %194 {approx = true} : vector<8x1xf32> -> vector<8x1xf32>
    %196 = vector.broadcast %195 : vector<8x1xf32> to vector<8x8xf32>
    %197 = arith.mulf %192, %196 : vector<8x8xf32>
    %198 = arith.truncf %197 : vector<8x8xf32> to vector<8x8xbf16>
    %cst_58 = arith.constant dense<0.000000e+00> : vector<8x8xf32>
    %199 = tpu.matmul %198, %186, %cst_58 {dimension_numbers = #tpu.dot_dimension_numbers<[1], [0], [0], [1], [0, 0, 1, 1], [], []>} : vector<8x8xbf16>, vector<8x8xbf16>, vector<8x8xf32> -> vector<8x8xf32>
    %200 = vector.extract_strided_slice %161 {offsets = [0, 16], sizes = [8, 8], strides = [1, 1]} : vector<8x96xf32> to vector<8x8xf32>
    %201 = arith.truncf %200 : vector<8x8xf32> to vector<8x8xbf16>
    %202 = vector.extract_strided_slice %161 {offsets = [0, 48], sizes = [8, 8], strides = [1, 1]} : vector<8x96xf32> to vector<8x8xf32>
    %203 = arith.truncf %202 : vector<8x8xf32> to vector<8x8xbf16>
    %204 = vector.extract_strided_slice %161 {offsets = [0, 80], sizes = [8, 8], strides = [1, 1]} : vector<8x96xf32> to vector<8x8xf32>
    %205 = arith.truncf %204 : vector<8x8xf32> to vector<8x8xbf16>
    "tpu.trace_start"() <{level = 10 : i32, message = "qd,kd->qk"}> : () -> ()
    %cst_59 = arith.constant dense<0.000000e+00> : vector<8x8xf32>
    %206 = tpu.matmul %201, %203, %cst_59 {dimension_numbers = #tpu.dot_dimension_numbers<[1], [1], [0], [0], [0, 0, 1, 0], [], []>} : vector<8x8xbf16>, vector<8x8xbf16>, vector<8x8xf32> -> vector<8x8xf32>
    "tpu.trace_stop"() : () -> ()
    %cst_60 = arith.constant dense<0xFF800000> : vector<8xf32>
    %207 = vector.multi_reduction <maximumf>, %206, %cst_60 [1] : vector<8x8xf32> to vector<8xf32>
    %208 = vector.shape_cast %207 : vector<8xf32> to vector<8x1xf32>
    %209 = vector.broadcast %208 : vector<8x1xf32> to vector<8x8xf32>
    %210 = arith.subf %206, %209 : vector<8x8xf32>
    %211 = math.exp %210 : vector<8x8xf32>
    %cst_61 = arith.constant dense<0.000000e+00> : vector<8xf32>
    %212 = vector.multi_reduction <add>, %211, %cst_61 [1] : vector<8x8xf32> to vector<8xf32>
    %213 = vector.shape_cast %212 : vector<8xf32> to vector<8x1xf32>
    %214 = tpu.reciprocal %213 {approx = true} : vector<8x1xf32> -> vector<8x1xf32>
    %215 = vector.broadcast %214 : vector<8x1xf32> to vector<8x8xf32>
    %216 = arith.mulf %211, %215 : vector<8x8xf32>
    %217 = arith.truncf %216 : vector<8x8xf32> to vector<8x8xbf16>
    %cst_62 = arith.constant dense<0.000000e+00> : vector<8x8xf32>
    %218 = tpu.matmul %217, %205, %cst_62 {dimension_numbers = #tpu.dot_dimension_numbers<[1], [0], [0], [1], [0, 0, 1, 1], [], []>} : vector<8x8xbf16>, vector<8x8xbf16>, vector<8x8xf32> -> vector<8x8xf32>
    %219 = vector.extract_strided_slice %161 {offsets = [0, 24], sizes = [8, 8], strides = [1, 1]} : vector<8x96xf32> to vector<8x8xf32>
    %220 = arith.truncf %219 : vector<8x8xf32> to vector<8x8xbf16>
    %221 = vector.extract_strided_slice %161 {offsets = [0, 56], sizes = [8, 8], strides = [1, 1]} : vector<8x96xf32> to vector<8x8xf32>
    %222 = arith.truncf %221 : vector<8x8xf32> to vector<8x8xbf16>
    %223 = vector.extract_strided_slice %161 {offsets = [0, 88], sizes = [8, 8], strides = [1, 1]} : vector<8x96xf32> to vector<8x8xf32>
    %224 = arith.truncf %223 : vector<8x8xf32> to vector<8x8xbf16>
    "tpu.trace_start"() <{level = 10 : i32, message = "qd,kd->qk"}> : () -> ()
    %cst_63 = arith.constant dense<0.000000e+00> : vector<8x8xf32>
    %225 = tpu.matmul %220, %222, %cst_63 {dimension_numbers = #tpu.dot_dimension_numbers<[1], [1], [0], [0], [0, 0, 1, 0], [], []>} : vector<8x8xbf16>, vector<8x8xbf16>, vector<8x8xf32> -> vector<8x8xf32>
    "tpu.trace_stop"() : () -> ()
    %cst_64 = arith.constant dense<0xFF800000> : vector<8xf32>
    %226 = vector.multi_reduction <maximumf>, %225, %cst_64 [1] : vector<8x8xf32> to vector<8xf32>
    %227 = vector.shape_cast %226 : vector<8xf32> to vector<8x1xf32>
    %228 = vector.broadcast %227 : vector<8x1xf32> to vector<8x8xf32>
    %229 = arith.subf %225, %228 : vector<8x8xf32>
    %230 = math.exp %229 : vector<8x8xf32>
    %cst_65 = arith.constant dense<0.000000e+00> : vector<8xf32>
    %231 = vector.multi_reduction <add>, %230, %cst_65 [1] : vector<8x8xf32> to vector<8xf32>
    %232 = vector.shape_cast %231 : vector<8xf32> to vector<8x1xf32>
    %233 = tpu.reciprocal %232 {approx = true} : vector<8x1xf32> -> vector<8x1xf32>
    %234 = vector.broadcast %233 : vector<8x1xf32> to vector<8x8xf32>
    %235 = arith.mulf %230, %234 : vector<8x8xf32>
    %236 = arith.truncf %235 : vector<8x8xf32> to vector<8x8xbf16>
    %cst_66 = arith.constant dense<0.000000e+00> : vector<8x8xf32>
    %237 = tpu.matmul %236, %224, %cst_66 {dimension_numbers = #tpu.dot_dimension_numbers<[1], [0], [0], [1], [0, 0, 1, 1], [], []>} : vector<8x8xbf16>, vector<8x8xbf16>, vector<8x8xf32> -> vector<8x8xf32>
    %238 = tpu.concatenate %180, %199, %218, %237 in 1 : vector<8x8xf32>, vector<8x8xf32>, vector<8x8xf32>, vector<8x8xf32> -> vector<8x32xf32>
    %239 = arith.truncf %238 : vector<8x32xf32> to vector<8x32xbf16>
    %c0_67 = arith.constant 0 : index
    %c0_68 = arith.constant 0 : index
    %240 = vector.load %arg8[%c0_67, %c0_68] : memref<8x32xf32, #tpu.memory_space<vmem>>, vector<8x32xf32>
    %241 = vector.extract_strided_slice %240 {offsets = [0, 0], sizes = [1, 32], strides = [1, 1]} : vector<8x32xf32> to vector<1x32xf32>
    %242 = vector.extract_strided_slice %240 {offsets = [1, 0], sizes = [1, 32], strides = [1, 1]} : vector<8x32xf32> to vector<1x32xf32>
    %243 = vector.extract_strided_slice %240 {offsets = [2, 0], sizes = [1, 32], strides = [1, 1]} : vector<8x32xf32> to vector<1x32xf32>
    %244 = vector.extract_strided_slice %240 {offsets = [3, 0], sizes = [1, 32], strides = [1, 1]} : vector<8x32xf32> to vector<1x32xf32>
    %245 = vector.extract_strided_slice %240 {offsets = [4, 0], sizes = [1, 32], strides = [1, 1]} : vector<8x32xf32> to vector<1x32xf32>
    %246 = vector.extract_strided_slice %240 {offsets = [5, 0], sizes = [1, 32], strides = [1, 1]} : vector<8x32xf32> to vector<1x32xf32>
    %c0_69 = arith.constant 0 : index
    %c0_70 = arith.constant 0 : index
    %247 = vector.load %arg4[%c0_69, %c0_70] : memref<32x32xbf16, #tpu.memory_space<vmem>>, vector<32x32xbf16>
    %cst_71 = arith.constant dense<0.000000e+00> : vector<8x32xf32>
    %248 = tpu.matmul %239, %247, %cst_71 {dimension_numbers = #tpu.dot_dimension_numbers<[1], [0], [0], [1], [0, 0, 1, 1], [], []>} : vector<8x32xbf16>, vector<32x32xbf16>, vector<8x32xf32> -> vector<8x32xf32>
    %249 = vector.broadcast %241 : vector<1x32xf32> to vector<8x32xf32>
    %250 = arith.addf %248, %249 : vector<8x32xf32>
    %251 = arith.addf %155, %250 : vector<8x32xf32>
    %cst_72 = arith.constant dense<0.000000e+00> : vector<8xf32>
    %252 = vector.multi_reduction <add>, %251, %cst_72 [1] : vector<8x32xf32> to vector<8xf32>
    %253 = vector.shape_cast %252 : vector<8xf32> to vector<8x1xf32>
    %cst_73 = arith.constant 3.200000e+01 : f32
    %254 = vector.broadcast %cst_73 : f32 to vector<8x1xf32>
    %255 = arith.divf %253, %254 : vector<8x1xf32>
    %256 = vector.broadcast %255 : vector<8x1xf32> to vector<8x32xf32>
    %257 = arith.subf %251, %256 : vector<8x32xf32>
    %258 = arith.mulf %257, %257 : vector<8x32xf32>
    %cst_74 = arith.constant dense<0.000000e+00> : vector<8xf32>
    %259 = vector.multi_reduction <add>, %258, %cst_74 [1] : vector<8x32xf32> to vector<8xf32>
    %260 = vector.shape_cast %259 : vector<8xf32> to vector<8x1xf32>
    %cst_75 = arith.constant 3.200000e+01 : f32
    %261 = vector.broadcast %cst_75 : f32 to vector<8x1xf32>
    %262 = arith.divf %260, %261 : vector<8x1xf32>
    %263 = vector.broadcast %255 : vector<8x1xf32> to vector<8x32xf32>
    %264 = arith.subf %251, %263 : vector<8x32xf32>
    %cst_76 = arith.constant 9.99999974E-6 : f32
    %265 = vector.broadcast %cst_76 : f32 to vector<8x1xf32>
    %266 = arith.addf %262, %265 : vector<8x1xf32>
    %267 = math.rsqrt %266 : vector<8x1xf32>
    %268 = vector.broadcast %267 : vector<8x1xf32> to vector<8x32xf32>
    %269 = arith.mulf %264, %268 : vector<8x32xf32>
    %270 = vector.broadcast %243 : vector<1x32xf32> to vector<8x32xf32>
    %271 = arith.mulf %269, %270 : vector<8x32xf32>
    %272 = vector.broadcast %244 : vector<1x32xf32> to vector<8x32xf32>
    %273 = arith.addf %271, %272 : vector<8x32xf32>
    %274 = arith.truncf %273 : vector<8x32xf32> to vector<8x32xbf16>
    %c0_77 = arith.constant 0 : index
    %c0_78 = arith.constant 0 : index
    %275 = vector.load %arg5[%c0_77, %c0_78] : memref<32x64xbf16, #tpu.memory_space<vmem>>, vector<32x64xbf16>
    %cst_79 = arith.constant dense<0.000000e+00> : vector<8x64xf32>
    %276 = tpu.matmul %274, %275, %cst_79 {dimension_numbers = #tpu.dot_dimension_numbers<[1], [0], [0], [1], [0, 0, 1, 1], [], []>} : vector<8x32xbf16>, vector<32x64xbf16>, vector<8x64xf32> -> vector<8x64xf32>
    %c0_80 = arith.constant 0 : index
    %c0_81 = arith.constant 0 : index
    %277 = vector.load %arg6[%c0_80, %c0_81] : memref<1x64xf32, #tpu.memory_space<vmem>>, vector<1x64xf32>
    %278 = vector.broadcast %277 : vector<1x64xf32> to vector<8x64xf32>
    %279 = arith.addf %276, %278 : vector<8x64xf32>
    %cst_82 = arith.constant 0.000000e+00 : f32
    %280 = vector.broadcast %cst_82 : f32 to vector<8x64xf32>
    %281 = arith.maximumf %279, %280 : vector<8x64xf32>
    %282 = arith.truncf %281 : vector<8x64xf32> to vector<8x64xbf16>
    %c0_83 = arith.constant 0 : index
    %c0_84 = arith.constant 0 : index
    %283 = vector.load %arg7[%c0_83, %c0_84] : memref<64x32xbf16, #tpu.memory_space<vmem>>, vector<64x32xbf16>
    %cst_85 = arith.constant dense<0.000000e+00> : vector<8x32xf32>
    %284 = tpu.matmul %282, %283, %cst_85 {dimension_numbers = #tpu.dot_dimension_numbers<[1], [0], [0], [1], [0, 0, 1, 1], [], []>} : vector<8x64xbf16>, vector<64x32xbf16>, vector<8x32xf32> -> vector<8x32xf32>
    %285 = vector.broadcast %242 : vector<1x32xf32> to vector<8x32xf32>
    %286 = arith.addf %284, %285 : vector<8x32xf32>
    %287 = arith.addf %273, %286 : vector<8x32xf32>
    %cst_86 = arith.constant dense<0.000000e+00> : vector<8xf32>
    %288 = vector.multi_reduction <add>, %287, %cst_86 [1] : vector<8x32xf32> to vector<8xf32>
    %289 = vector.shape_cast %288 : vector<8xf32> to vector<8x1xf32>
    %cst_87 = arith.constant 3.200000e+01 : f32
    %290 = vector.broadcast %cst_87 : f32 to vector<8x1xf32>
    %291 = arith.divf %289, %290 : vector<8x1xf32>
    %292 = vector.broadcast %291 : vector<8x1xf32> to vector<8x32xf32>
    %293 = arith.subf %287, %292 : vector<8x32xf32>
    %294 = arith.mulf %293, %293 : vector<8x32xf32>
    %cst_88 = arith.constant dense<0.000000e+00> : vector<8xf32>
    %295 = vector.multi_reduction <add>, %294, %cst_88 [1] : vector<8x32xf32> to vector<8xf32>
    %296 = vector.shape_cast %295 : vector<8xf32> to vector<8x1xf32>
    %cst_89 = arith.constant 3.200000e+01 : f32
    %297 = vector.broadcast %cst_89 : f32 to vector<8x1xf32>
    %298 = arith.divf %296, %297 : vector<8x1xf32>
    %299 = vector.broadcast %291 : vector<8x1xf32> to vector<8x32xf32>
    %300 = arith.subf %287, %299 : vector<8x32xf32>
    %cst_90 = arith.constant 9.99999974E-6 : f32
    %301 = vector.broadcast %cst_90 : f32 to vector<8x1xf32>
    %302 = arith.addf %298, %301 : vector<8x1xf32>
    %303 = math.rsqrt %302 : vector<8x1xf32>
    %304 = vector.broadcast %303 : vector<8x1xf32> to vector<8x32xf32>
    %305 = arith.mulf %300, %304 : vector<8x32xf32>
    %306 = vector.broadcast %245 : vector<1x32xf32> to vector<8x32xf32>
    %307 = arith.mulf %305, %306 : vector<8x32xf32>
    %308 = vector.broadcast %246 : vector<1x32xf32> to vector<8x32xf32>
    %309 = arith.addf %307, %308 : vector<8x32xf32>
    %c0_91 = arith.constant 0 : index
    %c0_92 = arith.constant 0 : index
    %310 = vector.load %arg8[%c0_91, %c0_92] : memref<8x32xf32, #tpu.memory_space<vmem>>, vector<8x32xf32>
    %311 = vector.extract_strided_slice %310 {offsets = [6, 0], sizes = [1, 32], strides = [1, 1]} : vector<8x32xf32> to vector<1x32xf32>
    %312 = vector.extract_strided_slice %310 {offsets = [7, 0], sizes = [1, 32], strides = [1, 1]} : vector<8x32xf32> to vector<1x32xf32>
    %cst_93 = arith.constant dense<0.000000e+00> : vector<8xf32>
    %313 = vector.multi_reduction <add>, %309, %cst_93 [1] : vector<8x32xf32> to vector<8xf32>
    %314 = vector.shape_cast %313 : vector<8xf32> to vector<8x1xf32>
    %cst_94 = arith.constant 3.200000e+01 : f32
    %315 = vector.broadcast %cst_94 : f32 to vector<8x1xf32>
    %316 = arith.divf %314, %315 : vector<8x1xf32>
    %317 = vector.broadcast %316 : vector<8x1xf32> to vector<8x32xf32>
    %318 = arith.subf %309, %317 : vector<8x32xf32>
    %319 = arith.mulf %318, %318 : vector<8x32xf32>
    %cst_95 = arith.constant dense<0.000000e+00> : vector<8xf32>
    %320 = vector.multi_reduction <add>, %319, %cst_95 [1] : vector<8x32xf32> to vector<8xf32>
    %321 = vector.shape_cast %320 : vector<8xf32> to vector<8x1xf32>
    %cst_96 = arith.constant 3.200000e+01 : f32
    %322 = vector.broadcast %cst_96 : f32 to vector<8x1xf32>
    %323 = arith.divf %321, %322 : vector<8x1xf32>
    %324 = vector.broadcast %316 : vector<8x1xf32> to vector<8x32xf32>
    %325 = arith.subf %309, %324 : vector<8x32xf32>
    %cst_97 = arith.constant 9.99999974E-6 : f32
    %326 = vector.broadcast %cst_97 : f32 to vector<8x1xf32>
    %327 = arith.addf %323, %326 : vector<8x1xf32>
    %328 = math.rsqrt %327 : vector<8x1xf32>
    %329 = vector.broadcast %328 : vector<8x1xf32> to vector<8x32xf32>
    %330 = arith.mulf %325, %329 : vector<8x32xf32>
    %331 = vector.broadcast %311 : vector<1x32xf32> to vector<8x32xf32>
    %332 = arith.mulf %330, %331 : vector<8x32xf32>
    %333 = vector.broadcast %312 : vector<1x32xf32> to vector<8x32xf32>
    %334 = arith.addf %332, %333 : vector<8x32xf32>
    %c0_98 = arith.constant 0 : index
    %c0_99 = arith.constant 0 : index
    %c0_100 = arith.constant 0 : index
    %335 = vector.load %arg9[%c0_98, %c0_99, %c0_100] : memref<1x8x32xf32, #tpu.memory_space<vmem>>, vector<1x8x32xf32>
    %336 = vector.shape_cast %335 : vector<1x8x32xf32> to vector<8x32xf32>
    %337 = vector.shape_cast %334 : vector<8x32xf32> to vector<1x8x32xf32>
    tpu.vector_store %arg9[%c0_98, %c0_99, %c0_100], %337 {strides = array<i32>} : memref<1x8x32xf32, #tpu.memory_space<vmem>>, vector<1x8x32xf32>,
    return
  }
  func.func @transform_0(%arg0: i32) -> (i32, i32, i32) {
    %c0_i32 = arith.constant 0 : i32
    %c0_i32_0 = arith.constant 0 : i32
    %c0_i32_1 = arith.constant 0 : i32
    return %arg0, %c0_i32, %c0_i32_0 : i32, i32, i32
  }
  func.func @transform_1(%arg0: i32) -> (i32, i32) {
    %c0_i32 = arith.constant 0 : i32
    %c0_i32_0 = arith.constant 0 : i32
    %c0_i32_1 = arith.constant 0 : i32
    return %c0_i32, %c0_i32_0 : i32, i32
  }
  func.func @transform_2(%arg0: i32) -> (i32, i32) {
    %c0_i32 = arith.constant 0 : i32
    %c0_i32_0 = arith.constant 0 : i32
    %c0_i32_1 = arith.constant 0 : i32
    return %c0_i32, %c0_i32_0 : i32, i32
  }
  func.func @transform_3(%arg0: i32) -> (i32, i32) {
    %c0_i32 = arith.constant 0 : i32
    %c0_i32_0 = arith.constant 0 : i32
    %c0_i32_1 = arith.constant 0 : i32
    return %c0_i32, %c0_i32_0 : i32, i32
  }
  func.func @transform_4(%arg0: i32) -> (i32, i32) {
    %c0_i32 = arith.constant 0 : i32
    %c0_i32_0 = arith.constant 0 : i32
    %c0_i32_1 = arith.constant 0 : i32
    return %c0_i32, %c0_i32_0 : i32, i32
  }
  func.func @transform_5(%arg0: i32) -> (i32, i32) {
    %c0_i32 = arith.constant 0 : i32
    %c0_i32_0 = arith.constant 0 : i32
    %c0_i32_1 = arith.constant 0 : i32
    return %c0_i32, %c0_i32_0 : i32, i32
  }
  func.func @transform_6(%arg0: i32) -> (i32, i32) {
    %c0_i32 = arith.constant 0 : i32
    %c0_i32_0 = arith.constant 0 : i32
    %c0_i32_1 = arith.constant 0 : i32
    return %c0_i32, %c0_i32_0 : i32, i32
  }
  func.func @transform_7(%arg0: i32) -> (i32, i32) {
    %c0_i32 = arith.constant 0 : i32
    %c0_i32_0 = arith.constant 0 : i32
    %c0_i32_1 = arith.constant 0 : i32
    return %c0_i32, %c0_i32_0 : i32, i32
  }
  func.func @transform_8(%arg0: i32) -> (i32, i32, i32) {
    %c0_i32 = arith.constant 0 : i32
    %c0_i32_0 = arith.constant 0 : i32
    %c0_i32_1 = arith.constant 0 : i32
    return %arg0, %c0_i32, %c0_i32_0 : i32, i32, i32
  }
}

</mosaic_0001>

<bundles_post_ra>
// kernel: tpu_custom_call.1
= control target key start
LH: loop header
LB: loop body
LE: loop exit
PB: predicated region body
PF: predicated region fallthrough
CT: control target
= control target key end

     0   :  { %13 = vsyncpa [#allocation3], 0  ;;  %s3098_s0 = inlined_call_operand.vmem [shape: f32[2,8,32], index: 0, kind: input, shape index: {}]   ;;  %s3099_s1 = inlined_call_operand.vmem [shape: bf16[32,96], index: 1, kind: input, shape index: {}]   ;;  %s3100_s2 = inlined_call_operand.vmem [shape: f32[1,96], index: 2, kind: input, shape index: {}]   ;;  %s3101_s3 = inlined_call_operand.vmem [shape: bf16[32,32], index: 3, kind: input, shape index: {}]   ;;  %s3102_s4 = inlined_call_operand.hbm [shape: bf16[32,64], index: 4, kind: input, shape index: {}]   ;;  %s3103_s5 = inlined_call_operand.hbm [shape: f32[1,64], index: 5, kind: input, shape index: {}]   ;;  %s3104_s6 = inlined_call_operand.vmem [shape: bf16[64,32], index: 6, kind: input, shape index: {}]   ;;  %s3105_s7 = inlined_call_operand.vmem [shape: f32[8,32], index: 7, kind: input, shape index: {}]   ;;  %s3106_s8 = inlined_call_operand.hbm [shape: f32[2,8,32], index: 8, kind: output, shape index: {}]  }
   0x1   :  { %14 = vsyncpa [#allocation6], 0 }
   0x2   :  { %15 = vsyncpa [#allocation4], 0 }
   0x3   :  { %17 = vsyncpa [#allocation4 + $0x1], 0  ;;  %s2641_s27 = smov 0   ;;  %s2643_s28 = smov 0  }
   0x4   :  { %s2645_s29 = smov 0   ;;  %s2647_s30 = smov 0  }
   0x5 LB: > { %s2662_s9 = sadd.s32 4294967295, %s2573_s30   ;;  %s2023_s10 = sadd.s32 4294967294, %s2573_s30   ;;  %s2573_s30 = sphi %s2647_s30, %s3129_s30   ;;  %s2569_s29 = sphi %s2645_s29, %s3128_s29   ;;  %s2565_s28 = sphi %s2643_s28, %s3127_s28   ;;  %s2561_s27 = sphi %s2641_s27, %s3126_s27  }
   0x6   : > { %s2666_s11 = sadd.s32 1, %s2573_s30   ;;  %s203_s12 = sadd.s32 1, %s2569_s29 }
   0x7   : > { %s200_s13 = ssub.s32 %s2573_s30, %s2666_s11  ;;  %p213_p0 = scmp.ne.s32.totalorder %s2569_s29, %s2565_s28 }
   0x8   : > { %p201_p1 = scmp.eq.s32.totalorder %s200_s13, 0  ;;  %p214_p2 = scmp.eq.s32.totalorder %s2662_s9, 1 }
   0x9   : > { %p219_p3 = scmp.ne.s32.totalorder %s2565_s28, %s2561_s27  ;;  %p220_p4 = scmp.eq.s32.totalorder %s2023_s10, 1 }
   0xa   : > { %s2677_s14 = scalar_select %p201_p1, %s2569_s29, %s203_s12  }
   0xb   : > { %p2679_p5 = por %p214_p2, %p213_p0  ;;  %p2683_p6 = por %p220_p4, %p219_p3 }
   0xc   : > { %p2024_p7 = scmp.ge.s32.totalorder %s2573_s30, 1  ;;  %p227_p8 = scmp.lt.s32.totalorder %s2573_s30, 3 }
   0xd   : > { %p3107_p9 = scmp.eq.s32.totalorder %s2662_s9, 0  ;;  %s2575_s18 = smov [#allocation2]  }
   0xe   : > { %p2690_p10 = pnand %p2024_p7, %p227_p8  ;;  %s248_s19 = sshll.u32 %s2575_s18, 4  ;;  %s249_s19 = int_to_ptr.vmem [resolvable:$true] %s248_s19 }
   0xf   : > { %s2576_s21 = smov [#allocation5]   ;;  %s2464_s23 = scalar_lea.vmem %s249_s19, 256 }
  0x10   : > { %p2323_p11 = pneg %p2690_p10  ;;  %s262_s22 = sshll.u32 %s2576_s21, 4  ;;  %s263_s22 = int_to_ptr.vmem [resolvable:$true] %s262_s22 }
  0x11   : > { %p2465_p0 = scmp.ne.s32.totalorder %s249_s19, %s2464_s23  ;;  %p2472_p3 = scmp.lt.s32.totalorder %s249_s19, %s249_s19 }
  0x12   : > { %p2698_p12 = pnand %p3107_p9, %p2323_p11  ;;  %p2473_p4 = scmp.lt.s32.totalorder %s2464_s23, %s2464_s23 }
  0x14   : > { %p2455_p13 = pneg %p2698_p12  ;;  %p2474_p7 = por %p2473_p4, %p2472_p3 }
  0x16   : > { %p2467_p1 = pnand %p2465_p0, %p2455_p13 }
  0x18   : > { %p2468_p2 = pneg %p2467_p1 }
  0x1a   : > { %p2475_p8 = pnand %p2474_p7, %p2468_p2 }
  0x1c   : > { %2478 = shalt.err (!%p2475_p8)
}
  0x1d   : > { %s2577_s24 = smov 64   ;;  %s2578_s25 = smov 4  }
  0x1e   : > { %2326 = dma.hbm_to_vmem [thread:$0]  (!%p2698_p12), %s3102_s4, 256, %s249_s19, [#allocation3], %s2577_s24, %s2577_s24, %s2578_s25  }
  0x1f   : > { %s2490_s12 = scalar_lea.vmem %s263_s22, 16  ;;  %s2497_s13 = scalar_lea.vmem %s263_s22, 32 }
  0x20   : > { %p2491_p11 = scmp.ne.s32.totalorder %s263_s22, %s2490_s12  ;;  %p2498_p9 = scmp.lt.s32.totalorder %s263_s22, %s263_s22 }
  0x21   : > { %p2499_p3 = scmp.lt.s32.totalorder %s2497_s13, %s2490_s12 }
  0x22   : > { %p2493_p0 = pnand %p2491_p11, %p2455_p13 }
  0x23   : > { %p2500_p2 = por %p2499_p3, %p2498_p9 }
  0x24   : > { %p2494_p1 = pneg %p2493_p0 }
  0x26   : > { %p2501_p4 = pnand %p2500_p2, %p2494_p1 }
  0x28   : > { %2504 = shalt.err (!%p2501_p4)
}
  0x29   : > { %2329 = dma.hbm_to_vmem [thread:$0]  (!%p2698_p12), %s3103_s5, 16, %s263_s22, [#allocation6]  }
  0x2a   : > { %288 = sbr.rel (%p2690_p10) target bundleno = 5204 (0x1454), region = 52  ;;  %p3117_p7 = scmp.eq.s32.totalorder (!%p2690_p10), %s2662_s9, 0 }
  0x2f   : > { %2548 = dma.done.wait (%p3117_p7), [#allocation3], 256   ;;  %p3118_p13 = pmov %p3117_p7 }
  0x30   : > { %p3119_p8 = pmov %p3117_p7 }
  0x31   : > { %2550 = vsyncadd (%p3118_p13), [#allocation3], 4294967040 }
  0x32   : > { %2552 = dma.done.wait (%p3119_p8), [#allocation6], 16   ;;  %p3120_p9 = pmov %p3117_p7 }
  0x33   : > { %p325_p11 = scmp.lt.s32.totalorder %s2662_s9, 1  ;;  %v2579_v0 = vmov 0.0   ;;  %vm2580_vm0 = vmmov 0   ;;  %v2391_v1 = vld [vmem:[%s3099_s1 + $0x8] sm:$0xff]   ;;  %v2392_v2 = vld [vmem:[%s3099_s1] sm:$0xff]   ;;  %vm355_vm1 = vcmask 261120  }
  0x34   : > { %2554 = vsyncadd (%p3120_p9), [#allocation6], 4294967280  ;;  %2145 = vmatprep.subr.bf16.mxu1 %v2579_v0  ;;  %2149 = vmatprep.mubr.msk.bf16.mxu1 %vm2580_vm0, %v2579_v0  ;;  %v2759_v5 = vld [vmem:[%s3100_s2] ss:$0 sm:$0xff]  ;;  %s2581_s18 = smov 120   ;;  %s2582_s21 = smov 96  }
  0x35   : > { %s326_s17 = scalar_select %p325_p11, %s2662_s9, 1  ;;  %2159 = vmatprep.subr.bf16.mxu0 %v2579_v0  ;;  %2161 = vmatprep.mubr.msk.bf16.mxu0 %vm2580_vm0, %v2579_v0  ;;  %vm403_vm2 = vcmask 64512   ;;  %vm467_vm3 = vcmask 1043456   ;;  %vm854_vm4 = vcmask 130048   ;;  %vm856_vm5 = vcmask 195584  }
  0x36   : > { %2146 = vmatpush3.bf16.msra.mxu1 %v2391_v1  ;;  %s2585_s20 = smov 72   ;;  %s2586_s22 = smov 112   ;;  %vm1053_vm6 = vcmask 523264  }
  0x37   : > { %s2032_s19 = sshll.u32 %s326_s17, 3  ;;  %2147 = vmatprep.subr.bf16.mxu1 %v2579_v0  ;;  %s2583_s17 = smov 80  }
  0x38   : > { %s328_s23 = scalar_lea.vmem %s3098_s0, %s2032_s19  ;;  %s2584_s19 = smov 88  }
  0x39   : > { %v2747_v3 = vld [vmem:[%s328_s23] sm:$0xff]  ;;  %s2587_s23 = smov 104   ;;  %s3111_s24 = smov 56  }
  0x3a   : > { %v331_v4 = vpack.c.bf16 %v2747_v3, %v2747_v3  ;;  %2148 = vmatpush3.bf16.msra.mxu1 %v2392_v2  ;;  %s3110_s25 = smov 64   ;;  %s3109_s26 = smov 40  }
  0x3b   : > { %2153 = vmatprep.subr.bf16.mxu1 %v2579_v0  ;;  %s3108_s10 = smov 48   ;;  %s2592_s12 = smov 8  }
  0x3d   : > { %2150 = vmatmul.mubr.msk.bf16.vlgmr.msra.gmra.mxu1 %vm355_vm1, %v331_v4 }
  0x3e   : > { %2155 = vmatprep.mubr.msk.bf16.mxu1 %vm2580_vm0, %v2579_v0 }
  0xfd   : > { %v393_v6 = vpop.f32.mrf.mxu1 }
  0xfe   : > { %v394_v7 = vadd.f32 %v2759_v5, %v393_v6 }
  0xff   : > { %v2151_v8 = vpop.f32.mrf.mxu1 }
 0x100   : > { %v2762_v9 = vpack.c.bf16 %v394_v7, %v394_v7 }
 0x101   : > { %v396_v10 = vpop.f32.mrf.mxu1 }
 0x102   : > { %511 = vrot.lane.b32.xlu1 %v2762_v9, %s2581_s18  ;;  %401 = vrot.lane.b32.xlu0 %v2762_v9, %s2582_s21 }
 0x103   : > { %v2152_v11 = vpop.f32.mrf.mxu1 }
 0x106   : > { %623 = vrot.lane.b32.xlu1 %v2762_v9, %s2583_s17  ;;  %513 = vrot.lane.b32.xlu0 %v2762_v9, %s2584_s19 }
 0x10a   : > { %733 = vrot.lane.b32.xlu1 %v2762_v9, %s2585_s20  ;;  %621 = vrot.lane.b32.xlu0 %v2762_v9, %s2586_s22 }
 0x10e   : > { %731 = vrot.lane.b32.xlu0 %v2762_v9, %s2587_s23 }
 0x174   : > { %v402_v12 = vpop.permute.xlu0 %401  ;;  %v512_v15 = vpop.permute.xlu1 %511 }
 0x175   : > { %v408_v13 = vsel %vm403_vm2, %v402_v12, 0 }
 0x176   : > { %2154 = vmatpush3.bf16.xpose.msra.mxu1 %v408_v13 }
 0x177   : > { %2165 = vmatprep.subr.bf16.mxu1 %v2579_v0 }
 0x178   : > { %v514_v14 = vpop.permute.xlu0 %513  ;;  %v624_v17 = vpop.permute.xlu1 %623 }
 0x179   : > { %v519_v16 = vsel %vm403_vm2, %v514_v14, 0  ;;  %v629_v18 = vsel %vm403_vm2, %v624_v17, 0 }
 0x17c   : > { %v734_v19 = vpop.permute.xlu1 %733  ;;  %v622_v20 = vpop.permute.xlu0 %621 }
 0x17d   : > { %2156 = vmatmul.mubr.msk.bf16.vlgmr.msra.gmra.mxu1 %vm403_vm2, %v2762_v9  ;;  %v739_v21 = vsel %vm403_vm2, %v734_v19, 0 }
 0x17e   : > { %2166 = vmatpush3.bf16.xpose.msra.mxu1 %v519_v16  ;;  %2167 = vmatprep.mubr.msk.bf16.mxu1 %vm2580_vm0, %v2579_v0 }
 0x17f   : > { %2177 = vmatprep.subr.bf16.mxu1 %v2579_v0 }
 0x180   : > { %v732_v22 = vpop.permute.xlu0 %731 }
 0x185   : > { %2168 = vmatmul.mubr.msk.bf16.vlgmr.msra.gmra.mxu1 %vm403_vm2, %v512_v15 }
 0x186   : > { %2178 = vmatpush3.bf16.xpose.msra.mxu1 %v629_v18  ;;  %2179 = vmatprep.mubr.msk.bf16.mxu1 %vm2580_vm0, %v2579_v0 }
 0x187   : > { %2189 = vmatprep.subr.bf16.mxu1 %v2579_v0 }
 0x18d   : > { %2180 = vmatmul.mubr.msk.bf16.vlgmr.msra.gmra.mxu1 %vm403_vm2, %v622_v20 }
 0x18e   : > { %2190 = vmatpush3.bf16.xpose.msra.mxu1 %v739_v21  ;;  %2191 = vmatprep.mubr.msk.bf16.mxu1 %vm2580_vm0, %v2579_v0 }
 0x18f   : > { %2201 = vmatprep.subr.bf16.mxu1 %v2579_v0 }
 0x195   : > { %2192 = vmatmul.mubr.msk.bf16.vlgmr.msra.gmra.mxu1 %vm403_vm2, %v732_v22 }
 0x196   : > { %2205 = vmatprep.mubr.msk.bf16.mxu1 %vm2580_vm0, %v2579_v0 }
 0x23d   : > { %v444_v23 = vpop.f32.mrf.mxu1 }
 0x23e   : > { %v450_v24 = vsel %vm403_vm2, %v444_v23, -inf }
 0x23f   : > { %451 = vmax.xlane.f32.xlu1 %v450_v24  ;;  %v2157_v25 = vpop.f32.mrf.mxu1 }
 0x241   : > { %v447_v26 = vpop.f32.mrf.mxu1 }
 0x243   : > { %v2158_v27 = vpop.f32.mrf.mxu1 }
 0x245   : > { %v555_v28 = vpop.f32.mrf.mxu1 }
 0x246   : > { %v561_v29 = vsel %vm403_vm2, %v555_v28, -inf }
 0x247   : > { %562 = vmax.xlane.f32.xlu0 %v561_v29  ;;  %v2169_v30 = vpop.f32.mrf.mxu1 }
 0x249   : > { %v558_v31 = vpop.f32.mrf.mxu1 }
 0x24b   : > { %v2170_v32 = vpop.f32.mrf.mxu1 }
 0x24d   : > { %v665_v33 = vpop.f32.mrf.mxu1 }
 0x24e   : > { %v671_v34 = vsel %vm403_vm2, %v665_v33, -inf }
 0x24f   : > { %672 = vmax.xlane.f32.xlu0 %v671_v34  ;;  %v2181_v35 = vpop.f32.mrf.mxu1  ;;  %v2393_v34 = vld [vmem:[%s3101_s3 + $0x8] sm:$0xff]  }
 0x250   : > { %2202 = vmatpush3.bf16.msra.mxu1 %v2393_v34  ;;  %v2394_v35 = vld [vmem:[%s3101_s3] sm:$0xff]  }
 0x251   : > { %v668_v36 = vpop.f32.mrf.mxu1  ;;  %2203 = vmatprep.subr.bf16.mxu1 %v2579_v0 }
 0x253   : > { %v2182_v37 = vpop.f32.mrf.mxu1 }
 0x254   : > { %2204 = vmatpush3.bf16.msra.mxu1 %v2394_v35 }
 0x255   : > { %v775_v38 = vpop.f32.mrf.mxu1  ;;  %2217 = vmatprep.subr.bf16.mxu1 %v2579_v0 }
 0x256   : > { %v781_v39 = vsel %vm403_vm2, %v775_v38, -inf }
 0x257   : > { %782 = vmax.xlane.f32.xlu1 %v781_v39  ;;  %v2193_v40 = vpop.f32.mrf.mxu1 }
 0x259   : > { %v778_v41 = vpop.f32.mrf.mxu1 }
 0x25b   : > { %v2194_v42 = vpop.f32.mrf.mxu1 }
 0x2c8   : > { %v452_v43 = vpop.xlane.xlu1 %451 }
 0x2c9   : > { %v453_v44 = vsub.f32 %v444_v23, %v452_v43 }
 0x2cb   : > { %v454_v45 = vmul.f32 1.442695, %v453_v44 }
 0x2cd   : > { %2411 = vpow2.f32 %v454_v45 }
 0x2d0   : > { %v563_v46 = vpop.xlane.xlu0 %562 }
 0x2d1   : > { %v564_v47 = vsub.f32 %v555_v28, %v563_v46 }
 0x2d3   : > { %v565_v48 = vmul.f32 1.442695, %v564_v47 }
 0x2d5   : > { %2413 = vpow2.f32 %v565_v48 }
 0x2d8   : > { %v673_v49 = vpop.xlane.xlu0 %672 }
 0x2d9   : > { %v674_v50 = vsub.f32 %v665_v33, %v673_v49 }
 0x2da   : > { %v2412_v51 = vpop.eup %2411 }
 0x2db   : > { %v675_v52 = vmul.f32 1.442695, %v674_v50  ;;  %v456_v53 = vsel %vm403_vm2, %v2412_v51, 0.0 }
 0x2dc   : > { %457 = vadd.xlane.f32.xlu0 %v456_v53 }
 0x2dd   : > { %2415 = vpow2.f32 %v675_v52 }
 0x2e0   : > { %v783_v58 = vpop.xlane.xlu1 %782 }
 0x2e1   : > { %v784_v59 = vsub.f32 %v775_v38, %v783_v58 }
 0x2e2   : > { %v2414_v54 = vpop.eup %2413 }
 0x2e3   : > { %v567_v55 = vsel %vm403_vm2, %v2414_v54, 0.0  ;;  %v785_v60 = vmul.f32 1.442695, %v784_v59 }
 0x2e4   : > { %568 = vadd.xlane.f32.xlu1 %v567_v55 }
 0x2e5   : > { %2417 = vpow2.f32 %v785_v60 }
 0x2ea   : > { %v2416_v56 = vpop.eup %2415 }
 0x2eb   : > { %v677_v57 = vsel %vm403_vm2, %v2416_v56, 0.0 }
 0x2ec   : > { %678 = vadd.xlane.f32.xlu0 %v677_v57 }
 0x2f2   : > { %v2418_v61 = vpop.eup %2417 }
 0x2f3   : > { %v787_v62 = vsel %vm403_vm2, %v2418_v61, 0.0 }
 0x2f5   : > { %573 = vrot.lane.b32.xlu1 %v2762_v9, %s3111_s24  ;;  %s2593_s24 = smov 16  }
 0x302   : > { %462 = vrot.lane.b32.xlu0 %v2762_v9, %s3110_s25 }
 0x306   : > { %793 = vrot.lane.b32.xlu0 %v2762_v9, %s3109_s26 }
 0x319   : > { %788 = vadd.xlane.f32.xlu1 %v787_v62 }
 0x32a   : > { %683 = vrot.lane.b32.xlu1 %v2762_v9, %s3108_s10  ;;  %s3112_s10 = smov 24  }
 0x365   : > { %v458_v63 = vpop.xlane.xlu0 %457 }
 0x366   : > { %2419 = vrcp.f32 %v458_v63 }
 0x36d   : > { %v569_v1 = vpop.xlane.xlu1 %568 }
 0x36e   : > { %2421 = vrcp.f32 %v569_v1 }
 0x371   : > { %v574_v10 = vpop.permute.xlu1 %573 }
 0x372   : > { %v579_v13 = vsel %vm467_vm3, %v574_v10, 0  ;;  %v2398_v10 = vld [vmem:[%s3104_s6 + $0x10] sm:$0xff]  }
 0x373   : > { %v2420_v2 = vpop.eup %2419 }
 0x374   : > { %v460_v6 = vmul.f32 %v2420_v2, %v2412_v51  ;;  %v864_v51 = vlaneseq }
 0x375   : > { %v679_v4 = vpop.xlane.xlu0 %678 }
 0x376   : > { %v461_v11 = vpack.c.bf16 %v460_v6, %v460_v6  ;;  %2423 = vrcp.f32 %v679_v4  ;;  %v2852_v52 = vshrl.u32 %v864_v51, 7 }
 0x378   : > { %v866_v53 = vsub.s32 0, %v2852_v52  ;;  %v1113_v51 = vsub.s32 4, %v2852_v52 }
 0x379   : > { %v463_v7 = vpop.permute.xlu0 %462 }
 0x37a   : > { %v469_v8 = vsel %vm467_vm3, %v463_v7, 0  ;;  %v2395_v7 = vld [vmem:[#allocation2 + $0x8] sm:$0xff]  }
 0x37b   : > { %2160 = vmatpush3.bf16.msra.mxu0 %v469_v8  ;;  %v2422_v12 = vpop.eup %2421  ;;  %v2396_v8 = vld [vmem:[#allocation2] sm:$0xff]  }
 0x37c   : > { %2171 = vmatprep.subr.bf16.mxu0 %v2579_v0  ;;  %v571_v9 = vmul.f32 %v2422_v12, %v2414_v54  ;;  %v2858_v54 = vld [vmem:[%s3105_s7] sm:$0xff] }
 0x37d   : > { %v794_v20 = vpop.permute.xlu0 %793  ;;  %v2861_v55 = vrot.slane %v2858_v54, %v866_v53  ;;  %v1118_v53 = vsub.s32 5, %v2852_v52 }
 0x37e   : > { %2162 = vmatmul.mubr.msk.bf16.vlgmr.msra.gmra.mxu0 %vm403_vm2, %v461_v11  ;;  %v572_v14 = vpack.c.bf16 %v571_v9, %v571_v9  ;;  %v799_v22 = vsel %vm467_vm3, %v794_v20, 0  ;;  %v940_v9 = vsub.s32 2, %v2852_v52 }
 0x37f   : > { %2172 = vmatpush3.bf16.msra.mxu0 %v579_v13  ;;  %2173 = vmatprep.mubr.msk.bf16.mxu0 %vm2580_vm0, %v2579_v0 }
 0x380   : > { %2183 = vmatprep.subr.bf16.mxu0 %v2579_v0 }
 0x383   : > { %v2424_v15 = vpop.eup %2423 }
 0x384   : > { %v681_v17 = vmul.f32 %v2424_v15, %v2416_v56  ;;  %v2880_v15 = vrot.slane %v2858_v54, %v940_v9 }
 0x386   : > { %2174 = vmatmul.mubr.msk.bf16.vlgmr.msra.gmra.mxu0 %vm403_vm2, %v572_v14  ;;  %v682_v21 = vpack.c.bf16 %v681_v17, %v681_v17  ;;  %v945_v14 = vsub.s32 3, %v2852_v52 }
 0x387   : > { %2185 = vmatprep.mubr.msk.bf16.mxu0 %vm2580_vm0, %v2579_v0 }
 0x3a2   : > { %v789_v16 = vpop.xlane.xlu1 %788 }
 0x3a3   : > { %2425 = vrcp.f32 %v789_v16 }
 0x3a6   : > { %v684_v18 = vpop.permute.xlu1 %683 }
 0x3a7   : > { %v689_v19 = vsel %vm467_vm3, %v684_v18, 0  ;;  %v2883_v18 = vrot.slane %v2858_v54, %v945_v14 }
 0x3a8   : > { %2184 = vmatpush3.bf16.msra.mxu0 %v689_v19 }
 0x3a9   : > { %2195 = vmatprep.subr.bf16.mxu0 %v2579_v0 }
 0x3ab   : > { %2186 = vmatmul.mubr.msk.bf16.vlgmr.msra.gmra.mxu0 %vm403_vm2, %v682_v21 }
 0x3ac   : > { %2196 = vmatpush3.bf16.msra.mxu0 %v799_v22  ;;  %2197 = vmatprep.mubr.msk.bf16.mxu0 %vm2580_vm0, %v2579_v0  ;;  %v2399_v22 = vld [vmem:[%s3104_s6 + $0x8] sm:$0xff]  }
 0x3ad   : > { %2209 = vmatprep.subr.bf16.mxu0 %v2579_v0 }
 0x3b0   : > { %v2426_v23 = vpop.eup %2425 }
 0x3b1   : > { %v791_v24 = vmul.f32 %v2426_v23, %v2418_v61  ;;  %v2400_v23 = vld [vmem:[%s3104_s6] sm:$0xff]  }
 0x3b3   : > { %v792_v25 = vpack.c.bf16 %v791_v24, %v791_v24  ;;  %v2898_v24 = vld [vmem:[#allocation5] ss:$0 sm:$0xff] }
 0x3b5   : > { %2198 = vmatmul.mubr.msk.bf16.vlgmr.msra.gmra.mxu0 %vm403_vm2, %v792_v25 }
 0x3b6   : > { %2213 = vmatprep.mubr.msk.bf16.mxu0 %vm2580_vm0, %v2579_v0  ;;  %2210 = vmatpush3.bf16.msra.mxu0 %v2395_v7 }
 0x3b7   : > { %2211 = vmatprep.subr.bf16.mxu0 %v2579_v0 }
 0x3ba   : > { %2212 = vmatpush3.bf16.msra.mxu0 %v2396_v8 }
 0x3bb   : > { %2229 = vmatprep.subr.bf16.mxu0 %v2579_v0 }
 0x43e   : > { %v505_v26 = vpop.f32.mrf.mxu0 }
 0x440   : > { %v2163_v27 = vpop.f32.mrf.mxu0 }
 0x442   : > { %v508_v28 = vpop.f32.mrf.mxu0 }
 0x444   : > { %v2164_v29 = vpop.f32.mrf.mxu0 }
 0x446   : > { %v615_v30 = vpop.f32.mrf.mxu0 }
 0x447   : > { %842 = vrot.lane.b32.xlu1 %v615_v30, %s2592_s12 }
 0x448   : > { %v2175_v31 = vpop.f32.mrf.mxu0 }
 0x44a   : > { %v618_v32 = vpop.f32.mrf.mxu0 }
 0x44b   : > { %v1027_v32 = vsub.s32 1, %v2852_v52 }
 0x44c   : > { %v2176_v33 = vpop.f32.mrf.mxu0 }
 0x44d   : > { %v2906_v33 = vrot.slane %v2858_v54, %v1027_v32 }
 0x46b   : > { %v725_v36 = vpop.f32.mrf.mxu0 }
 0x46c   : > { %846 = vrot.lane.b32.xlu0 %v725_v36, %s2593_s24 }
 0x46d   : > { %v2187_v37 = vpop.f32.mrf.mxu0 }
 0x46f   : > { %v728_v38 = vpop.f32.mrf.mxu0 }
 0x471   : > { %v2188_v39 = vpop.f32.mrf.mxu0 }
 0x475   : > { %v835_v40 = vpop.f32.mrf.mxu0 }
 0x476   : > { %850 = vrot.lane.b32.xlu1 %v835_v40, %s3112_s10 }
 0x477   : > { %v2199_v41 = vpop.f32.mrf.mxu0 }
 0x479   : > { %v838_v42 = vpop.f32.mrf.mxu0 }
 0x47b   : > { %v2200_v43 = vpop.f32.mrf.mxu0 }
 0x4b9   : > { %v843_v44 = vpop.permute.xlu1 %842 }
 0x4ba   : > { %v853_v46 = vsel %vm403_vm2, %v505_v26, %v843_v44 }
 0x4de   : > { %v847_v45 = vpop.permute.xlu0 %846 }
 0x4df   : > { %v855_v47 = vsel %vm854_vm4, %v853_v46, %v847_v45  ;;  %v2401_v46 = vld [vmem:[%s3099_s1 + $0x8] sm:$0xff]  }
 0x4e8   : > { %v851_v48 = vpop.permute.xlu1 %850 }
 0x4e9   : > { %v857_v49 = vsel %vm856_vm5, %v855_v47, %v851_v48  ;;  %v2402_v47 = vld [vmem:[%s3099_s1] sm:$0xff]  }
 0x4ea   : > { %v858_v50 = vpack.c.bf16 %v857_v49, %v857_v49 }
 0x4ec   : > { %2206 = vmatmul.mubr.msk.bf16.vlgmr.msra.gmra.mxu1 %vm355_vm1, %v858_v50 }
 0x4ed   : > { %2225 = vmatprep.mubr.msk.bf16.mxu1 %vm2580_vm0, %v2579_v0 }
 0x5ac   : > { %v917_v56 = vpop.f32.mrf.mxu1 }
 0x5ad   : > { %v918_v57 = vadd.f32 %v917_v56, %v2861_v55  ;;  %v2922_v56 = vrot.slane %v2858_v54, %v1113_v51 }
 0x5ae   : > { %v2207_v58 = vpop.f32.mrf.mxu1 }
 0x5af   : > { %v923_v59 = vadd.f32 %v918_v57, %v2747_v3  ;;  %v2397_v3 = vld [vmem:[%s3104_s6 + $0x18] sm:$0xff]  }
 0x5b0   : > { %v920_v60 = vpop.f32.mrf.mxu1  ;;  %2218 = vmatpush3.bf16.msra.mxu1 %v2397_v3 }
 0x5b1   : > { %v924_v61 = vsel %vm355_vm1, %v923_v59, 0.0  ;;  %2219 = vmatprep.subr.bf16.mxu1 %v2579_v0 }
 0x5b2   : > { %925 = vadd.xlane.f32.xlu0 %v924_v61  ;;  %v2208_v62 = vpop.f32.mrf.mxu1 }
 0x5b4   : > { %2220 = vmatpush3.bf16.msra.mxu1 %v2398_v10 }
 0x5b5   : > { %2221 = vmatprep.subr.bf16.mxu1 %v2579_v0 }
 0x5b8   : > { %2222 = vmatpush3.bf16.msra.mxu1 %v2399_v22 }
 0x5b9   : > { %2223 = vmatprep.subr.bf16.mxu1 %v2579_v0 }
 0x5bc   : > { %2224 = vmatpush3.bf16.msra.mxu1 %v2400_v23 }
 0x5bd   : > { %2243 = vmatprep.subr.bf16.mxu1 %v2579_v0 }
 0x63b   : > { %v926_v63 = vpop.xlane.xlu0 %925 }
 0x63c   : > { %v928_v1 = vmul.f32 0.03125, %v926_v63 }
 0x63e   : > { %v929_v2 = vsub.f32 %v923_v59, %v928_v1  ;;  %v2925_v59 = vrot.slane %v2858_v54, %v1118_v53 }
 0x640   : > { %v930_v4 = vmul.f32 %v929_v2, %v929_v2 }
 0x642   : > { %v931_v6 = vsel %vm355_vm1, %v930_v4, 0.0 }
 0x643   : > { %932 = vadd.xlane.f32.xlu1 %v931_v6 }
 0x6cc   : > { %v933_v11 = vpop.xlane.xlu1 %932 }
 0x6cd   : > { %v934_v12 = vmul.f32 0.03125, %v933_v11 }
 0x6cf   : > { %v935_v13 = vadd.f32 1e-05, %v934_v12 }
 0x6d1   : > { %2427 = vrsqrt.f32 %v935_v13 }
 0x6de   : > { %v2428_v16 = vpop.eup %2427 }
 0x6df   : > { %v937_v17 = vmul.f32 %v2428_v16, %v929_v2 }
 0x6e1   : > { %v942_v19 = vmul.f32 %v2880_v15, %v937_v17 }
 0x6e3   : > { %v947_v20 = vadd.f32 %v2883_v18, %v942_v19 }
 0x6e5   : > { %v948_v21 = vpack.c.bf16 %v947_v20, %v947_v20 }
 0x6e7   : > { %2214 = vmatmul.mubr.msk.bf16.vlgmr.msra.gmra.mxu0 %vm355_vm1, %v948_v21 }
 0x6e8   : > { %2233 = vmatprep.mubr.msk.bf16.mxu0 %vm2580_vm0, %v2579_v0  ;;  %2230 = vmatpush3.bf16.msra.mxu0 %v2401_v46 }
 0x6e9   : > { %2231 = vmatprep.subr.bf16.mxu0 %v2579_v0 }
 0x6ec   : > { %2232 = vmatpush3.bf16.msra.mxu0 %v2402_v47 }
 0x6ed   : > { %2237 = vmatprep.subr.bf16.mxu0 %v2579_v0 }
 0x7a7   : > { %v1009_v25 = vpop.f32.mrf.mxu0 }
 0x7a8   : > { %v1010_v26 = vadd.f32 %v2898_v24, %v1009_v25 }
 0x7a9   : > { %v2215_v27 = vpop.f32.mrf.mxu0 }
 0x7aa   : > { %v1015_v28 = vmax.f32 %v1010_v26, 0.0 }
 0x7ab   : > { %v1012_v29 = vpop.f32.mrf.mxu0 }
 0x7ac   : > { %v1016_v30 = vpack.c.bf16 %v1015_v28, %v1015_v28 }
 0x7ad   : > { %v2216_v31 = vpop.f32.mrf.mxu0 }
 0x7ae   : > { %2226 = vmatmul.mubr.msk.bf16.vlgmr.msra.gmra.mxu1 %vm1053_vm6, %v1016_v30 }
 0x7af   : > { %2245 = vmatprep.mubr.msk.bf16.mxu1 %vm2580_vm0, %v2579_v0 }
 0x86e   : > { %v1091_v34 = vpop.f32.mrf.mxu1 }
 0x86f   : > { %v1092_v35 = vadd.f32 %v1091_v34, %v2906_v33 }
 0x870   : > { %v2227_v36 = vpop.f32.mrf.mxu1 }
 0x871   : > { %v1097_v37 = vadd.f32 %v1092_v35, %v947_v20 }
 0x872   : > { %v1094_v38 = vpop.f32.mrf.mxu1 }
 0x873   : > { %v1098_v39 = vsel %vm355_vm1, %v1097_v37, 0.0 }
 0x874   : > { %1099 = vadd.xlane.f32.xlu0 %v1098_v39  ;;  %v2228_v40 = vpop.f32.mrf.mxu1 }
 0x8fd   : > { %v1100_v41 = vpop.xlane.xlu0 %1099 }
 0x8fe   : > { %v1101_v42 = vmul.f32 0.03125, %v1100_v41 }
 0x900   : > { %v1102_v43 = vsub.f32 %v1097_v37, %v1101_v42 }
 0x902   : > { %v1103_v44 = vmul.f32 %v1102_v43, %v1102_v43 }
 0x904   : > { %v1104_v45 = vsel %vm355_vm1, %v1103_v44, 0.0 }
 0x905   : > { %1105 = vadd.xlane.f32.xlu0 %v1104_v45 }
 0x98e   : > { %v1106_v48 = vpop.xlane.xlu0 %1105 }
 0x98f   : > { %v1107_v49 = vmul.f32 0.03125, %v1106_v48 }
 0x991   : > { %v1108_v50 = vadd.f32 1e-05, %v1107_v49 }
 0x993   : > { %2429 = vrsqrt.f32 %v1108_v50 }
 0x9a0   : > { %v2430_v57 = vpop.eup %2429 }
 0x9a1   : > { %v1110_v58 = vmul.f32 %v2430_v57, %v1102_v43 }
 0x9a3   : > { %v1115_v60 = vmul.f32 %v2922_v56, %v1110_v58 }
 0x9a5   : > { %v2929_v61 = vadd.f32 %v2925_v59, %v1115_v60 }
 0x9a7   : > { %v1121_v62 = vpack.c.bf16 %v2929_v61, %v2929_v61 }
 0x9a9   : > { %2234 = vmatmul.mubr.msk.bf16.vlgmr.msra.gmra.mxu0 %vm355_vm1, %v1121_v62 }
 0x9aa   : > { %2239 = vmatprep.mubr.msk.bf16.mxu0 %vm2580_vm0, %v2579_v0 }
 0xa69   : > { %v1182_v63 = vpop.f32.mrf.mxu0 }
 0xa6a   : > { %v1183_v1 = vadd.f32 %v2759_v5, %v1182_v63 }
 0xa6b   : > { %v2235_v2 = vpop.f32.mrf.mxu0 }
 0xa6c   : > { %v2937_v4 = vpack.c.bf16 %v1183_v1, %v1183_v1 }
 0xa6d   : > { %v1185_v6 = vpop.f32.mrf.mxu0 }
 0xa6e   : > { %1300 = vrot.lane.b32.xlu0 %v2937_v4, %s2584_s19  ;;  %1190 = vrot.lane.b32.xlu1 %v2937_v4, %s2582_s21  ;;  %s3122_s21 = smov 64   ;;  %s3124_s19 = smov 48  }
 0xa6f   : > { %v2236_v7 = vpop.f32.mrf.mxu0 }
 0xa72   : > { %1408 = vrot.lane.b32.xlu0 %v2937_v4, %s2586_s22  ;;  %1298 = vrot.lane.b32.xlu1 %v2937_v4, %s2581_s18  ;;  %s3121_s18 = smov 56  }
 0xa76   : > { %1518 = vrot.lane.b32.xlu0 %v2937_v4, %s2587_s23  ;;  %1410 = vrot.lane.b32.xlu1 %v2937_v4, %s2583_s17  ;;  %s3123_s17 = smov 40   ;;  %s2082_s23 = sshll.u32 %s2662_s9, 7 }
 0xa77   : > { %s1940_s25 = scalar_lea.hbm %s3106_s8, %s2082_s23 }
 0xa7a   : > { %1520 = vrot.lane.b32.xlu1 %v2937_v4, %s2585_s20  ;;  %s322_s20 = sand.u32 1, %s2565_s28  }
 0xa7b   : > { %s2031_s22 = sshll.u32 %s322_s20, 3  ;;  %s1929_s26 = scalar_lea.sflag [#allocation4], %s322_s20 }
 0xa7c   : > { %s324_s10 = scalar_lea.vmem [#allocation7], %s2031_s22 }
 0xae0   : > { %v1191_v5 = vpop.permute.xlu1 %1190  ;;  %v1301_v3 = vpop.permute.xlu0 %1300 }
 0xae1   : > { %v1196_v8 = vsel %vm403_vm2, %v1191_v5, 0  ;;  %v1306_v11 = vsel %vm403_vm2, %v1301_v3, 0 }
 0xae2   : > { %2238 = vmatpush3.bf16.xpose.msra.mxu0 %v1196_v8 }
 0xae3   : > { %2249 = vmatprep.subr.bf16.mxu0 %v2579_v0 }
 0xae4   : > { %v1299_v10 = vpop.permute.xlu1 %1298  ;;  %v1409_v14 = vpop.permute.xlu0 %1408 }
 0xae8   : > { %v1411_v12 = vpop.permute.xlu1 %1410  ;;  %v1519_v17 = vpop.permute.xlu0 %1518 }
 0xae9   : > { %2240 = vmatmul.mubr.msk.bf16.vlgmr.msra.gmra.mxu0 %vm403_vm2, %v2937_v4  ;;  %v1416_v13 = vsel %vm403_vm2, %v1411_v12, 0 }
 0xaea   : > { %2250 = vmatpush3.bf16.xpose.msra.mxu0 %v1306_v11  ;;  %2251 = vmatprep.mubr.msk.bf16.mxu0 %vm2580_vm0, %v2579_v0 }
 0xaeb   : > { %2261 = vmatprep.subr.bf16.mxu0 %v2579_v0 }
 0xaec   : > { %v1521_v9 = vpop.permute.xlu1 %1520 }
 0xaed   : > { %v1526_v16 = vsel %vm403_vm2, %v1521_v9, 0 }
 0xaf1   : > { %2252 = vmatmul.mubr.msk.bf16.vlgmr.msra.gmra.mxu0 %vm403_vm2, %v1299_v10 }
 0xaf2   : > { %2262 = vmatpush3.bf16.xpose.msra.mxu0 %v1416_v13  ;;  %2263 = vmatprep.mubr.msk.bf16.mxu0 %vm2580_vm0, %v2579_v0 }
 0xaf3   : > { %2273 = vmatprep.subr.bf16.mxu0 %v2579_v0 }
 0xaf9   : > { %2264 = vmatmul.mubr.msk.bf16.vlgmr.msra.gmra.mxu0 %vm403_vm2, %v1409_v14 }
 0xafa   : > { %2274 = vmatpush3.bf16.xpose.msra.mxu0 %v1526_v16  ;;  %2275 = vmatprep.mubr.msk.bf16.mxu0 %vm2580_vm0, %v2579_v0 }
 0xafb   : > { %2285 = vmatprep.subr.bf16.mxu0 %v2579_v0 }
 0xb01   : > { %2276 = vmatmul.mubr.msk.bf16.vlgmr.msra.gmra.mxu0 %vm403_vm2, %v1519_v17 }
 0xb02   : > { %2289 = vmatprep.mubr.msk.bf16.mxu0 %vm2580_vm0, %v2579_v0 }
 0xba9   : > { %v1232_v19 = vpop.f32.mrf.mxu0 }
 0xbaa   : > { %v1238_v20 = vsel %vm403_vm2, %v1232_v19, -inf }
 0xbab   : > { %1239 = vmax.xlane.f32.xlu1 %v1238_v20  ;;  %v2241_v21 = vpop.f32.mrf.mxu0 }
 0xbad   : > { %v1235_v22 = vpop.f32.mrf.mxu0 }
 0xbaf   : > { %v2242_v23 = vpop.f32.mrf.mxu0 }
 0xbb1   : > { %v1342_v25 = vpop.f32.mrf.mxu0 }
 0xbb2   : > { %v1348_v26 = vsel %vm403_vm2, %v1342_v25, -inf }
 0xbb3   : > { %1349 = vmax.xlane.f32.xlu0 %v1348_v26  ;;  %v2253_v27 = vpop.f32.mrf.mxu0 }
 0xbb5   : > { %v1345_v28 = vpop.f32.mrf.mxu0 }
 0xbb7   : > { %v2254_v29 = vpop.f32.mrf.mxu0 }
 0xbb9   : > { %v1452_v30 = vpop.f32.mrf.mxu0 }
 0xbba   : > { %v1458_v31 = vsel %vm403_vm2, %v1452_v30, -inf }
 0xbbb   : > { %1459 = vmax.xlane.f32.xlu0 %v1458_v31  ;;  %v2265_v32 = vpop.f32.mrf.mxu0 }
 0xbbd   : > { %v1455_v34 = vpop.f32.mrf.mxu0 }
 0xbbf   : > { %v2266_v35 = vpop.f32.mrf.mxu0 }
 0xbc1   : > { %v1562_v36 = vpop.f32.mrf.mxu0 }
 0xbc2   : > { %v1568_v37 = vsel %vm403_vm2, %v1562_v36, -inf }
 0xbc3   : > { %1569 = vmax.xlane.f32.xlu1 %v1568_v37  ;;  %v2277_v38 = vpop.f32.mrf.mxu0 }
 0xbc5   : > { %v1565_v39 = vpop.f32.mrf.mxu0 }
 0xbc7   : > { %v2278_v40 = vpop.f32.mrf.mxu0 }
 0xbc8   : > { %v2403_v40 = vld [vmem:[%s3101_s3 + $0x8] sm:$0xff]  }
 0xbc9   : > { %2286 = vmatpush3.bf16.msra.mxu0 %v2403_v40 }
 0xbca   : > { %2287 = vmatprep.subr.bf16.mxu0 %v2579_v0 }
 0xc34   : > { %v1240_v41 = vpop.xlane.xlu1 %1239 }
 0xc35   : > { %v1241_v42 = vsub.f32 %v1232_v19, %v1240_v41  ;;  %v2404_v41 = vld [vmem:[%s3101_s3] sm:$0xff]  }
 0xc36   : > { %2288 = vmatpush3.bf16.msra.mxu0 %v2404_v41 }
 0xc37   : > { %v1242_v43 = vmul.f32 1.442695, %v1241_v42  ;;  %2301 = vmatprep.subr.bf16.mxu0 %v2579_v0 }
 0xc39   : > { %2431 = vpow2.f32 %v1242_v43 }
 0xc3c   : > { %v1350_v44 = vpop.xlane.xlu0 %1349 }
 0xc3d   : > { %v1351_v45 = vsub.f32 %v1342_v25, %v1350_v44 }
 0xc3f   : > { %v1352_v46 = vmul.f32 1.442695, %v1351_v45 }
 0xc41   : > { %2433 = vpow2.f32 %v1352_v46 }
 0xc44   : > { %v1460_v47 = vpop.xlane.xlu0 %1459 }
 0xc45   : > { %v1461_v48 = vsub.f32 %v1452_v30, %v1460_v47 }
 0xc46   : > { %v2432_v49 = vpop.eup %2431 }
 0xc47   : > { %v1462_v50 = vmul.f32 1.442695, %v1461_v48  ;;  %v1244_v51 = vsel %vm403_vm2, %v2432_v49, 0.0 }
 0xc48   : > { %1245 = vadd.xlane.f32.xlu0 %v1244_v51 }
 0xc49   : > { %2435 = vpow2.f32 %v1462_v50 }
 0xc4c   : > { %v1570_v62 = vpop.xlane.xlu1 %1569 }
 0xc4d   : > { %v1571_v63 = vsub.f32 %v1562_v36, %v1570_v62 }
 0xc4e   : > { %v2434_v53 = vpop.eup %2433 }
 0xc4f   : > { %v1354_v57 = vsel %vm403_vm2, %v2434_v53, 0.0  ;;  %v1572_v1 = vmul.f32 1.442695, %v1571_v63 }
 0xc50   : > { %1355 = vadd.xlane.f32.xlu1 %v1354_v57 }
 0xc51   : > { %2437 = vpow2.f32 %v1572_v1 }
 0xc56   : > { %v2436_v58 = vpop.eup %2435 }
 0xc57   : > { %v1464_v60 = vsel %vm403_vm2, %v2436_v58, 0.0 }
 0xc58   : > { %1465 = vadd.xlane.f32.xlu0 %v1464_v60 }
 0xc5e   : > { %v2438_v2 = vpop.eup %2437 }
 0xc5f   : > { %v1574_v6 = vsel %vm403_vm2, %v2438_v2, 0.0 }
 0xc61   : > { %1360 = vrot.lane.b32.xlu1 %v2937_v4, %s3121_s18 }
 0xc6e   : > { %1250 = vrot.lane.b32.xlu0 %v2937_v4, %s3122_s21  ;;  %s2595_s21 = smov [#allocation7]  }
 0xc72   : > { %1580 = vrot.lane.b32.xlu0 %v2937_v4, %s3123_s17  ;;  %s2509_s17 = sshll.u32 %s2595_s21, 4  ;;  %s2510_s17 = int_to_ptr.vmem [resolvable:$false] %s2509_s17 }
 0xc73   : > { %s2511_s9 = scalar_lea.vmem %s2510_s17, 256 }
 0xc85   : > { %1575 = vadd.xlane.f32.xlu1 %v1574_v6 }
 0xc96   : > { %1470 = vrot.lane.b32.xlu1 %v2937_v4, %s3124_s19 }
 0xcd1   : > { %v1246_v7 = vpop.xlane.xlu0 %1245 }
 0xcd2   : > { %2439 = vrcp.f32 %v1246_v7 }
 0xcd9   : > { %v1356_v5 = vpop.xlane.xlu1 %1355 }
 0xcda   : > { %2441 = vrcp.f32 %v1356_v5 }
 0xcdd   : > { %v1361_v13 = vpop.permute.xlu1 %1360 }
 0xcde   : > { %v1366_v16 = vsel %vm467_vm3, %v1361_v13, 0 }
 0xcdf   : > { %v2440_v8 = vpop.eup %2439 }
 0xce0   : > { %v1248_v10 = vmul.f32 %v2440_v8, %v2432_v49 }
 0xce1   : > { %v1466_v3 = vpop.xlane.xlu0 %1465 }
 0xce2   : > { %v1249_v9 = vpack.c.bf16 %v1248_v10, %v1248_v10  ;;  %2443 = vrcp.f32 %v1466_v3 }
 0xce5   : > { %v1251_v11 = vpop.permute.xlu0 %1250 }
 0xce6   : > { %v1256_v12 = vsel %vm467_vm3, %v1251_v11, 0 }
 0xce7   : > { %2244 = vmatpush3.bf16.msra.mxu1 %v1256_v12  ;;  %v2442_v14 = vpop.eup %2441 }
 0xce8   : > { %2255 = vmatprep.subr.bf16.mxu1 %v2579_v0  ;;  %v1358_v4 = vmul.f32 %v2442_v14, %v2434_v53  ;;  %v2406_v14 = vld [vmem:[#allocation2] sm:$0xff]  }
 0xce9   : > { %v1581_v25 = vpop.permute.xlu0 %1580 }
 0xcea   : > { %2246 = vmatmul.mubr.msk.bf16.vlgmr.msra.gmra.mxu1 %vm403_vm2, %v1249_v9  ;;  %v1359_v17 = vpack.c.bf16 %v1358_v4, %v1358_v4  ;;  %v1586_v27 = vsel %vm467_vm3, %v1581_v25, 0  ;;  %v2405_v9 = vld [vmem:[#allocation2 + $0x8] sm:$0xff]  }
 0xceb   : > { %2256 = vmatpush3.bf16.msra.mxu1 %v1366_v16  ;;  %2257 = vmatprep.mubr.msk.bf16.mxu1 %vm2580_vm0, %v2579_v0  ;;  %v2409_v25 = vld [vmem:[%s3104_s6 + $0x8] sm:$0xff]  }
 0xcec   : > { %2267 = vmatprep.subr.bf16.mxu1 %v2579_v0 }
 0xcef   : > { %v2444_v19 = vpop.eup %2443 }
 0xcf0   : > { %v1468_v21 = vmul.f32 %v2444_v19, %v2436_v58 }
 0xcf2   : > { %2258 = vmatmul.mubr.msk.bf16.vlgmr.msra.gmra.mxu1 %vm403_vm2, %v1359_v17  ;;  %v1469_v26 = vpack.c.bf16 %v1468_v21, %v1468_v21 }
 0xcf3   : > { %2269 = vmatprep.mubr.msk.bf16.mxu1 %vm2580_vm0, %v2579_v0 }
 0xd0e   : > { %v1576_v20 = vpop.xlane.xlu1 %1575 }
 0xd0f   : > { %2445 = vrcp.f32 %v1576_v20 }
 0xd12   : > { %v1471_v22 = vpop.permute.xlu1 %1470 }
 0xd13   : > { %v1476_v23 = vsel %vm467_vm3, %v1471_v22, 0 }
 0xd14   : > { %2268 = vmatpush3.bf16.msra.mxu1 %v1476_v23 }
 0xd15   : > { %2279 = vmatprep.subr.bf16.mxu1 %v2579_v0 }
 0xd17   : > { %2270 = vmatmul.mubr.msk.bf16.vlgmr.msra.gmra.mxu1 %vm403_vm2, %v1469_v26  ;;  %v2410_v26 = vld [vmem:[%s3104_s6] sm:$0xff]  }
 0xd18   : > { %2280 = vmatpush3.bf16.msra.mxu1 %v1586_v27  ;;  %2281 = vmatprep.mubr.msk.bf16.mxu1 %vm2580_vm0, %v2579_v0 }
 0xd19   : > { %2293 = vmatprep.subr.bf16.mxu1 %v2579_v0 }
 0xd1c   : > { %v2446_v28 = vpop.eup %2445 }
 0xd1d   : > { %v1578_v29 = vmul.f32 %v2446_v28, %v2438_v2 }
 0xd1f   : > { %v1579_v30 = vpack.c.bf16 %v1578_v29, %v1578_v29 }
 0xd21   : > { %2282 = vmatmul.mubr.msk.bf16.vlgmr.msra.gmra.mxu1 %vm403_vm2, %v1579_v30 }
 0xd22   : > { %2297 = vmatprep.mubr.msk.bf16.mxu1 %vm2580_vm0, %v2579_v0  ;;  %2294 = vmatpush3.bf16.msra.mxu1 %v2405_v9 }
 0xd23   : > { %2295 = vmatprep.subr.bf16.mxu1 %v2579_v0 }
 0xd26   : > { %2296 = vmatpush3.bf16.msra.mxu1 %v2406_v14 }
 0xdaa   : > { %v1292_v31 = vpop.f32.mrf.mxu1 }
 0xdac   : > { %v2247_v32 = vpop.f32.mrf.mxu1 }
 0xdae   : > { %v1295_v34 = vpop.f32.mrf.mxu1 }
 0xdb0   : > { %v2248_v35 = vpop.f32.mrf.mxu1 }
 0xdb2   : > { %v1402_v36 = vpop.f32.mrf.mxu1 }
 0xdb3   : > { %1629 = vrot.lane.b32.xlu1 %v1402_v36, %s2592_s12  ;;  %s3125_s12 = smov 24  }
 0xdb4   : > { %v2259_v37 = vpop.f32.mrf.mxu1 }
 0xdb6   : > { %v1405_v38 = vpop.f32.mrf.mxu1 }
 0xdb8   : > { %v2260_v39 = vpop.f32.mrf.mxu1 }
 0xdd7   : > { %v1512_v42 = vpop.f32.mrf.mxu1 }
 0xdd8   : > { %1633 = vrot.lane.b32.xlu0 %v1512_v42, %s2593_s24 }
 0xdd9   : > { %v2271_v43 = vpop.f32.mrf.mxu1 }
 0xddb   : > { %v1515_v44 = vpop.f32.mrf.mxu1 }
 0xddd   : > { %v2272_v45 = vpop.f32.mrf.mxu1 }
 0xde1   : > { %v1622_v46 = vpop.f32.mrf.mxu1 }
 0xde2   : > { %1637 = vrot.lane.b32.xlu1 %v1622_v46, %s3125_s12  ;;  %s1942_s12 = sshll.u32 %s324_s10, 4  ;;  %s1943_s12 = int_to_ptr.vmem [resolvable:$true] %s1942_s12 }
 0xde3   : > { %v2283_v47 = vpop.f32.mrf.mxu1  ;;  %s2505_s18 = scalar_lea.vmem %s1943_s12, 128  ;;  %p2512_p1 = scmp.lt.s32.totalorder %s1943_s12, %s2510_s17 }
 0xde4   : > { %p2506_p10 = scmp.ne.s32.totalorder %s1943_s12, %s2505_s18  ;;  %p2513_p3 = scmp.lt.s32.totalorder %s2511_s9, %s2505_s18 }
 0xde5   : > { %v1625_v48 = vpop.f32.mrf.mxu1 }
 0xde6   : > { %p2507_p12 = pnand %p2506_p10, %p2679_p5  ;;  %p2514_p2 = por %p2513_p3, %p2512_p1 }
 0xde7   : > { %v2284_v49 = vpop.f32.mrf.mxu1 }
 0xde8   : > { %p2508_p0 = pneg %p2507_p12 }
 0xdea   : > { %p2515_p4 = pnand %p2514_p2, %p2508_p0 }
 0xe25   : > { %v1630_v50 = vpop.permute.xlu1 %1629 }
 0xe26   : > { %v1640_v53 = vsel %vm403_vm2, %v1292_v31, %v1630_v50 }
 0xe4a   : > { %v1634_v51 = vpop.permute.xlu0 %1633 }
 0xe4b   : > { %v1641_v57 = vsel %vm854_vm4, %v1640_v53, %v1634_v51 }
 0xe54   : > { %v1638_v58 = vpop.permute.xlu1 %1637 }
 0xe55   : > { %v1642_v60 = vsel %vm856_vm5, %v1641_v57, %v1638_v58 }
 0xe56   : > { %v1643_v62 = vpack.c.bf16 %v1642_v60, %v1642_v60 }
 0xe58   : > { %2290 = vmatmul.mubr.msk.bf16.vlgmr.msra.gmra.mxu0 %vm355_vm1, %v1643_v62 }
 0xe59   : > { %2309 = vmatprep.mubr.msk.bf16.mxu0 %vm2580_vm0, %v2579_v0 }
 0xf18   : > { %v1702_v63 = vpop.f32.mrf.mxu0 }
 0xf19   : > { %v1703_v1 = vadd.f32 %v1702_v63, %v2861_v55  ;;  %v2407_v55 = vld [vmem:[%s3104_s6 + $0x18] sm:$0xff]  }
 0xf1a   : > { %v2291_v2 = vpop.f32.mrf.mxu0  ;;  %2302 = vmatpush3.bf16.msra.mxu0 %v2407_v55 }
 0xf1b   : > { %v1708_v6 = vadd.f32 %v1703_v1, %v2929_v61  ;;  %v2408_v61 = vld [vmem:[%s3104_s6 + $0x10] sm:$0xff]   ;;  %2303 = vmatprep.subr.bf16.mxu0 %v2579_v0 }
 0xf1c   : > { %v1705_v7 = vpop.f32.mrf.mxu0 }
 0xf1d   : > { %v1709_v5 = vsel %vm355_vm1, %v1708_v6, 0.0 }
 0xf1e   : > { %1710 = vadd.xlane.f32.xlu0 %v1709_v5  ;;  %v2292_v8 = vpop.f32.mrf.mxu0  ;;  %2304 = vmatpush3.bf16.msra.mxu0 %v2408_v61 }
 0xf1f   : > { %2305 = vmatprep.subr.bf16.mxu0 %v2579_v0 }
 0xf22   : > { %2306 = vmatpush3.bf16.msra.mxu0 %v2409_v25 }
 0xf23   : > { %2307 = vmatprep.subr.bf16.mxu0 %v2579_v0 }
 0xf26   : > { %2308 = vmatpush3.bf16.msra.mxu0 %v2410_v26 }
 0xfa7   : > { %v1711_v3 = vpop.xlane.xlu0 %1710 }
 0xfa8   : > { %v1712_v10 = vmul.f32 0.03125, %v1711_v3 }
 0xfaa   : > { %v1713_v11 = vsub.f32 %v1708_v6, %v1712_v10 }
 0xfac   : > { %v1714_v12 = vmul.f32 %v1713_v11, %v1713_v11 }
 0xfae   : > { %v1715_v13 = vsel %vm355_vm1, %v1714_v12, 0.0 }
 0xfaf   : > { %1716 = vadd.xlane.f32.xlu1 %v1715_v13 }
0x1038   : > { %v1717_v16 = vpop.xlane.xlu1 %1716 }
0x1039   : > { %v1718_v4 = vmul.f32 0.03125, %v1717_v16 }
0x103b   : > { %v1719_v17 = vadd.f32 1e-05, %v1718_v4 }
0x103d   : > { %2447 = vrsqrt.f32 %v1719_v17 }
0x104a   : > { %v2448_v19 = vpop.eup %2447 }
0x104b   : > { %v1721_v20 = vmul.f32 %v2448_v19, %v1713_v11 }
0x104d   : > { %v1726_v21 = vmul.f32 %v1721_v20, %v2880_v15 }
0x104f   : > { %v1731_v22 = vadd.f32 %v1726_v21, %v2883_v18 }
0x1051   : > { %v1732_v23 = vpack.c.bf16 %v1731_v22, %v1731_v22 }
0x1053   : > { %2298 = vmatmul.mubr.msk.bf16.vlgmr.msra.gmra.mxu1 %vm355_vm1, %v1732_v23 }
0x1113   : > { %v1793_v27 = vpop.f32.mrf.mxu1 }
0x1114   : > { %v1794_v15 = vadd.f32 %v2898_v24, %v1793_v27 }
0x1115   : > { %v2299_v28 = vpop.f32.mrf.mxu1 }
0x1116   : > { %v1799_v18 = vmax.f32 %v1794_v15, 0.0 }
0x1117   : > { %v1796_v29 = vpop.f32.mrf.mxu1 }
0x1118   : > { %v1800_v30 = vpack.c.bf16 %v1799_v18, %v1799_v18 }
0x1119   : > { %v2300_v31 = vpop.f32.mrf.mxu1 }
0x111a   : > { %2310 = vmatmul.mubr.msk.bf16.vlgmr.msra.gmra.mxu0 %vm1053_vm6, %v1800_v30 }
0x11da   : > { %v1874_v32 = vpop.f32.mrf.mxu0 }
0x11db   : > { %v1875_v34 = vadd.f32 %v1874_v32, %v2906_v33 }
0x11dc   : > { %v2311_v35 = vpop.f32.mrf.mxu0 }
0x11dd   : > { %v1880_v0 = vadd.f32 %v1875_v34, %v1731_v22 }
0x11de   : > { %v1877_v36 = vpop.f32.mrf.mxu0 }
0x11df   : > { %v1881_v37 = vsel %vm355_vm1, %v1880_v0, 0.0 }
0x11e0   : > { %1882 = vadd.xlane.f32.xlu0 %v1881_v37  ;;  %v2312_v38 = vpop.f32.mrf.mxu0 }
0x1269   : > { %v1883_v39 = vpop.xlane.xlu0 %1882 }
0x126a   : > { %v1884_v40 = vmul.f32 0.03125, %v1883_v39 }
0x126c   : > { %v1885_v24 = vsub.f32 %v1880_v0, %v1884_v40 }
0x126e   : > { %v1886_v41 = vmul.f32 %v1885_v24, %v1885_v24 }
0x1270   : > { %v1887_v42 = vsel %vm355_vm1, %v1886_v41, 0.0 }
0x1271   : > { %1888 = vadd.xlane.f32.xlu0 %v1887_v42 }
0x12fa   : > { %v1889_v43 = vpop.xlane.xlu0 %1888 }
0x12fb   : > { %v1890_v44 = vmul.f32 0.03125, %v1889_v43 }
0x12fd   : > { %v1891_v45 = vadd.f32 1e-05, %v1890_v44 }
0x12ff   : > { %2449 = vrsqrt.f32 %v1891_v45 }
0x130c   : > { %v2450_v46 = vpop.eup %2449 }
0x130d   : > { %v1893_v33 = vmul.f32 %v2450_v46, %v1885_v24 }
0x130f   : > { %v1898_v47 = vmul.f32 %v1893_v33, %v2922_v56  ;;  %v1919_v56 = vsub.s32 6, %v2852_v52 }
0x1311   : > { %v1903_v48 = vadd.f32 %v1898_v47, %v2925_v59  ;;  %v1924_v59 = vsub.s32 7, %v2852_v52  ;;  %v1920_v1 = vrot.slane %v2858_v54, %v1919_v56 }
0x1313   : > { %v1904_v49 = vsel %vm355_vm1, %v1903_v48, 0.0  ;;  %v1925_v7 = vrot.slane %v2858_v54, %v1924_v59 }
0x1314   : > { %1905 = vadd.xlane.f32.xlu1 %v1904_v49 }
0x139d   : > { %v1906_v50 = vpop.xlane.xlu1 %1905 }
0x139e   : > { %v1907_v51 = vmul.f32 0.03125, %v1906_v50 }
0x13a0   : > { %v1908_v53 = vsub.f32 %v1903_v48, %v1907_v51 }
0x13a2   : > { %v1909_v57 = vmul.f32 %v1908_v53, %v1908_v53 }
0x13a4   : > { %v1910_v58 = vsel %vm355_vm1, %v1909_v57, 0.0 }
0x13a5   : > { %1911 = vadd.xlane.f32.xlu0 %v1910_v58 }
0x142e   : > { %v1912_v60 = vpop.xlane.xlu0 %1911 }
0x142f   : > { %v1913_v62 = vmul.f32 0.03125, %v1912_v60 }
0x1431   : > { %v1914_v63 = vadd.f32 1e-05, %v1913_v62 }
0x1433   : > { %2451 = vrsqrt.f32 %v1914_v63 }
0x1440   : > { %v2452_v2 = vpop.eup %2451 }
0x1441   : > { %v1916_v6 = vmul.f32 %v2452_v2, %v1908_v53 }
0x1443   : > { %v1921_v5 = vmul.f32 %v1920_v1, %v1916_v6 }
0x1445   : > { %v1926_v8 = vadd.f32 %v1925_v7, %v1921_v5 }
0x1447   : > { %1927 = vst.msk [vmem:[%s324_s10] sm:$0xff] %vm355_vm1, %v1926_v8 }
0x1448   : > { %2518 = shalt.err (!%p2515_p4)
}
0x1449   : > { %s2519_s19 = scalar_lea.hbm %s1940_s25, 128  ;;  %s2523_s23 = scalar_lea.hbm %s3106_s8, 256 }
0x144a   : > { %p2520_p7 = scmp.ne.s32.totalorder %s1940_s25, %s2519_s19  ;;  %p2524_p9 = scmp.lt.s32.totalorder %s1940_s25, %s3106_s8 }
0x144b   : > { %p2525_p11 = scmp.lt.s32.totalorder %s2523_s23, %s2519_s19 }
0x144c   : > { %p2521_p13 = pnand %p2520_p7, %p2679_p5 }
0x144d   : > { %p2526_p10 = por %p2525_p11, %p2524_p9 }
0x144e   : > { %p2522_p8 = pneg %p2521_p13 }
0x1450   : > { %p2527_p12 = pnand %p2526_p10, %p2522_p8 }
0x1452   : > { %2530 = shalt.err (!%p2527_p12)
}
0x1453   : > { %2321 = dma.vmem_to_hbm [thread:$0]  (%p2679_p5), %s1943_s12, 128, %s1940_s25, %s1929_s26  }
0x1454 PF: > { %p2338_p0 = scmp.ge.s32.totalorder %s2573_s30, 2  ;;  %s1954_s13 = sand.u32 1, %s2561_s27  }
0x1455   : > { %s1955_s18 = scalar_lea.sflag [#allocation4], %s1954_s13 }
0x1456   : > { %p2331_p1 = pnand %p2338_p0, %p2683_p6 }
0x1458   : > { %p2332_p3 = pneg %p2331_p1 }
0x145a   : > { %2556 = dma.done.wait (%p2332_p3), %s1955_s18, 128  }
0x145b   : > { %2558 = vsyncadd (%p2332_p3), %s1955_s18, 4294967168  ;;  %p20_p2 = scmp.ge.s32.totalorder %s2666_s11, 4   ;;  %s3126_s27 = smov %s2565_s28 }
0x145c   : > { %s3127_s28 = smov %s2569_s29  ;;  %s3128_s29 = smov %s2677_s14 }
0x145d   : > { %s3129_s30 = smov %s2666_s11  ;;  %22 = sbr.rel (!%p20_p2) target bundleno = 5 (0x5), region = 96 }
0x1462   :  { %1960 = vsyncpa [#allocation3], 1 }
0x1463   :  { %1962 = vsyncpa [#allocation3 + $0x1], 1 }
0x1464   :  { %1963 = vsyncpa [#allocation6], 1 }
0x1465   :  { %1964 = vsyncpa [#allocation4], 1 }
0x1466   :  { %1966 = vsyncpa [#allocation4 + $0x1], 1 }

// kernel: tpu_custom_call.1
= control target key start
LH: loop header
LB: loop body
LE: loop exit
PB: predicated region body
PF: predicated region fallthrough
CT: control target
= control target key end

     0   :  { %13 = vsyncpa [#allocation3], 0  ;;  %s3098_s0 = inlined_call_operand.vmem [shape: f32[2,8,32], index: 0, kind: input, shape index: {}]   ;;  %s3099_s1 = inlined_call_operand.vmem [shape: bf16[32,96], index: 1, kind: input, shape index: {}]   ;;  %s3100_s2 = inlined_call_operand.vmem [shape: f32[1,96], index: 2, kind: input, shape index: {}]   ;;  %s3101_s3 = inlined_call_operand.vmem [shape: bf16[32,32], index: 3, kind: input, shape index: {}]   ;;  %s3102_s4 = inlined_call_operand.hbm [shape: bf16[32,64], index: 4, kind: input, shape index: {}]   ;;  %s3103_s5 = inlined_call_operand.hbm [shape: f32[1,64], index: 5, kind: input, shape index: {}]   ;;  %s3104_s6 = inlined_call_operand.vmem [shape: bf16[64,32], index: 6, kind: input, shape index: {}]   ;;  %s3105_s7 = inlined_call_operand.vmem [shape: f32[8,32], index: 7, kind: input, shape index: {}]   ;;  %s3106_s8 = inlined_call_operand.hbm [shape: f32[2,8,32], index: 8, kind: output, shape index: {}]  }
   0x1   :  { %14 = vsyncpa [#allocation6], 0 }
   0x2   :  { %15 = vsyncpa [#allocation4], 0 }
   0x3   :  { %17 = vsyncpa [#allocation4 + $0x1], 0  ;;  %s2641_s27 = smov 0   ;;  %s2643_s28 = smov 0  }
   0x4   :  { %s2645_s29 = smov 0   ;;  %s2647_s30 = smov 0  }
   0x5 LB: > { %s2662_s9 = sadd.s32 4294967295, %s2573_s30   ;;  %s2023_s10 = sadd.s32 4294967294, %s2573_s30   ;;  %s2573_s30 = sphi %s2647_s30, %s3129_s30   ;;  %s2569_s29 = sphi %s2645_s29, %s3128_s29   ;;  %s2565_s28 = sphi %s2643_s28, %s3127_s28   ;;  %s2561_s27 = sphi %s2641_s27, %s3126_s27  }
   0x6   : > { %s2666_s11 = sadd.s32 1, %s2573_s30   ;;  %s203_s12 = sadd.s32 1, %s2569_s29 }
   0x7   : > { %s200_s13 = ssub.s32 %s2573_s30, %s2666_s11  ;;  %p213_p0 = scmp.ne.s32.totalorder %s2569_s29, %s2565_s28 }
   0x8   : > { %p201_p1 = scmp.eq.s32.totalorder %s200_s13, 0  ;;  %p214_p2 = scmp.eq.s32.totalorder %s2662_s9, 1 }
   0x9   : > { %p219_p3 = scmp.ne.s32.totalorder %s2565_s28, %s2561_s27  ;;  %p220_p4 = scmp.eq.s32.totalorder %s2023_s10, 1 }
   0xa   : > { %s2677_s14 = scalar_select %p201_p1, %s2569_s29, %s203_s12  }
   0xb   : > { %p2679_p5 = por %p214_p2, %p213_p0  ;;  %p2683_p6 = por %p220_p4, %p219_p3 }
   0xc   : > { %p2024_p7 = scmp.ge.s32.totalorder %s2573_s30, 1  ;;  %p227_p8 = scmp.lt.s32.totalorder %s2573_s30, 3 }
   0xd   : > { %p3107_p9 = scmp.eq.s32.totalorder %s2662_s9, 0  ;;  %s2575_s18 = smov [#allocation2]  }
   0xe   : > { %p2690_p10 = pnand %p2024_p7, %p227_p8  ;;  %s248_s19 = sshll.u32 %s2575_s18, 4  ;;  %s249_s19 = int_to_ptr.vmem [resolvable:$true] %s248_s19 }
   0xf   : > { %s2576_s21 = smov [#allocation5]   ;;  %s2464_s23 = scalar_lea.vmem %s249_s19, 256 }
  0x10   : > { %p2323_p11 = pneg %p2690_p10  ;;  %s262_s22 = sshll.u32 %s2576_s21, 4  ;;  %s263_s22 = int_to_ptr.vmem [resolvable:$true] %s262_s22 }
  0x11   : > { %p2465_p0 = scmp.ne.s32.totalorder %s249_s19, %s2464_s23  ;;  %p2472_p3 = scmp.lt.s32.totalorder %s249_s19, %s249_s19 }
  0x12   : > { %p2698_p12 = pnand %p3107_p9, %p2323_p11  ;;  %p2473_p4 = scmp.lt.s32.totalorder %s2464_s23, %s2464_s23 }
  0x14   : > { %p2455_p13 = pneg %p2698_p12  ;;  %p2474_p7 = por %p2473_p4, %p2472_p3 }
  0x16   : > { %p2467_p1 = pnand %p2465_p0, %p2455_p13 }
  0x18   : > { %p2468_p2 = pneg %p2467_p1 }
  0x1a   : > { %p2475_p8 = pnand %p2474_p7, %p2468_p2 }
  0x1c   : > { %2478 = shalt.err (!%p2475_p8)
}
  0x1d   : > { %s2577_s24 = smov 64   ;;  %s2578_s25 = smov 4  }
  0x1e   : > { %2326 = dma.hbm_to_vmem [thread:$0]  (!%p2698_p12), %s3102_s4, 256, %s249_s19, [#allocation3], %s2577_s24, %s2577_s24, %s2578_s25  }
  0x1f   : > { %s2490_s12 = scalar_lea.vmem %s263_s22, 16  ;;  %s2497_s13 = scalar_lea.vmem %s263_s22, 32 }
  0x20   : > { %p2491_p11 = scmp.ne.s32.totalorder %s263_s22, %s2490_s12  ;;  %p2498_p9 = scmp.lt.s32.totalorder %s263_s22, %s263_s22 }
  0x21   : > { %p2499_p3 = scmp.lt.s32.totalorder %s2497_s13, %s2490_s12 }
  0x22   : > { %p2493_p0 = pnand %p2491_p11, %p2455_p13 }
  0x23   : > { %p2500_p2 = por %p2499_p3, %p2498_p9 }
  0x24   : > { %p2494_p1 = pneg %p2493_p0 }
  0x26   : > { %p2501_p4 = pnand %p2500_p2, %p2494_p1 }
  0x28   : > { %2504 = shalt.err (!%p2501_p4)
}
  0x29   : > { %2329 = dma.hbm_to_vmem [thread:$0]  (!%p2698_p12), %s3103_s5, 16, %s263_s22, [#allocation6]  }
  0x2a   : > { %288 = sbr.rel (%p2690_p10) target bundleno = 5204 (0x1454), region = 52  ;;  %p3117_p7 = scmp.eq.s32.totalorder (!%p2690_p10), %s2662_s9, 0 }
  0x2f   : > { %2548 = dma.done.wait (%p3117_p7), [#allocation3], 256   ;;  %p3118_p13 = pmov %p3117_p7 }
  0x30   : > { %p3119_p8 = pmov %p3117_p7 }
  0x31   : > { %2550 = vsyncadd (%p3118_p13), [#allocation3], 4294967040 }
  0x32   : > { %2552 = dma.done.wait (%p3119_p8), [#allocation6], 16   ;;  %p3120_p9 = pmov %p3117_p7 }
  0x33   : > { %p325_p11 = scmp.lt.s32.totalorder %s2662_s9, 1  ;;  %v2579_v0 = vmov 0.0   ;;  %vm2580_vm0 = vmmov 0   ;;  %v2391_v1 = vld [vmem:[%s3099_s1 + $0x8] sm:$0xff]   ;;  %v2392_v2 = vld [vmem:[%s3099_s1] sm:$0xff]   ;;  %vm355_vm1 = vcmask 261120  }
  0x34   : > { %2554 = vsyncadd (%p3120_p9), [#allocation6], 4294967280  ;;  %2145 = vmatprep.subr.bf16.mxu1 %v2579_v0  ;;  %2149 = vmatprep.mubr.msk.bf16.mxu1 %vm2580_vm0, %v2579_v0  ;;  %v2759_v5 = vld [vmem:[%s3100_s2] ss:$0 sm:$0xff]  ;;  %s2581_s18 = smov 120   ;;  %s2582_s21 = smov 96  }
  0x35   : > { %s326_s17 = scalar_select %p325_p11, %s2662_s9, 1  ;;  %2159 = vmatprep.subr.bf16.mxu0 %v2579_v0  ;;  %2161 = vmatprep.mubr.msk.bf16.mxu0 %vm2580_vm0, %v2579_v0  ;;  %vm403_vm2 = vcmask 64512   ;;  %vm467_vm3 = vcmask 1043456   ;;  %vm854_vm4 = vcmask 130048   ;;  %vm856_vm5 = vcmask 195584  }
  0x36   : > { %2146 = vmatpush3.bf16.msra.mxu1 %v2391_v1  ;;  %s2585_s20 = smov 72   ;;  %s2586_s22 = smov 112   ;;  %vm1053_vm6 = vcmask 523264  }
  0x37   : > { %s2032_s19 = sshll.u32 %s326_s17, 3  ;;  %2147 = vmatprep.subr.bf16.mxu1 %v2579_v0  ;;  %s2583_s17 = smov 80  }
  0x38   : > { %s328_s23 = scalar_lea.vmem %s3098_s0, %s2032_s19  ;;  %s2584_s19 = smov 88  }
  0x39   : > { %v2747_v3 = vld [vmem:[%s328_s23] sm:$0xff]  ;;  %s2587_s23 = smov 104   ;;  %s3111_s24 = smov 56  }
  0x3a   : > { %v331_v4 = vpack.c.bf16 %v2747_v3, %v2747_v3  ;;  %2148 = vmatpush3.bf16.msra.mxu1 %v2392_v2  ;;  %s3110_s25 = smov 64   ;;  %s3109_s26 = smov 40  }
  0x3b   : > { %2153 = vmatprep.subr.bf16.mxu1 %v2579_v0  ;;  %s3108_s10 = smov 48   ;;  %s2592_s12 = smov 8  }
  0x3d   : > { %2150 = vmatmul.mubr.msk.bf16.vlgmr.msra.gmra.mxu1 %vm355_vm1, %v331_v4 }
  0x3e   : > { %2155 = vmatprep.mubr.msk.bf16.mxu1 %vm2580_vm0, %v2579_v0 }
  0xfd   : > { %v393_v6 = vpop.f32.mrf.mxu1 }
  0xfe   : > { %v394_v7 = vadd.f32 %v2759_v5, %v393_v6 }
  0xff   : > { %v2151_v8 = vpop.f32.mrf.mxu1 }
 0x100   : > { %v2762_v9 = vpack.c.bf16 %v394_v7, %v394_v7 }
 0x101   : > { %v396_v10 = vpop.f32.mrf.mxu1 }
 0x102   : > { %511 = vrot.lane.b32.xlu1 %v2762_v9, %s2581_s18  ;;  %401 = vrot.lane.b32.xlu0 %v2762_v9, %s2582_s21 }
 0x103   : > { %v2152_v11 = vpop.f32.mrf.mxu1 }
 0x106   : > { %623 = vrot.lane.b32.xlu1 %v2762_v9, %s2583_s17  ;;  %513 = vrot.lane.b32.xlu0 %v2762_v9, %s2584_s19 }
 0x10a   : > { %733 = vrot.lane.b32.xlu1 %v2762_v9, %s2585_s20  ;;  %621 = vrot.lane.b32.xlu0 %v2762_v9, %s2586_s22 }
 0x10e   : > { %731 = vrot.lane.b32.xlu0 %v2762_v9, %s2587_s23 }
 0x174   : > { %v402_v12 = vpop.permute.xlu0 %401  ;;  %v512_v15 = vpop.permute.xlu1 %511 }
 0x175   : > { %v408_v13 = vsel %vm403_vm2, %v402_v12, 0 }
 0x176   : > { %2154 = vmatpush3.bf16.xpose.msra.mxu1 %v408_v13 }
 0x177   : > { %2165 = vmatprep.subr.bf16.mxu1 %v2579_v0 }
 0x178   : > { %v514_v14 = vpop.permute.xlu0 %513  ;;  %v624_v17 = vpop.permute.xlu1 %623 }
 0x179   : > { %v519_v16 = vsel %vm403_vm2, %v514_v14, 0  ;;  %v629_v18 = vsel %vm403_vm2, %v624_v17, 0 }
 0x17c   : > { %v734_v19 = vpop.permute.xlu1 %733  ;;  %v622_v20 = vpop.permute.xlu0 %621 }
 0x17d   : > { %2156 = vmatmul.mubr.msk.bf16.vlgmr.msra.gmra.mxu1 %vm403_vm2, %v2762_v9  ;;  %v739_v21 = vsel %vm403_vm2, %v734_v19, 0 }
 0x17e   : > { %2166 = vmatpush3.bf16.xpose.msra.mxu1 %v519_v16  ;;  %2167 = vmatprep.mubr.msk.bf16.mxu1 %vm2580_vm0, %v2579_v0 }
 0x17f   : > { %2177 = vmatprep.subr.bf16.mxu1 %v2579_v0 }
 0x180   : > { %v732_v22 = vpop.permute.xlu0 %731 }
 0x185   : > { %2168 = vmatmul.mubr.msk.bf16.vlgmr.msra.gmra.mxu1 %vm403_vm2, %v512_v15 }
 0x186   : > { %2178 = vmatpush3.bf16.xpose.msra.mxu1 %v629_v18  ;;  %2179 = vmatprep.mubr.msk.bf16.mxu1 %vm2580_vm0, %v2579_v0 }
 0x187   : > { %2189 = vmatprep.subr.bf16.mxu1 %v2579_v0 }
 0x18d   : > { %2180 = vmatmul.mubr.msk.bf16.vlgmr.msra.gmra.mxu1 %vm403_vm2, %v622_v20 }
 0x18e   : > { %2190 = vmatpush3.bf16.xpose.msra.mxu1 %v739_v21  ;;  %2191 = vmatprep.mubr.msk.bf16.mxu1 %vm2580_vm0, %v2579_v0 }
 0x18f   : > { %2201 = vmatprep.subr.bf16.mxu1 %v2579_v0 }
 0x195   : > { %2192 = vmatmul.mubr.msk.bf16.vlgmr.msra.gmra.mxu1 %vm403_vm2, %v732_v22 }
 0x196   : > { %2205 = vmatprep.mubr.msk.bf16.mxu1 %vm2580_vm0, %v2579_v0 }
 0x23d   : > { %v444_v23 = vpop.f32.mrf.mxu1 }
 0x23e   : > { %v450_v24 = vsel %vm403_vm2, %v444_v23, -inf }
 0x23f   : > { %451 = vmax.xlane.f32.xlu1 %v450_v24  ;;  %v2157_v25 = vpop.f32.mrf.mxu1 }
 0x241   : > { %v447_v26 = vpop.f32.mrf.mxu1 }
 0x243   : > { %v2158_v27 = vpop.f32.mrf.mxu1 }
 0x245   : > { %v555_v28 = vpop.f32.mrf.mxu1 }
 0x246   : > { %v561_v29 = vsel %vm403_vm2, %v555_v28, -inf }
 0x247   : > { %562 = vmax.xlane.f32.xlu0 %v561_v29  ;;  %v2169_v30 = vpop.f32.mrf.mxu1 }
 0x249   : > { %v558_v31 = vpop.f32.mrf.mxu1 }
 0x24b   : > { %v2170_v32 = vpop.f32.mrf.mxu1 }
 0x24d   : > { %v665_v33 = vpop.f32.mrf.mxu1 }
 0x24e   : > { %v671_v34 = vsel %vm403_vm2, %v665_v33, -inf }
 0x24f   : > { %672 = vmax.xlane.f32.xlu0 %v671_v34  ;;  %v2181_v35 = vpop.f32.mrf.mxu1  ;;  %v2393_v34 = vld [vmem:[%s3101_s3 + $0x8] sm:$0xff]  }
 0x250   : > { %2202 = vmatpush3.bf16.msra.mxu1 %v2393_v34  ;;  %v2394_v35 = vld [vmem:[%s3101_s3] sm:$0xff]  }
 0x251   : > { %v668_v36 = vpop.f32.mrf.mxu1  ;;  %2203 = vmatprep.subr.bf16.mxu1 %v2579_v0 }
 0x253   : > { %v2182_v37 = vpop.f32.mrf.mxu1 }
 0x254   : > { %2204 = vmatpush3.bf16.msra.mxu1 %v2394_v35 }
 0x255   : > { %v775_v38 = vpop.f32.mrf.mxu1  ;;  %2217 = vmatprep.subr.bf16.mxu1 %v2579_v0 }
 0x256   : > { %v781_v39 = vsel %vm403_vm2, %v775_v38, -inf }
 0x257   : > { %782 = vmax.xlane.f32.xlu1 %v781_v39  ;;  %v2193_v40 = vpop.f32.mrf.mxu1 }
 0x259   : > { %v778_v41 = vpop.f32.mrf.mxu1 }
 0x25b   : > { %v2194_v42 = vpop.f32.mrf.mxu1 }
 0x2c8   : > { %v452_v43 = vpop.xlane.xlu1 %451 }
 0x2c9   : > { %v453_v44 = vsub.f32 %v444_v23, %v452_v43 }
 0x2cb   : > { %v454_v45 = vmul.f32 1.442695, %v453_v44 }
 0x2cd   : > { %2411 = vpow2.f32 %v454_v45 }
 0x2d0   : > { %v563_v46 = vpop.xlane.xlu0 %562 }
 0x2d1   : > { %v564_v47 = vsub.f32 %v555_v28, %v563_v46 }
 0x2d3   : > { %v565_v48 = vmul.f32 1.442695, %v564_v47 }
 0x2d5   : > { %2413 = vpow2.f32 %v565_v48 }
 0x2d8   : > { %v673_v49 = vpop.xlane.xlu0 %672 }
 0x2d9   : > { %v674_v50 = vsub.f32 %v665_v33, %v673_v49 }
 0x2da   : > { %v2412_v51 = vpop.eup %2411 }
 0x2db   : > { %v675_v52 = vmul.f32 1.442695, %v674_v50  ;;  %v456_v53 = vsel %vm403_vm2, %v2412_v51, 0.0 }
 0x2dc   : > { %457 = vadd.xlane.f32.xlu0 %v456_v53 }
 0x2dd   : > { %2415 = vpow2.f32 %v675_v52 }
 0x2e0   : > { %v783_v58 = vpop.xlane.xlu1 %782 }
 0x2e1   : > { %v784_v59 = vsub.f32 %v775_v38, %v783_v58 }
 0x2e2   : > { %v2414_v54 = vpop.eup %2413 }
 0x2e3   : > { %v567_v55 = vsel %vm403_vm2, %v2414_v54, 0.0  ;;  %v785_v60 = vmul.f32 1.442695, %v784_v59 }
 0x2e4   : > { %568 = vadd.xlane.f32.xlu1 %v567_v55 }
 0x2e5   : > { %2417 = vpow2.f32 %v785_v60 }
 0x2ea   : > { %v2416_v56 = vpop.eup %2415 }
 0x2eb   : > { %v677_v57 = vsel %vm403_vm2, %v2416_v56, 0.0 }
 0x2ec   : > { %678 = vadd.xlane.f32.xlu0 %v677_v57 }
 0x2f2   : > { %v2418_v61 = vpop.eup %2417 }
 0x2f3   : > { %v787_v62 = vsel %vm403_vm2, %v2418_v61, 0.0 }
 0x2f5   : > { %573 = vrot.lane.b32.xlu1 %v2762_v9, %s3111_s24  ;;  %s2593_s24 = smov 16  }
 0x302   : > { %462 = vrot.lane.b32.xlu0 %v2762_v9, %s3110_s25 }
 0x306   : > { %793 = vrot.lane.b32.xlu0 %v2762_v9, %s3109_s26 }
 0x319   : > { %788 = vadd.xlane.f32.xlu1 %v787_v62 }
 0x32a   : > { %683 = vrot.lane.b32.xlu1 %v2762_v9, %s3108_s10  ;;  %s3112_s10 = smov 24  }
 0x365   : > { %v458_v63 = vpop.xlane.xlu0 %457 }
 0x366   : > { %2419 = vrcp.f32 %v458_v63 }
 0x36d   : > { %v569_v1 = vpop.xlane.xlu1 %568 }
 0x36e   : > { %2421 = vrcp.f32 %v569_v1 }
 0x371   : > { %v574_v10 = vpop.permute.xlu1 %573 }
 0x372   : > { %v579_v13 = vsel %vm467_vm3, %v574_v10, 0  ;;  %v2398_v10 = vld [vmem:[%s3104_s6 + $0x10] sm:$0xff]  }
 0x373   : > { %v2420_v2 = vpop.eup %2419 }
 0x374   : > { %v460_v6 = vmul.f32 %v2420_v2, %v2412_v51  ;;  %v864_v51 = vlaneseq }
 0x375   : > { %v679_v4 = vpop.xlane.xlu0 %678 }
 0x376   : > { %v461_v11 = vpack.c.bf16 %v460_v6, %v460_v6  ;;  %2423 = vrcp.f32 %v679_v4  ;;  %v2852_v52 = vshrl.u32 %v864_v51, 7 }
 0x378   : > { %v866_v53 = vsub.s32 0, %v2852_v52  ;;  %v1113_v51 = vsub.s32 4, %v2852_v52 }
 0x379   : > { %v463_v7 = vpop.permute.xlu0 %462 }
 0x37a   : > { %v469_v8 = vsel %vm467_vm3, %v463_v7, 0  ;;  %v2395_v7 = vld [vmem:[#allocation2 + $0x8] sm:$0xff]  }
 0x37b   : > { %2160 = vmatpush3.bf16.msra.mxu0 %v469_v8  ;;  %v2422_v12 = vpop.eup %2421  ;;  %v2396_v8 = vld [vmem:[#allocation2] sm:$0xff]  }
 0x37c   : > { %2171 = vmatprep.subr.bf16.mxu0 %v2579_v0  ;;  %v571_v9 = vmul.f32 %v2422_v12, %v2414_v54  ;;  %v2858_v54 = vld [vmem:[%s3105_s7] sm:$0xff] }
 0x37d   : > { %v794_v20 = vpop.permute.xlu0 %793  ;;  %v2861_v55 = vrot.slane %v2858_v54, %v866_v53  ;;  %v1118_v53 = vsub.s32 5, %v2852_v52 }
 0x37e   : > { %2162 = vmatmul.mubr.msk.bf16.vlgmr.msra.gmra.mxu0 %vm403_vm2, %v461_v11  ;;  %v572_v14 = vpack.c.bf16 %v571_v9, %v571_v9  ;;  %v799_v22 = vsel %vm467_vm3, %v794_v20, 0  ;;  %v940_v9 = vsub.s32 2, %v2852_v52 }
 0x37f   : > { %2172 = vmatpush3.bf16.msra.mxu0 %v579_v13  ;;  %2173 = vmatprep.mubr.msk.bf16.mxu0 %vm2580_vm0, %v2579_v0 }
 0x380   : > { %2183 = vmatprep.subr.bf16.mxu0 %v2579_v0 }
 0x383   : > { %v2424_v15 = vpop.eup %2423 }
 0x384   : > { %v681_v17 = vmul.f32 %v2424_v15, %v2416_v56  ;;  %v2880_v15 = vrot.slane %v2858_v54, %v940_v9 }
 0x386   : > { %2174 = vmatmul.mubr.msk.bf16.vlgmr.msra.gmra.mxu0 %vm403_vm2, %v572_v14  ;;  %v682_v21 = vpack.c.bf16 %v681_v17, %v681_v17  ;;  %v945_v14 = vsub.s32 3, %v2852_v52 }
 0x387   : > { %2185 = vmatprep.mubr.msk.bf16.mxu0 %vm2580_vm0, %v2579_v0 }
 0x3a2   : > { %v789_v16 = vpop.xlane.xlu1 %788 }
 0x3a3   : > { %2425 = vrcp.f32 %v789_v16 }
 0x3a6   : > { %v684_v18 = vpop.permute.xlu1 %683 }
 0x3a7   : > { %v689_v19 = vsel %vm467_vm3, %v684_v18, 0  ;;  %v2883_v18 = vrot.slane %v2858_v54, %v945_v14 }
 0x3a8   : > { %2184 = vmatpush3.bf16.msra.mxu0 %v689_v19 }
 0x3a9   : > { %2195 = vmatprep.subr.bf16.mxu0 %v2579_v0 }
 0x3ab   : > { %2186 = vmatmul.mubr.msk.bf16.vlgmr.msra.gmra.mxu0 %vm403_vm2, %v682_v21 }
 0x3ac   : > { %2196 = vmatpush3.bf16.msra.mxu0 %v799_v22  ;;  %2197 = vmatprep.mubr.msk.bf16.mxu0 %vm2580_vm0, %v2579_v0  ;;  %v2399_v22 = vld [vmem:[%s3104_s6 + $0x8] sm:$0xff]  }
 0x3ad   : > { %2209 = vmatprep.subr.bf16.mxu0 %v2579_v0 }
 0x3b0   : > { %v2426_v23 = vpop.eup %2425 }
 0x3b1   : > { %v791_v24 = vmul.f32 %v2426_v23, %v2418_v61  ;;  %v2400_v23 = vld [vmem:[%s3104_s6] sm:$0xff]  }
 0x3b3   : > { %v792_v25 = vpack.c.bf16 %v791_v24, %v791_v24  ;;  %v2898_v24 = vld [vmem:[#allocation5] ss:$0 sm:$0xff] }
 0x3b5   : > { %2198 = vmatmul.mubr.msk.bf16.vlgmr.msra.gmra.mxu0 %vm403_vm2, %v792_v25 }
 0x3b6   : > { %2213 = vmatprep.mubr.msk.bf16.mxu0 %vm2580_vm0, %v2579_v0  ;;  %2210 = vmatpush3.bf16.msra.mxu0 %v2395_v7 }
 0x3b7   : > { %2211 = vmatprep.subr.bf16.mxu0 %v2579_v0 }
 0x3ba   : > { %2212 = vmatpush3.bf16.msra.mxu0 %v2396_v8 }
 0x3bb   : > { %2229 = vmatprep.subr.bf16.mxu0 %v2579_v0 }
 0x43e   : > { %v505_v26 = vpop.f32.mrf.mxu0 }
 0x440   : > { %v2163_v27 = vpop.f32.mrf.mxu0 }
 0x442   : > { %v508_v28 = vpop.f32.mrf.mxu0 }
 0x444   : > { %v2164_v29 = vpop.f32.mrf.mxu0 }
 0x446   : > { %v615_v30 = vpop.f32.mrf.mxu0 }
 0x447   : > { %842 = vrot.lane.b32.xlu1 %v615_v30, %s2592_s12 }
 0x448   : > { %v2175_v31 = vpop.f32.mrf.mxu0 }
 0x44a   : > { %v618_v32 = vpop.f32.mrf.mxu0 }
 0x44b   : > { %v1027_v32 = vsub.s32 1, %v2852_v52 }
 0x44c   : > { %v2176_v33 = vpop.f32.mrf.mxu0 }
 0x44d   : > { %v2906_v33 = vrot.slane %v2858_v54, %v1027_v32 }
 0x46b   : > { %v725_v36 = vpop.f32.mrf.mxu0 }
 0x46c   : > { %846 = vrot.lane.b32.xlu0 %v725_v36, %s2593_s24 }
 0x46d   : > { %v2187_v37 = vpop.f32.mrf.mxu0 }
 0x46f   : > { %v728_v38 = vpop.f32.mrf.mxu0 }
 0x471   : > { %v2188_v39 = vpop.f32.mrf.mxu0 }
 0x475   : > { %v835_v40 = vpop.f32.mrf.mxu0 }
 0x476   : > { %850 = vrot.lane.b32.xlu1 %v835_v40, %s3112_s10 }
 0x477   : > { %v2199_v41 = vpop.f32.mrf.mxu0 }
 0x479   : > { %v838_v42 = vpop.f32.mrf.mxu0 }
 0x47b   : > { %v2200_v43 = vpop.f32.mrf.mxu0 }
 0x4b9   : > { %v843_v44 = vpop.permute.xlu1 %842 }
 0x4ba   : > { %v853_v46 = vsel %vm403_vm2, %v505_v26, %v843_v44 }
 0x4de   : > { %v847_v45 = vpop.permute.xlu0 %846 }
 0x4df   : > { %v855_v47 = vsel %vm854_vm4, %v853_v46, %v847_v45  ;;  %v2401_v46 = vld [vmem:[%s3099_s1 + $0x8] sm:$0xff]  }
 0x4e8   : > { %v851_v48 = vpop.permute.xlu1 %850 }
 0x4e9   : > { %v857_v49 = vsel %vm856_vm5, %v855_v47, %v851_v48  ;;  %v2402_v47 = vld [vmem:[%s3099_s1] sm:$0xff]  }
 0x4ea   : > { %v858_v50 = vpack.c.bf16 %v857_v49, %v857_v49 }
 0x4ec   : > { %2206 = vmatmul.mubr.msk.bf16.vlgmr.msra.gmra.mxu1 %vm355_vm1, %v858_v50 }
 0x4ed   : > { %2225 = vmatprep.mubr.msk.bf16.mxu1 %vm2580_vm0, %v2579_v0 }
 0x5ac   : > { %v917_v56 = vpop.f32.mrf.mxu1 }
 0x5ad   : > { %v918_v57 = vadd.f32 %v917_v56, %v2861_v55  ;;  %v2922_v56 = vrot.slane %v2858_v54, %v1113_v51 }
 0x5ae   : > { %v2207_v58 = vpop.f32.mrf.mxu1 }
 0x5af   : > { %v923_v59 = vadd.f32 %v918_v57, %v2747_v3  ;;  %v2397_v3 = vld [vmem:[%s3104_s6 + $0x18] sm:$0xff]  }
 0x5b0   : > { %v920_v60 = vpop.f32.mrf.mxu1  ;;  %2218 = vmatpush3.bf16.msra.mxu1 %v2397_v3 }
 0x5b1   : > { %v924_v61 = vsel %vm355_vm1, %v923_v59, 0.0  ;;  %2219 = vmatprep.subr.bf16.mxu1 %v2579_v0 }
 0x5b2   : > { %925 = vadd.xlane.f32.xlu0 %v924_v61  ;;  %v2208_v62 = vpop.f32.mrf.mxu1 }
 0x5b4   : > { %2220 = vmatpush3.bf16.msra.mxu1 %v2398_v10 }
 0x5b5   : > { %2221 = vmatprep.subr.bf16.mxu1 %v2579_v0 }
 0x5b8   : > { %2222 = vmatpush3.bf16.msra.mxu1 %v2399_v22 }
 0x5b9   : > { %2223 = vmatprep.subr.bf16.mxu1 %v2579_v0 }
 0x5bc   : > { %2224 = vmatpush3.bf16.msra.mxu1 %v2400_v23 }
 0x5bd   : > { %2243 = vmatprep.subr.bf16.mxu1 %v2579_v0 }
 0x63b   : > { %v926_v63 = vpop.xlane.xlu0 %925 }
 0x63c   : > { %v928_v1 = vmul.f32 0.03125, %v926_v63 }
 0x63e   : > { %v929_v2 = vsub.f32 %v923_v59, %v928_v1  ;;  %v2925_v59 = vrot.slane %v2858_v54, %v1118_v53 }
 0x640   : > { %v930_v4 = vmul.f32 %v929_v2, %v929_v2 }
 0x642   : > { %v931_v6 = vsel %vm355_vm1, %v930_v4, 0.0 }
 0x643   : > { %932 = vadd.xlane.f32.xlu1 %v931_v6 }
 0x6cc   : > { %v933_v11 = vpop.xlane.xlu1 %932 }
 0x6cd   : > { %v934_v12 = vmul.f32 0.03125, %v933_v11 }
 0x6cf   : > { %v935_v13 = vadd.f32 1e-05, %v934_v12 }
 0x6d1   : > { %2427 = vrsqrt.f32 %v935_v13 }
 0x6de   : > { %v2428_v16 = vpop.eup %2427 }
 0x6df   : > { %v937_v17 = vmul.f32 %v2428_v16, %v929_v2 }
 0x6e1   : > { %v942_v19 = vmul.f32 %v2880_v15, %v937_v17 }
 0x6e3   : > { %v947_v20 = vadd.f32 %v2883_v18, %v942_v19 }
 0x6e5   : > { %v948_v21 = vpack.c.bf16 %v947_v20, %v947_v20 }
 0x6e7   : > { %2214 = vmatmul.mubr.msk.bf16.vlgmr.msra.gmra.mxu0 %vm355_vm1, %v948_v21 }
 0x6e8   : > { %2233 = vmatprep.mubr.msk.bf16.mxu0 %vm2580_vm0, %v2579_v0  ;;  %2230 = vmatpush3.bf16.msra.mxu0 %v2401_v46 }
 0x6e9   : > { %2231 = vmatprep.subr.bf16.mxu0 %v2579_v0 }
 0x6ec   : > { %2232 = vmatpush3.bf16.msra.mxu0 %v2402_v47 }
 0x6ed   : > { %2237 = vmatprep.subr.bf16.mxu0 %v2579_v0 }
 0x7a7   : > { %v1009_v25 = vpop.f32.mrf.mxu0 }
 0x7a8   : > { %v1010_v26 = vadd.f32 %v2898_v24, %v1009_v25 }
 0x7a9   : > { %v2215_v27 = vpop.f32.mrf.mxu0 }
 0x7aa   : > { %v1015_v28 = vmax.f32 %v1010_v26, 0.0 }
 0x7ab   : > { %v1012_v29 = vpop.f32.mrf.mxu0 }
 0x7ac   : > { %v1016_v30 = vpack.c.bf16 %v1015_v28, %v1015_v28 }
 0x7ad   : > { %v2216_v31 = vpop.f32.mrf.mxu0 }
 0x7ae   : > { %2226 = vmatmul.mubr.msk.bf16.vlgmr.msra.gmra.mxu1 %vm1053_vm6, %v1016_v30 }
 0x7af   : > { %2245 = vmatprep.mubr.msk.bf16.mxu1 %vm2580_vm0, %v2579_v0 }
 0x86e   : > { %v1091_v34 = vpop.f32.mrf.mxu1 }
 0x86f   : > { %v1092_v35 = vadd.f32 %v1091_v34, %v2906_v33 }
 0x870   : > { %v2227_v36 = vpop.f32.mrf.mxu1 }
 0x871   : > { %v1097_v37 = vadd.f32 %v1092_v35, %v947_v20 }
 0x872   : > { %v1094_v38 = vpop.f32.mrf.mxu1 }
 0x873   : > { %v1098_v39 = vsel %vm355_vm1, %v1097_v37, 0.0 }
 0x874   : > { %1099 = vadd.xlane.f32.xlu0 %v1098_v39  ;;  %v2228_v40 = vpop.f32.mrf.mxu1 }
 0x8fd   : > { %v1100_v41 = vpop.xlane.xlu0 %1099 }
 0x8fe   : > { %v1101_v42 = vmul.f32 0.03125, %v1100_v41 }
 0x900   : > { %v1102_v43 = vsub.f32 %v1097_v37, %v1101_v42 }
 0x902   : > { %v1103_v44 = vmul.f32 %v1102_v43, %v1102_v43 }
 0x904   : > { %v1104_v45 = vsel %vm355_vm1, %v1103_v44, 0.0 }
 0x905   : > { %1105 = vadd.xlane.f32.xlu0 %v1104_v45 }
 0x98e   : > { %v1106_v48 = vpop.xlane.xlu0 %1105 }
 0x98f   : > { %v1107_v49 = vmul.f32 0.03125, %v1106_v48 }
 0x991   : > { %v1108_v50 = vadd.f32 1e-05, %v1107_v49 }
 0x993   : > { %2429 = vrsqrt.f32 %v1108_v50 }
 0x9a0   : > { %v2430_v57 = vpop.eup %2429 }
 0x9a1   : > { %v1110_v58 = vmul.f32 %v2430_v57, %v1102_v43 }
 0x9a3   : > { %v1115_v60 = vmul.f32 %v2922_v56, %v1110_v58 }
 0x9a5   : > { %v2929_v61 = vadd.f32 %v2925_v59, %v1115_v60 }
 0x9a7   : > { %v1121_v62 = vpack.c.bf16 %v2929_v61, %v2929_v61 }
 0x9a9   : > { %2234 = vmatmul.mubr.msk.bf16.vlgmr.msra.gmra.mxu0 %vm355_vm1, %v1121_v62 }
 0x9aa   : > { %2239 = vmatprep.mubr.msk.bf16.mxu0 %vm2580_vm0, %v2579_v0 }
 0xa69   : > { %v1182_v63 = vpop.f32.mrf.mxu0 }
 0xa6a   : > { %v1183_v1 = vadd.f32 %v2759_v5, %v1182_v63 }
 0xa6b   : > { %v2235_v2 = vpop.f32.mrf.mxu0 }
 0xa6c   : > { %v2937_v4 = vpack.c.bf16 %v1183_v1, %v1183_v1 }
 0xa6d   : > { %v1185_v6 = vpop.f32.mrf.mxu0 }
 0xa6e   : > { %1300 = vrot.lane.b32.xlu0 %v2937_v4, %s2584_s19  ;;  %1190 = vrot.lane.b32.xlu1 %v2937_v4, %s2582_s21  ;;  %s3122_s21 = smov 64   ;;  %s3124_s19 = smov 48  }
 0xa6f   : > { %v2236_v7 = vpop.f32.mrf.mxu0 }
 0xa72   : > { %1408 = vrot.lane.b32.xlu0 %v2937_v4, %s2586_s22  ;;  %1298 = vrot.lane.b32.xlu1 %v2937_v4, %s2581_s18  ;;  %s3121_s18 = smov 56  }
 0xa76   : > { %1518 = vrot.lane.b32.xlu0 %v2937_v4, %s2587_s23  ;;  %1410 = vrot.lane.b32.xlu1 %v2937_v4, %s2583_s17  ;;  %s3123_s17 = smov 40   ;;  %s2082_s23 = sshll.u32 %s2662_s9, 7 }
 0xa77   : > { %s1940_s25 = scalar_lea.hbm %s3106_s8, %s2082_s23 }
 0xa7a   : > { %1520 = vrot.lane.b32.xlu1 %v2937_v4, %s2585_s20  ;;  %s322_s20 = sand.u32 1, %s2565_s28  }
 0xa7b   : > { %s2031_s22 = sshll.u32 %s322_s20, 3  ;;  %s1929_s26 = scalar_lea.sflag [#allocation4], %s322_s20 }
 0xa7c   : > { %s324_s10 = scalar_lea.vmem [#allocation7], %s2031_s22 }
 0xae0   : > { %v1191_v5 = vpop.permute.xlu1 %1190  ;;  %v1301_v3 = vpop.permute.xlu0 %1300 }
 0xae1   : > { %v1196_v8 = vsel %vm403_vm2, %v1191_v5, 0  ;;  %v1306_v11 = vsel %vm403_vm2, %v1301_v3, 0 }
 0xae2   : > { %2238 = vmatpush3.bf16.xpose.msra.mxu0 %v1196_v8 }
 0xae3   : > { %2249 = vmatprep.subr.bf16.mxu0 %v2579_v0 }
 0xae4   : > { %v1299_v10 = vpop.permute.xlu1 %1298  ;;  %v1409_v14 = vpop.permute.xlu0 %1408 }
 0xae8   : > { %v1411_v12 = vpop.permute.xlu1 %1410  ;;  %v1519_v17 = vpop.permute.xlu0 %1518 }
 0xae9   : > { %2240 = vmatmul.mubr.msk.bf16.vlgmr.msra.gmra.mxu0 %vm403_vm2, %v2937_v4  ;;  %v1416_v13 = vsel %vm403_vm2, %v1411_v12, 0 }
 0xaea   : > { %2250 = vmatpush3.bf16.xpose.msra.mxu0 %v1306_v11  ;;  %2251 = vmatprep.mubr.msk.bf16.mxu0 %vm2580_vm0, %v2579_v0 }
 0xaeb   : > { %2261 = vmatprep.subr.bf16.mxu0 %v2579_v0 }
 0xaec   : > { %v1521_v9 = vpop.permute.xlu1 %1520 }
 0xaed   : > { %v1526_v16 = vsel %vm403_vm2, %v1521_v9, 0 }
 0xaf1   : > { %2252 = vmatmul.mubr.msk.bf16.vlgmr.msra.gmra.mxu0 %vm403_vm2, %v1299_v10 }
 0xaf2   : > { %2262 = vmatpush3.bf16.xpose.msra.mxu0 %v1416_v13  ;;  %2263 = vmatprep.mubr.msk.bf16.mxu0 %vm2580_vm0, %v2579_v0 }
 0xaf3   : > { %2273 = vmatprep.subr.bf16.mxu0 %v2579_v0 }
 0xaf9   : > { %2264 = vmatmul.mubr.msk.bf16.vlgmr.msra.gmra.mxu0 %vm403_vm2, %v1409_v14 }
 0xafa   : > { %2274 = vmatpush3.bf16.xpose.msra.mxu0 %v1526_v16  ;;  %2275 = vmatprep.mubr.msk.bf16.mxu0 %vm2580_vm0, %v2579_v0 }
 0xafb   : > { %2285 = vmatprep.subr.bf16.mxu0 %v2579_v0 }
 0xb01   : > { %2276 = vmatmul.mubr.msk.bf16.vlgmr.msra.gmra.mxu0 %vm403_vm2, %v1519_v17 }
 0xb02   : > { %2289 = vmatprep.mubr.msk.bf16.mxu0 %vm2580_vm0, %v2579_v0 }
 0xba9   : > { %v1232_v19 = vpop.f32.mrf.mxu0 }
 0xbaa   : > { %v1238_v20 = vsel %vm403_vm2, %v1232_v19, -inf }
 0xbab   : > { %1239 = vmax.xlane.f32.xlu1 %v1238_v20  ;;  %v2241_v21 = vpop.f32.mrf.mxu0 }
 0xbad   : > { %v1235_v22 = vpop.f32.mrf.mxu0 }
 0xbaf   : > { %v2242_v23 = vpop.f32.mrf.mxu0 }
 0xbb1   : > { %v1342_v25 = vpop.f32.mrf.mxu0 }
 0xbb2   : > { %v1348_v26 = vsel %vm403_vm2, %v1342_v25, -inf }
 0xbb3   : > { %1349 = vmax.xlane.f32.xlu0 %v1348_v26  ;;  %v2253_v27 = vpop.f32.mrf.mxu0 }
 0xbb5   : > { %v1345_v28 = vpop.f32.mrf.mxu0 }
 0xbb7   : > { %v2254_v29 = vpop.f32.mrf.mxu0 }
 0xbb9   : > { %v1452_v30 = vpop.f32.mrf.mxu0 }
 0xbba   : > { %v1458_v31 = vsel %vm403_vm2, %v1452_v30, -inf }
 0xbbb   : > { %1459 = vmax.xlane.f32.xlu0 %v1458_v31  ;;  %v2265_v32 = vpop.f32.mrf.mxu0 }
 0xbbd   : > { %v1455_v34 = vpop.f32.mrf.mxu0 }
 0xbbf   : > { %v2266_v35 = vpop.f32.mrf.mxu0 }
 0xbc1   : > { %v1562_v36 = vpop.f32.mrf.mxu0 }
 0xbc2   : > { %v1568_v37 = vsel %vm403_vm2, %v1562_v36, -inf }
 0xbc3   : > { %1569 = vmax.xlane.f32.xlu1 %v1568_v37  ;;  %v2277_v38 = vpop.f32.mrf.mxu0 }
 0xbc5   : > { %v1565_v39 = vpop.f32.mrf.mxu0 }
 0xbc7   : > { %v2278_v40 = vpop.f32.mrf.mxu0 }
 0xbc8   : > { %v2403_v40 = vld [vmem:[%s3101_s3 + $0x8] sm:$0xff]  }
 0xbc9   : > { %2286 = vmatpush3.bf16.msra.mxu0 %v2403_v40 }
 0xbca   : > { %2287 = vmatprep.subr.bf16.mxu0 %v2579_v0 }
 0xc34   : > { %v1240_v41 = vpop.xlane.xlu1 %1239 }
 0xc35   : > { %v1241_v42 = vsub.f32 %v1232_v19, %v1240_v41  ;;  %v2404_v41 = vld [vmem:[%s3101_s3] sm:$0xff]  }
 0xc36   : > { %2288 = vmatpush3.bf16.msra.mxu0 %v2404_v41 }
 0xc37   : > { %v1242_v43 = vmul.f32 1.442695, %v1241_v42  ;;  %2301 = vmatprep.subr.bf16.mxu0 %v2579_v0 }
 0xc39   : > { %2431 = vpow2.f32 %v1242_v43 }
 0xc3c   : > { %v1350_v44 = vpop.xlane.xlu0 %1349 }
 0xc3d   : > { %v1351_v45 = vsub.f32 %v1342_v25, %v1350_v44 }
 0xc3f   : > { %v1352_v46 = vmul.f32 1.442695, %v1351_v45 }
 0xc41   : > { %2433 = vpow2.f32 %v1352_v46 }
 0xc44   : > { %v1460_v47 = vpop.xlane.xlu0 %1459 }
 0xc45   : > { %v1461_v48 = vsub.f32 %v1452_v30, %v1460_v47 }
 0xc46   : > { %v2432_v49 = vpop.eup %2431 }
 0xc47   : > { %v1462_v50 = vmul.f32 1.442695, %v1461_v48  ;;  %v1244_v51 = vsel %vm403_vm2, %v2432_v49, 0.0 }
 0xc48   : > { %1245 = vadd.xlane.f32.xlu0 %v1244_v51 }
 0xc49   : > { %2435 = vpow2.f32 %v1462_v50 }
 0xc4c   : > { %v1570_v62 = vpop.xlane.xlu1 %1569 }
 0xc4d   : > { %v1571_v63 = vsub.f32 %v1562_v36, %v1570_v62 }
 0xc4e   : > { %v2434_v53 = vpop.eup %2433 }
 0xc4f   : > { %v1354_v57 = vsel %vm403_vm2, %v2434_v53, 0.0  ;;  %v1572_v1 = vmul.f32 1.442695, %v1571_v63 }
 0xc50   : > { %1355 = vadd.xlane.f32.xlu1 %v1354_v57 }
 0xc51   : > { %2437 = vpow2.f32 %v1572_v1 }
 0xc56   : > { %v2436_v58 = vpop.eup %2435 }
 0xc57   : > { %v1464_v60 = vsel %vm403_vm2, %v2436_v58, 0.0 }
 0xc58   : > { %1465 = vadd.xlane.f32.xlu0 %v1464_v60 }
 0xc5e   : > { %v2438_v2 = vpop.eup %2437 }
 0xc5f   : > { %v1574_v6 = vsel %vm403_vm2, %v2438_v2, 0.0 }
 0xc61   : > { %1360 = vrot.lane.b32.xlu1 %v2937_v4, %s3121_s18 }
 0xc6e   : > { %1250 = vrot.lane.b32.xlu0 %v2937_v4, %s3122_s21  ;;  %s2595_s21 = smov [#allocation7]  }
 0xc72   : > { %1580 = vrot.lane.b32.xlu0 %v2937_v4, %s3123_s17  ;;  %s2509_s17 = sshll.u32 %s2595_s21, 4  ;;  %s2510_s17 = int_to_ptr.vmem [resolvable:$false] %s2509_s17 }
 0xc73   : > { %s2511_s9 = scalar_lea.vmem %s2510_s17, 256 }
 0xc85   : > { %1575 = vadd.xlane.f32.xlu1 %v1574_v6 }
 0xc96   : > { %1470 = vrot.lane.b32.xlu1 %v2937_v4, %s3124_s19 }
 0xcd1   : > { %v1246_v7 = vpop.xlane.xlu0 %1245 }
 0xcd2   : > { %2439 = vrcp.f32 %v1246_v7 }
 0xcd9   : > { %v1356_v5 = vpop.xlane.xlu1 %1355 }
 0xcda   : > { %2441 = vrcp.f32 %v1356_v5 }
 0xcdd   : > { %v1361_v13 = vpop.permute.xlu1 %1360 }
 0xcde   : > { %v1366_v16 = vsel %vm467_vm3, %v1361_v13, 0 }
 0xcdf   : > { %v2440_v8 = vpop.eup %2439 }
 0xce0   : > { %v1248_v10 = vmul.f32 %v2440_v8, %v2432_v49 }
 0xce1   : > { %v1466_v3 = vpop.xlane.xlu0 %1465 }
 0xce2   : > { %v1249_v9 = vpack.c.bf16 %v1248_v10, %v1248_v10  ;;  %2443 = vrcp.f32 %v1466_v3 }
 0xce5   : > { %v1251_v11 = vpop.permute.xlu0 %1250 }
 0xce6   : > { %v1256_v12 = vsel %vm467_vm3, %v1251_v11, 0 }
 0xce7   : > { %2244 = vmatpush3.bf16.msra.mxu1 %v1256_v12  ;;  %v2442_v14 = vpop.eup %2441 }
 0xce8   : > { %2255 = vmatprep.subr.bf16.mxu1 %v2579_v0  ;;  %v1358_v4 = vmul.f32 %v2442_v14, %v2434_v53  ;;  %v2406_v14 = vld [vmem:[#allocation2] sm:$0xff]  }
 0xce9   : > { %v1581_v25 = vpop.permute.xlu0 %1580 }
 0xcea   : > { %2246 = vmatmul.mubr.msk.bf16.vlgmr.msra.gmra.mxu1 %vm403_vm2, %v1249_v9  ;;  %v1359_v17 = vpack.c.bf16 %v1358_v4, %v1358_v4  ;;  %v1586_v27 = vsel %vm467_vm3, %v1581_v25, 0  ;;  %v2405_v9 = vld [vmem:[#allocation2 + $0x8] sm:$0xff]  }
 0xceb   : > { %2256 = vmatpush3.bf16.msra.mxu1 %v1366_v16  ;;  %2257 = vmatprep.mubr.msk.bf16.mxu1 %vm2580_vm0, %v2579_v0  ;;  %v2409_v25 = vld [vmem:[%s3104_s6 + $0x8] sm:$0xff]  }
 0xcec   : > { %2267 = vmatprep.subr.bf16.mxu1 %v2579_v0 }
 0xcef   : > { %v2444_v19 = vpop.eup %2443 }
 0xcf0   : > { %v1468_v21 = vmul.f32 %v2444_v19, %v2436_v58 }
 0xcf2   : > { %2258 = vmatmul.mubr.msk.bf16.vlgmr.msra.gmra.mxu1 %vm403_vm2, %v1359_v17  ;;  %v1469_v26 = vpack.c.bf16 %v1468_v21, %v1468_v21 }
 0xcf3   : > { %2269 = vmatprep.mubr.msk.bf16.mxu1 %vm2580_vm0, %v2579_v0 }
 0xd0e   : > { %v1576_v20 = vpop.xlane.xlu1 %1575 }
 0xd0f   : > { %2445 = vrcp.f32 %v1576_v20 }
 0xd12   : > { %v1471_v22 = vpop.permute.xlu1 %1470 }
 0xd13   : > { %v1476_v23 = vsel %vm467_vm3, %v1471_v22, 0 }
 0xd14   : > { %2268 = vmatpush3.bf16.msra.mxu1 %v1476_v23 }
 0xd15   : > { %2279 = vmatprep.subr.bf16.mxu1 %v2579_v0 }
 0xd17   : > { %2270 = vmatmul.mubr.msk.bf16.vlgmr.msra.gmra.mxu1 %vm403_vm2, %v1469_v26  ;;  %v2410_v26 = vld [vmem:[%s3104_s6] sm:$0xff]  }
 0xd18   : > { %2280 = vmatpush3.bf16.msra.mxu1 %v1586_v27  ;;  %2281 = vmatprep.mubr.msk.bf16.mxu1 %vm2580_vm0, %v2579_v0 }
 0xd19   : > { %2293 = vmatprep.subr.bf16.mxu1 %v2579_v0 }
 0xd1c   : > { %v2446_v28 = vpop.eup %2445 }
 0xd1d   : > { %v1578_v29 = vmul.f32 %v2446_v28, %v2438_v2 }
 0xd1f   : > { %v1579_v30 = vpack.c.bf16 %v1578_v29, %v1578_v29 }
 0xd21   : > { %2282 = vmatmul.mubr.msk.bf16.vlgmr.msra.gmra.mxu1 %vm403_vm2, %v1579_v30 }
 0xd22   : > { %2297 = vmatprep.mubr.msk.bf16.mxu1 %vm2580_vm0, %v2579_v0  ;;  %2294 = vmatpush3.bf16.msra.mxu1 %v2405_v9 }
 0xd23   : > { %2295 = vmatprep.subr.bf16.mxu1 %v2579_v0 }
 0xd26   : > { %2296 = vmatpush3.bf16.msra.mxu1 %v2406_v14 }
 0xdaa   : > { %v1292_v31 = vpop.f32.mrf.mxu1 }
 0xdac   : > { %v2247_v32 = vpop.f32.mrf.mxu1 }
 0xdae   : > { %v1295_v34 = vpop.f32.mrf.mxu1 }
 0xdb0   : > { %v2248_v35 = vpop.f32.mrf.mxu1 }
 0xdb2   : > { %v1402_v36 = vpop.f32.mrf.mxu1 }
 0xdb3   : > { %1629 = vrot.lane.b32.xlu1 %v1402_v36, %s2592_s12  ;;  %s3125_s12 = smov 24  }
 0xdb4   : > { %v2259_v37 = vpop.f32.mrf.mxu1 }
 0xdb6   : > { %v1405_v38 = vpop.f32.mrf.mxu1 }
 0xdb8   : > { %v2260_v39 = vpop.f32.mrf.mxu1 }
 0xdd7   : > { %v1512_v42 = vpop.f32.mrf.mxu1 }
 0xdd8   : > { %1633 = vrot.lane.b32.xlu0 %v1512_v42, %s2593_s24 }
 0xdd9   : > { %v2271_v43 = vpop.f32.mrf.mxu1 }
 0xddb   : > { %v1515_v44 = vpop.f32.mrf.mxu1 }
 0xddd   : > { %v2272_v45 = vpop.f32.mrf.mxu1 }
 0xde1   : > { %v1622_v46 = vpop.f32.mrf.mxu1 }
 0xde2   : > { %1637 = vrot.lane.b32.xlu1 %v1622_v46, %s3125_s12  ;;  %s1942_s12 = sshll.u32 %s324_s10, 4  ;;  %s1943_s12 = int_to_ptr.vmem [resolvable:$true] %s1942_s12 }
 0xde3   : > { %v2283_v47 = vpop.f32.mrf.mxu1  ;;  %s2505_s18 = scalar_lea.vmem %s1943_s12, 128  ;;  %p2512_p1 = scmp.lt.s32.totalorder %s1943_s12, %s2510_s17 }
 0xde4   : > { %p2506_p10 = scmp.ne.s32.totalorder %s1943_s12, %s2505_s18  ;;  %p2513_p3 = scmp.lt.s32.totalorder %s2511_s9, %s2505_s18 }
 0xde5   : > { %v1625_v48 = vpop.f32.mrf.mxu1 }
 0xde6   : > { %p2507_p12 = pnand %p2506_p10, %p2679_p5  ;;  %p2514_p2 = por %p2513_p3, %p2512_p1 }
 0xde7   : > { %v2284_v49 = vpop.f32.mrf.mxu1 }
 0xde8   : > { %p2508_p0 = pneg %p2507_p12 }
 0xdea   : > { %p2515_p4 = pnand %p2514_p2, %p2508_p0 }
 0xe25   : > { %v1630_v50 = vpop.permute.xlu1 %1629 }
 0xe26   : > { %v1640_v53 = vsel %vm403_vm2, %v1292_v31, %v1630_v50 }
 0xe4a   : > { %v1634_v51 = vpop.permute.xlu0 %1633 }
 0xe4b   : > { %v1641_v57 = vsel %vm854_vm4, %v1640_v53, %v1634_v51 }
 0xe54   : > { %v1638_v58 = vpop.permute.xlu1 %1637 }
 0xe55   : > { %v1642_v60 = vsel %vm856_vm5, %v1641_v57, %v1638_v58 }
 0xe56   : > { %v1643_v62 = vpack.c.bf16 %v1642_v60, %v1642_v60 }
 0xe58   : > { %2290 = vmatmul.mubr.msk.bf16.vlgmr.msra.gmra.mxu0 %vm355_vm1, %v1643_v62 }
 0xe59   : > { %2309 = vmatprep.mubr.msk.bf16.mxu0 %vm2580_vm0, %v2579_v0 }
 0xf18   : > { %v1702_v63 = vpop.f32.mrf.mxu0 }
 0xf19   : > { %v1703_v1 = vadd.f32 %v1702_v63, %v2861_v55  ;;  %v2407_v55 = vld [vmem:[%s3104_s6 + $0x18] sm:$0xff]  }
 0xf1a   : > { %v2291_v2 = vpop.f32.mrf.mxu0  ;;  %2302 = vmatpush3.bf16.msra.mxu0 %v2407_v55 }
 0xf1b   : > { %v1708_v6 = vadd.f32 %v1703_v1, %v2929_v61  ;;  %v2408_v61 = vld [vmem:[%s3104_s6 + $0x10] sm:$0xff]   ;;  %2303 = vmatprep.subr.bf16.mxu0 %v2579_v0 }
 0xf1c   : > { %v1705_v7 = vpop.f32.mrf.mxu0 }
 0xf1d   : > { %v1709_v5 = vsel %vm355_vm1, %v1708_v6, 0.0 }
 0xf1e   : > { %1710 = vadd.xlane.f32.xlu0 %v1709_v5  ;;  %v2292_v8 = vpop.f32.mrf.mxu0  ;;  %2304 = vmatpush3.bf16.msra.mxu0 %v2408_v61 }
 0xf1f   : > { %2305 = vmatprep.subr.bf16.mxu0 %v2579_v0 }
 0xf22   : > { %2306 = vmatpush3.bf16.msra.mxu0 %v2409_v25 }
 0xf23   : > { %2307 = vmatprep.subr.bf16.mxu0 %v2579_v0 }
 0xf26   : > { %2308 = vmatpush3.bf16.msra.mxu0 %v2410_v26 }
 0xfa7   : > { %v1711_v3 = vpop.xlane.xlu0 %1710 }
 0xfa8   : > { %v1712_v10 = vmul.f32 0.03125, %v1711_v3 }
 0xfaa   : > { %v1713_v11 = vsub.f32 %v1708_v6, %v1712_v10 }
 0xfac   : > { %v1714_v12 = vmul.f32 %v1713_v11, %v1713_v11 }
 0xfae   : > { %v1715_v13 = vsel %vm355_vm1, %v1714_v12, 0.0 }
 0xfaf   : > { %1716 = vadd.xlane.f32.xlu1 %v1715_v13 }
0x1038   : > { %v1717_v16 = vpop.xlane.xlu1 %1716 }
0x1039   : > { %v1718_v4 = vmul.f32 0.03125, %v1717_v16 }
0x103b   : > { %v1719_v17 = vadd.f32 1e-05, %v1718_v4 }
0x103d   : > { %2447 = vrsqrt.f32 %v1719_v17 }
0x104a   : > { %v2448_v19 = vpop.eup %2447 }
0x104b   : > { %v1721_v20 = vmul.f32 %v2448_v19, %v1713_v11 }
0x104d   : > { %v1726_v21 = vmul.f32 %v1721_v20, %v2880_v15 }
0x104f   : > { %v1731_v22 = vadd.f32 %v1726_v21, %v2883_v18 }
0x1051   : > { %v1732_v23 = vpack.c.bf16 %v1731_v22, %v1731_v22 }
0x1053   : > { %2298 = vmatmul.mubr.msk.bf16.vlgmr.msra.gmra.mxu1 %vm355_vm1, %v1732_v23 }
0x1113   : > { %v1793_v27 = vpop.f32.mrf.mxu1 }
0x1114   : > { %v1794_v15 = vadd.f32 %v2898_v24, %v1793_v27 }
0x1115   : > { %v2299_v28 = vpop.f32.mrf.mxu1 }
0x1116   : > { %v1799_v18 = vmax.f32 %v1794_v15, 0.0 }
0x1117   : > { %v1796_v29 = vpop.f32.mrf.mxu1 }
0x1118   : > { %v1800_v30 = vpack.c.bf16 %v1799_v18, %v1799_v18 }
0x1119   : > { %v2300_v31 = vpop.f32.mrf.mxu1 }
0x111a   : > { %2310 = vmatmul.mubr.msk.bf16.vlgmr.msra.gmra.mxu0 %vm1053_vm6, %v1800_v30 }
0x11da   : > { %v1874_v32 = vpop.f32.mrf.mxu0 }
0x11db   : > { %v1875_v34 = vadd.f32 %v1874_v32, %v2906_v33 }
0x11dc   : > { %v2311_v35 = vpop.f32.mrf.mxu0 }
0x11dd   : > { %v1880_v0 = vadd.f32 %v1875_v34, %v1731_v22 }
0x11de   : > { %v1877_v36 = vpop.f32.mrf.mxu0 }
0x11df   : > { %v1881_v37 = vsel %vm355_vm1, %v1880_v0, 0.0 }
0x11e0   : > { %1882 = vadd.xlane.f32.xlu0 %v1881_v37  ;;  %v2312_v38 = vpop.f32.mrf.mxu0 }
0x1269   : > { %v1883_v39 = vpop.xlane.xlu0 %1882 }
0x126a   : > { %v1884_v40 = vmul.f32 0.03125, %v1883_v39 }
0x126c   : > { %v1885_v24 = vsub.f32 %v1880_v0, %v1884_v40 }
0x126e   : > { %v1886_v41 = vmul.f32 %v1885_v24, %v1885_v24 }
0x1270   : > { %v1887_v42 = vsel %vm355_vm1, %v1886_v41, 0.0 }
0x1271   : > { %1888 = vadd.xlane.f32.xlu0 %v1887_v42 }
0x12fa   : > { %v1889_v43 = vpop.xlane.xlu0 %1888 }
0x12fb   : > { %v1890_v44 = vmul.f32 0.03125, %v1889_v43 }
0x12fd   : > { %v1891_v45 = vadd.f32 1e-05, %v1890_v44 }
0x12ff   : > { %2449 = vrsqrt.f32 %v1891_v45 }
0x130c   : > { %v2450_v46 = vpop.eup %2449 }
0x130d   : > { %v1893_v33 = vmul.f32 %v2450_v46, %v1885_v24 }
0x130f   : > { %v1898_v47 = vmul.f32 %v1893_v33, %v2922_v56  ;;  %v1919_v56 = vsub.s32 6, %v2852_v52 }
0x1311   : > { %v1903_v48 = vadd.f32 %v1898_v47, %v2925_v59  ;;  %v1924_v59 = vsub.s32 7, %v2852_v52  ;;  %v1920_v1 = vrot.slane %v2858_v54, %v1919_v56 }
0x1313   : > { %v1904_v49 = vsel %vm355_vm1, %v1903_v48, 0.0  ;;  %v1925_v7 = vrot.slane %v2858_v54, %v1924_v59 }
0x1314   : > { %1905 = vadd.xlane.f32.xlu1 %v1904_v49 }
0x139d   : > { %v1906_v50 = vpop.xlane.xlu1 %1905 }
0x139e   : > { %v1907_v51 = vmul.f32 0.03125, %v1906_v50 }
0x13a0   : > { %v1908_v53 = vsub.f32 %v1903_v48, %v1907_v51 }
0x13a2   : > { %v1909_v57 = vmul.f32 %v1908_v53, %v1908_v53 }
0x13a4   : > { %v1910_v58 = vsel %vm355_vm1, %v1909_v57, 0.0 }
0x13a5   : > { %1911 = vadd.xlane.f32.xlu0 %v1910_v58 }
0x142e   : > { %v1912_v60 = vpop.xlane.xlu0 %1911 }
0x142f   : > { %v1913_v62 = vmul.f32 0.03125, %v1912_v60 }
0x1431   : > { %v1914_v63 = vadd.f32 1e-05, %v1913_v62 }
0x1433   : > { %2451 = vrsqrt.f32 %v1914_v63 }
0x1440   : > { %v2452_v2 = vpop.eup %2451 }
0x1441   : > { %v1916_v6 = vmul.f32 %v2452_v2, %v1908_v53 }
0x1443   : > { %v1921_v5 = vmul.f32 %v1920_v1, %v1916_v6 }
0x1445   : > { %v1926_v8 = vadd.f32 %v1925_v7, %v1921_v5 }
0x1447   : > { %1927 = vst.msk [vmem:[%s324_s10] sm:$0xff] %vm355_vm1, %v1926_v8 }
0x1448   : > { %2518 = shalt.err (!%p2515_p4)
}
0x1449   : > { %s2519_s19 = scalar_lea.hbm %s1940_s25, 128  ;;  %s2523_s23 = scalar_lea.hbm %s3106_s8, 256 }
0x144a   : > { %p2520_p7 = scmp.ne.s32.totalorder %s1940_s25, %s2519_s19  ;;  %p2524_p9 = scmp.lt.s32.totalorder %s1940_s25, %s3106_s8 }
0x144b   : > { %p2525_p11 = scmp.lt.s32.totalorder %s2523_s23, %s2519_s19 }
0x144c   : > { %p2521_p13 = pnand %p2520_p7, %p2679_p5 }
0x144d   : > { %p2526_p10 = por %p2525_p11, %p2524_p9 }
0x144e   : > { %p2522_p8 = pneg %p2521_p13 }
0x1450   : > { %p2527_p12 = pnand %p2526_p10, %p2522_p8 }
0x1452   : > { %2530 = shalt.err (!%p2527_p12)
}
0x1453   : > { %2321 = dma.vmem_to_hbm [thread:$0]  (%p2679_p5), %s1943_s12, 128, %s1940_s25, %s1929_s26  }
0x1454 PF: > { %p2338_p0 = scmp.ge.s32.totalorder %s2573_s30, 2  ;;  %s1954_s13 = sand.u32 1, %s2561_s27  }
0x1455   : > { %s1955_s18 = scalar_lea.sflag [#allocation4], %s1954_s13 }
0x1456   : > { %p2331_p1 = pnand %p2338_p0, %p2683_p6 }
0x1458   : > { %p2332_p3 = pneg %p2331_p1 }
0x145a   : > { %2556 = dma.done.wait (%p2332_p3), %s1955_s18, 128  }
0x145b   : > { %2558 = vsyncadd (%p2332_p3), %s1955_s18, 4294967168  ;;  %p20_p2 = scmp.ge.s32.totalorder %s2666_s11, 4   ;;  %s3126_s27 = smov %s2565_s28 }
0x145c   : > { %s3127_s28 = smov %s2569_s29  ;;  %s3128_s29 = smov %s2677_s14 }
0x145d   : > { %s3129_s30 = smov %s2666_s11  ;;  %22 = sbr.rel (!%p20_p2) target bundleno = 5 (0x5), region = 96 }
0x1462   :  { %1960 = vsyncpa [#allocation3], 1 }
0x1463   :  { %1962 = vsyncpa [#allocation3 + $0x1], 1 }
0x1464   :  { %1963 = vsyncpa [#allocation6], 1 }
0x1465   :  { %1964 = vsyncpa [#allocation4], 1 }
0x1466   :  { %1966 = vsyncpa [#allocation4 + $0x1], 1 }

</bundles_post_ra>
